<compile_context>
chip_gen: v7x
topology: tpu7x:2x2x1
jax: 0.10.0
libtpu: 0.0.40
codegen_flags: <defaults>
</compile_context>

<pallas_src>
import jax
import jax.numpy as jnp
from jax.experimental import pallas as pl
from jax.experimental.pallas import tpu as pltpu

# ------------------------- hyper-parameters ---------------------------------
L_WIN = 8                      # encoder kernel size L
HOP = L_WIN // 2               # encoder stride L//2
N_ENC = 32                     # N : encoder channels
B_CH = 16                      # B : bottleneck channels
H_CH = 32                      # H : conv channels inside blocks
X_BLOCKS = 3                   # X : blocks per repeat (dilations 1,2,4)
P_KER = 3                      # P : depthwise kernel size
EPS = 1e-5

BATCH = 2
SIG_LEN = 68
T_FRAMES = (SIG_LEN - L_WIN) // HOP + 1      # = 16
S_OUT = (T_FRAMES - 1) * HOP + L_WIN         # = 68
GROUP = T_FRAMES + 1                         # 17 rows / batch item (16 frames + tail row)
SROWS = BATCH * GROUP                        # 34 rows per stream
assert SIG_LEN == GROUP * HOP and S_OUT == GROUP * HOP


# ------------------------- packed weight slab layout -------------------------
SLAB_COLS = max(N_ENC, H_CH)                 # 32


def _build_slab_layout():
    fields = [("alphas", 2 * X_BLOCKS), ("enc_w", L_WIN), ("ln_w", 1), ("ln_b", 1),
              ("proj_w", N_ENC), ("mask_w", B_CH), ("act_w", B_CH), ("dec_w", N_ENC)]
    for i in range(X_BLOCKS):
        fields += [(f"w1_{i}", B_CH), (f"ln1w_{i}", 1), (f"ln1b_{i}", 1),
                   (f"wd_{i}", P_KER), (f"ln2w_{i}", 1), (f"ln2b_{i}", 1),
                   (f"ws_{i}", H_CH)]
    offs, row = {}, 0
    for name, rows in fields:
        offs[name] = row
        row += (rows + 7) // 8 * 8           # keep every field 8-row aligned
    return offs, row


SLAB_OFF, SLAB_ROWS = _build_slab_layout()


# ------------------------- fused forward kernel -----------------------------
def fused_forward_kernel(slab_ref,           # (SLAB_ROWS, 32) packed weights
                         hops_t_ref,         # (SROWS, HOP) target hop rows
                         hops_i_ref,         # (SROWS, HOP) interferer hop rows
                         o_ref):             # (SROWS, HOP) overlap-added output
    f32 = jnp.float32

    def ld(name, rows, cols, row_off=0):     # static slab slice (zero-cost view)
        o = SLAB_OFF[name] + row_off
        return slab_ref[o:o + rows, :cols]

    # constant helpers (VPU iota / splats only, built once per call)
    ones_nn = jnp.ones((N_ENC, N_ENC), f32)                       # MXU row-reduction
    r2 = jax.lax.broadcasted_iota(jnp.int32, (SROWS, SROWS), 0)
    c2 = jax.lax.broadcasted_iota(jnp.int32, (SROWS, SROWS), 1)
    t2 = r2
    for b in range(1, BATCH):                                     # in-batch frame idx
        t2 = jnp.where(r2 >= b * GROUP, t2 - GROUP, t2)

    def down_shift(s):
        # out[r] = x[r - s] when r-s is in the same batch item and r is a
        # causally valid row (in-batch t >= s); 0 otherwise.
        return jnp.where((r2 - c2 == s) & (t2 >= s), 1.0, 0.0)

    up1 = jnp.where(c2 - r2 == 1, 1.0, 0.0)                       # out[r] = x[r + 1]

    def cln(x, gamma, beta):
        # channel-wise LayerNorm; lane reductions run on the (idle) MXU.
        inv_c = 1.0 / x.shape[-1]
        mu = jnp.dot(x, ones_nn, preferred_element_type=f32) * inv_c
        msq = jnp.dot(x * x, ones_nn, preferred_element_type=f32) * inv_c
        var = jnp.maximum(msq - mu * mu, 0.0)
        return (x - mu) * jax.lax.rsqrt(var + EPS) * gamma + beta

    # ---- encoder + cLN + 1x1 projection (per stream, frames built in-kernel)
    enc_lo = ld("enc_w", HOP, N_ENC, 0)          # taps 0..3 (current hop)
    enc_hi = ld("enc_w", HOP, N_ENC, HOP)        # taps 4..7 (next hop)
    ln_w = ld("ln_w", 1, N_ENC)
    ln_b = ld("ln_b", 1, N_ENC)
    proj_w = ld("proj_w", N_ENC, B_CH)

    def encode(h):                               # h: (SROWS, HOP) hop rows
        h_next = jnp.dot(up1, h, preferred_element_type=f32)      # hop r+1
        x = (jnp.dot(h, enc_lo, preferred_element_type=f32)
             + jnp.dot(h_next, enc_hi, preferred_element_type=f32))
        return jnp.dot(cln(x, ln_w, ln_b), proj_w, preferred_element_type=f32)

    y_t = encode(hops_t_ref[...])                # (SROWS, B)
    y_i = encode(hops_i_ref[...])                # (SROWS, B)

    # ---- dilated causal temporal conv blocks on the interferer stream ----
    for i in range(X_BLOCKS):
        d = 2 ** i
        a1 = ld("alphas", 1, H_CH, 2 * i)        # PReLU slopes, lane-replicated
        a2 = ld("alphas", 1, H_CH, 2 * i + 1)
        w1 = ld(f"w1_{i}", B_CH, H_CH)
        ln1w = ld(f"ln1w_{i}", 1, H_CH)
        ln1b = ld(f"ln1b_{i}", 1, H_CH)
        ln2w = ld(f"ln2w_{i}", 1, H_CH)
        ln2b = ld(f"ln2b_{i}", 1, H_CH)
        w_s = ld(f"ws_{i}", H_CH, B_CH)

        y = jnp.dot(y_i, w1, preferred_element_type=f32)          # (SROWS, H)
        y = jnp.where(y >= 0, y, a1 * y)                          # PReLU
        y = cln(y, ln1w, ln1b)

        # causal dilated depthwise conv: delayed taps via MXU shift matrices
        acc = y * ld(f"wd_{i}", 1, H_CH, P_KER - 1)               # zero-lag tap
        for k in range(P_KER - 1):
            s = (P_KER - 1 - k) * d
            tap = jnp.dot(down_shift(s), y, preferred_element_type=f32)
            acc = acc + tap * ld(f"wd_{i}", 1, H_CH, k)

        acc = jnp.where(acc >= 0, acc, a2 * acc)                  # PReLU
        acc = cln(acc, ln2w, ln2b)
        y_i = y_i + jnp.dot(acc, w_s, preferred_element_type=f32)  # residual

    # ---- mask / inverted mask / activation ----
    m = jax.nn.sigmoid(jnp.dot(y_i, ld("mask_w", B_CH, B_CH),
                               preferred_element_type=f32))
    y2 = jax.nn.sigmoid(jnp.dot(y_t * (1.0 - m), ld("act_w", B_CH, N_ENC),
                                preferred_element_type=f32))      # (SROWS, N)

    # ---- transposed-conv decoder: overlap-add, single store ----
    dec = jnp.dot(y2, ld("dec_w", N_ENC, L_WIN), preferred_element_type=f32)
    head = dec[:, :HOP]
    tail = dec[:, HOP:]
    tail_prev = jnp.dot(down_shift(1), tail, preferred_element_type=f32)
    ro = jax.lax.broadcasted_iota(jnp.int32, (SROWS, HOP), 0)
    to = ro
    for b in range(1, BATCH):
        to = jnp.where(ro >= b * GROUP, to - GROUP, to)
    o_ref[...] = jnp.where(to < T_FRAMES, head, 0.0) + tail_prev


# ------------------------- weight packing (runs once) ------------------------
def pack_params(params):
    blocks = params["blocks"]
    for i, blk in enumerate(blocks):             # kernel assumes dilation 2**i
        assert blk["dilation"] == 2 ** i

    slab = jnp.zeros((SLAB_ROWS, SLAB_COLS), jnp.float32)

    def put(s, name, arr):
        arr = jnp.asarray(arr, jnp.float32)
        if arr.ndim == 1:
            arr = arr[None, :]
        r, c = arr.shape
        return s.at[SLAB_OFF[name]:SLAB_OFF[name] + r, :c].set(arr)

    alphas = jnp.stack([v for blk in blocks for v in (blk["a1"], blk["a2"])])
    slab = put(slab, "alphas", jnp.tile(alphas[:, None], (1, SLAB_COLS)))
    slab = put(slab, "enc_w", jnp.transpose(params["enc_w"][:, 0, :]))   # (L, N)
    slab = put(slab, "ln_w", params["ln_w"])
    slab = put(slab, "ln_b", params["ln_b"])
    slab = put(slab, "proj_w", jnp.transpose(params["proj_w"]))          # (N, B)
    slab = put(slab, "mask_w", jnp.transpose(params["mask_w"]))          # (B, B)
    slab = put(slab, "act_w", jnp.transpose(params["act_w"]))            # (B, N)
    slab = put(slab, "dec_w", params["dec_w"])                           # (N, L)
    for i, b in enumerate(blocks):
        slab = put(slab, f"w1_{i}", jnp.transpose(b["w1"]))              # (B, H)
        slab = put(slab, f"ln1w_{i}", b["ln1_w"])
        slab = put(slab, f"ln1b_{i}", b["ln1_b"])
        slab = put(slab, f"wd_{i}", jnp.transpose(b["wd"]))              # (P, H)
        slab = put(slab, f"ln2w_{i}", b["ln2_w"])
        slab = put(slab, f"ln2b_{i}", b["ln2_b"])
        slab = put(slab, f"ws_{i}", jnp.transpose(b["ws"]))              # (H, B)
    return {"slab": slab}


# ------------------------- forward wrapper -----------------------------------
@jax.jit
def convtasnet_forward(target, interferer, kp):
    # Free (contiguous) reshape: signal -> hop rows, row b*(T+1)+j = x[b, 4j:4j+4]
    hops_t = target.reshape(SROWS, HOP)
    hops_i = interferer.reshape(SROWS, HOP)

    def full(shape):
        return pl.BlockSpec(shape, lambda i: (0,) * len(shape))

    segs = pl.pallas_call(
        fused_forward_kernel,
        out_shape=jax.ShapeDtypeStruct((SROWS, HOP), jnp.float32),
        grid=(1,),
        in_specs=[full((SLAB_ROWS, SLAB_COLS)),      # packed weights (1 DMA)
                  full((SROWS, HOP)),                # target hop rows
                  full((SROWS, HOP))],               # interferer hop rows
        out_specs=full((SROWS, HOP)),
        compiler_params=pltpu.CompilerParams(
            dimension_semantics=("arbitrary",)),
    )(kp["slab"], hops_t, hops_i)
    return segs.reshape(BATCH, S_OUT)


# ------------------------- pure-JAX reference --------------------------------
def reference_forward(target, interferer, params):
    def conv1x1(x_nct, w_oi):
        return jnp.einsum("oc,bct->bot", w_oi, x_nct)

    def cln(x_nct, w, b):
        xt = jnp.swapaxes(x_nct, 1, 2)
        mu = xt.mean(-1, keepdims=True)
        var = ((xt - mu) ** 2).mean(-1, keepdims=True)
        y = (xt - mu) / jnp.sqrt(var + EPS) * w + b
        return jnp.swapaxes(y, 1, 2)

    def prelu(x, a):
        return jnp.where(x >= 0, x, a * x)

    def encode(sig):
        return jax.lax.conv_general_dilated(
            sig[:, None, :], params["enc_w"], window_strides=(HOP,),
            padding="VALID", dimension_numbers=("NCH", "OIH", "NCH"))

    w_t, w_i = encode(target), encode(interferer)
    y_t = conv1x1(cln(w_t, params["ln_w"], params["ln_b"]), params["proj_w"])
    y_i = conv1x1(cln(w_i, params["ln_w"], params["ln_b"]), params["proj_w"])

    for blk in params["blocks"]:
        d = blk["dilation"]
        pad = (P_KER - 1) * d
        y = conv1x1(y_i, blk["w1"])
        y = cln(prelu(y, blk["a1"]), blk["ln1_w"], blk["ln1_b"])
        y = jax.lax.conv_general_dilated(
            y, blk["wd"][:, None, :], window_strides=(1,),
            padding=[(pad, pad)], rhs_dilation=(d,),
            feature_group_count=H_CH,
            dimension_numbers=("NCH", "OIH", "NCH"))
        y = y[:, :, :-pad]                                 # causal slice
        y = cln(prelu(y, blk["a2"]), blk["ln2_w"], blk["ln2_b"])
        y_i = y_i + conv1x1(y, blk["ws"])

    m = jax.nn.sigmoid(conv1x1(y_i, params["mask_w"]))
    masked = y_t * (1.0 - m)
    y2 = jax.nn.sigmoid(conv1x1(masked, params["act_w"]))  # (B, N_ENC, T)
    frames = jnp.einsum("bct,cl->btl", y2, params["dec_w"])
    out = jnp.zeros((BATCH, S_OUT), jnp.float32)
    for t in range(T_FRAMES):
        out = out.at[:, t * HOP:t * HOP + L_WIN].add(frames[:, t, :])
    return out


# ------------------------- deterministic params ------------------------------
def init_params(key):
    ki = iter(jax.random.split(key, 64))

    def nrm(shape, scale=0.2):
        return (scale * jax.random.normal(next(ki), shape)).astype(jnp.float32)

    params = {
        "enc_w": nrm((N_ENC, 1, L_WIN)),
        "ln_w": jnp.ones((N_ENC,), jnp.float32),
        "ln_b": jnp.zeros((N_ENC,), jnp.float32),
        "proj_w": nrm((B_CH, N_ENC)),
        "mask_w": nrm((B_CH, B_CH)),
        "act_w": nrm((N_ENC, B_CH)),
        "dec_w": nrm((N_ENC, L_WIN)),
        "blocks": [],
    }
    for b in range(X_BLOCKS):
        params["blocks"].append({
            "dilation": 2 ** b,
            "w1": nrm((H_CH, B_CH)),
            "a1": jnp.float32(0.25),                       # torch PReLU default
            "ln1_w": jnp.ones((H_CH,), jnp.float32),
            "ln1_b": jnp.zeros((H_CH,), jnp.float32),
            "wd": nrm((H_CH, P_KER)),
            "a2": jnp.float32(0.25),
            "ln2_w": jnp.ones((H_CH,), jnp.float32),
            "ln2_b": jnp.zeros((H_CH,), jnp.float32),
            "ws": nrm((B_CH, H_CH)),
        })
    return params


# ------------------------- main ----------------------------------------------
if __name__ == "__main__":
    key = jax.random.PRNGKey(0)
    k_param, k_tgt, k_int = jax.random.split(key, 3)
    params = init_params(k_param)
    kernel_params = pack_params(params)                    # pack weights once
    target = jax.random.normal(k_tgt, (BATCH, SIG_LEN), jnp.float32)
    interferer = jax.random.normal(k_int, (BATCH, SIG_LEN), jnp.float32)

    out = jax.block_until_ready(convtasnet_forward(target, interferer,
                                                   kernel_params))
    ref = jax.block_until_ready(reference_forward(target, interferer, params))
    assert out.shape == (BATCH, SIG_LEN) and ref.shape == out.shape
    max_err = float(jnp.max(jnp.abs(out - ref)))
    if max_err < 2e-2:
        print("KERNEL_OK")
    else:
        print(f"MISMATCH max_err={max_err}")
</pallas_src>

<mosaic_0001>
module attributes {stable_mosaic.version = 11 : i64} {
  func.func @fused_forward_kernel(%arg0: i32, %arg1: memref<392x32xf32, #tpu.memory_space<vmem>>, %arg2: memref<34x4xf32, #tpu.memory_space<vmem>>, %arg3: memref<34x4xf32, #tpu.memory_space<vmem>>, %arg4: memref<34x4xf32, #tpu.memory_space<vmem>>) attributes {dimension_semantics = [#tpu.dimension_semantics<arbitrary>], iteration_bounds = array<i64: 1>, scalar_prefetch = 0 : i64, scratch_operands = 0 : i64, tpu.core_type = #tpu.core_type<tc>, window_params = [{pipeline_mode = #tpu.pipeline_mode<synchronous>, transform_indices = @transform_0, window_bounds = array<i64: 392, 32>}, {pipeline_mode = #tpu.pipeline_mode<synchronous>, transform_indices = @transform_1, window_bounds = array<i64: 34, 4>}, {pipeline_mode = #tpu.pipeline_mode<synchronous>, transform_indices = @transform_2, window_bounds = array<i64: 34, 4>}, {pipeline_mode = #tpu.pipeline_mode<synchronous>, transform_indices = @transform_3, window_bounds = array<i64: 34, 4>}]} {
    %cst = arith.constant 1.000000e+00 : f32
    %0 = vector.broadcast %cst : f32 to vector<32x32xf32>
    %1 = tpu.iota {dimensions = array<i32: 0>} : vector<34x34xi32>
    %2 = tpu.iota {dimensions = array<i32: 1>} : vector<34x34xi32>
    %c17_i32 = arith.constant 17 : i32
    %3 = vector.broadcast %c17_i32 : i32 to vector<34x34xi32>
    %4 = arith.cmpi sge, %1, %3 : vector<34x34xi32>
    %c17_i32_0 = arith.constant 17 : i32
    %5 = vector.broadcast %c17_i32_0 : i32 to vector<34x34xi32>
    %6 = arith.subi %1, %5 : vector<34x34xi32>
    %7 = arith.select %4, %6, %1 : vector<34x34xi1>, vector<34x34xi32>
    %8 = arith.subi %2, %1 : vector<34x34xi32>
    %c1_i32 = arith.constant 1 : i32
    %9 = vector.broadcast %c1_i32 : i32 to vector<34x34xi32>
    %10 = arith.cmpi eq, %8, %9 : vector<34x34xi32>
    %cst_1 = arith.constant 1.000000e+00 : f32
    %cst_2 = arith.constant 0.000000e+00 : f32
    %11 = vector.broadcast %cst_1 : f32 to vector<34x34xf32>
    %12 = vector.broadcast %cst_2 : f32 to vector<34x34xf32>
    %13 = arith.select %10, %11, %12 : vector<34x34xi1>, vector<34x34xf32>
    %c8 = arith.constant 8 : index
    %c0 = arith.constant 0 : index
    %14 = vector.load %arg1[%c8, %c0] : memref<392x32xf32, #tpu.memory_space<vmem>>, vector<4x32xf32>
    %c12 = arith.constant 12 : index
    %c0_3 = arith.constant 0 : index
    %15 = vector.load %arg1[%c12, %c0_3] : memref<392x32xf32, #tpu.memory_space<vmem>>, vector<4x32xf32>
    %c16 = arith.constant 16 : index
    %c0_4 = arith.constant 0 : index
    %16 = vector.load %arg1[%c16, %c0_4] : memref<392x32xf32, #tpu.memory_space<vmem>>, vector<1x32xf32>
    %c24 = arith.constant 24 : index
    %c0_5 = arith.constant 0 : index
    %17 = vector.load %arg1[%c24, %c0_5] : memref<392x32xf32, #tpu.memory_space<vmem>>, vector<1x32xf32>
    %c32 = arith.constant 32 : index
    %c0_6 = arith.constant 0 : index
    %18 = vector.load %arg1[%c32, %c0_6] : memref<392x32xf32, #tpu.memory_space<vmem>>, vector<32x16xf32>
    %c0_7 = arith.constant 0 : index
    %c0_8 = arith.constant 0 : index
    %19 = vector.load %arg2[%c0_7, %c0_8] : memref<34x4xf32, #tpu.memory_space<vmem>>, vector<34x4xf32>
    %cst_9 = arith.constant dense<0.000000e+00> : vector<34x4xf32>
    %20 = tpu.matmul %13, %19, %cst_9 {dimension_numbers = #tpu.dot_dimension_numbers<[1], [0], [0], [1], [0, 0, 1, 1], [], []>} : vector<34x34xf32>, vector<34x4xf32>, vector<34x4xf32> -> vector<34x4xf32>
    %cst_10 = arith.constant dense<0.000000e+00> : vector<34x32xf32>
    %21 = tpu.matmul %19, %14, %cst_10 {dimension_numbers = #tpu.dot_dimension_numbers<[1], [0], [0], [1], [0, 0, 1, 1], [], []>} : vector<34x4xf32>, vector<4x32xf32>, vector<34x32xf32> -> vector<34x32xf32>
    %cst_11 = arith.constant dense<0.000000e+00> : vector<34x32xf32>
    %22 = tpu.matmul %20, %15, %cst_11 {dimension_numbers = #tpu.dot_dimension_numbers<[1], [0], [0], [1], [0, 0, 1, 1], [], []>} : vector<34x4xf32>, vector<4x32xf32>, vector<34x32xf32> -> vector<34x32xf32>
    %23 = arith.addf %21, %22 : vector<34x32xf32>
    %cst_12 = arith.constant dense<0.000000e+00> : vector<34x32xf32>
    %24 = tpu.matmul %23, %0, %cst_12 {dimension_numbers = #tpu.dot_dimension_numbers<[1], [0], [0], [1], [0, 0, 1, 1], [], []>} : vector<34x32xf32>, vector<32x32xf32>, vector<34x32xf32> -> vector<34x32xf32>
    %cst_13 = arith.constant 3.125000e-02 : f32
    %25 = vector.broadcast %cst_13 : f32 to vector<34x32xf32>
    %26 = arith.mulf %24, %25 : vector<34x32xf32>
    %27 = arith.mulf %23, %23 : vector<34x32xf32>
    %cst_14 = arith.constant dense<0.000000e+00> : vector<34x32xf32>
    %28 = tpu.matmul %27, %0, %cst_14 {dimension_numbers = #tpu.dot_dimension_numbers<[1], [0], [0], [1], [0, 0, 1, 1], [], []>} : vector<34x32xf32>, vector<32x32xf32>, vector<34x32xf32> -> vector<34x32xf32>
    %cst_15 = arith.constant 3.125000e-02 : f32
    %29 = vector.broadcast %cst_15 : f32 to vector<34x32xf32>
    %30 = arith.mulf %28, %29 : vector<34x32xf32>
    %31 = arith.mulf %26, %26 : vector<34x32xf32>
    %32 = arith.subf %30, %31 : vector<34x32xf32>
    %cst_16 = arith.constant 0.000000e+00 : f32
    %33 = vector.broadcast %cst_16 : f32 to vector<34x32xf32>
    %34 = arith.maximumf %32, %33 : vector<34x32xf32>
    %35 = arith.subf %23, %26 : vector<34x32xf32>
    %cst_17 = arith.constant 9.99999974E-6 : f32
    %36 = vector.broadcast %cst_17 : f32 to vector<34x32xf32>
    %37 = arith.addf %34, %36 : vector<34x32xf32>
    %38 = math.rsqrt %37 : vector<34x32xf32>
    %39 = arith.mulf %35, %38 : vector<34x32xf32>
    %40 = vector.broadcast %16 : vector<1x32xf32> to vector<34x32xf32>
    %41 = arith.mulf %39, %40 : vector<34x32xf32>
    %42 = vector.broadcast %17 : vector<1x32xf32> to vector<34x32xf32>
    %43 = arith.addf %41, %42 : vector<34x32xf32>
    %cst_18 = arith.constant dense<0.000000e+00> : vector<34x16xf32>
    %44 = tpu.matmul %43, %18, %cst_18 {dimension_numbers = #tpu.dot_dimension_numbers<[1], [0], [0], [1], [0, 0, 1, 1], [], []>} : vector<34x32xf32>, vector<32x16xf32>, vector<34x16xf32> -> vector<34x16xf32>
    %c0_19 = arith.constant 0 : index
    %c0_20 = arith.constant 0 : index
    %45 = vector.load %arg3[%c0_19, %c0_20] : memref<34x4xf32, #tpu.memory_space<vmem>>, vector<34x4xf32>
    %cst_21 = arith.constant dense<0.000000e+00> : vector<34x4xf32>
    %46 = tpu.matmul %13, %45, %cst_21 {dimension_numbers = #tpu.dot_dimension_numbers<[1], [0], [0], [1], [0, 0, 1, 1], [], []>} : vector<34x34xf32>, vector<34x4xf32>, vector<34x4xf32> -> vector<34x4xf32>
    %cst_22 = arith.constant dense<0.000000e+00> : vector<34x32xf32>
    %47 = tpu.matmul %45, %14, %cst_22 {dimension_numbers = #tpu.dot_dimension_numbers<[1], [0], [0], [1], [0, 0, 1, 1], [], []>} : vector<34x4xf32>, vector<4x32xf32>, vector<34x32xf32> -> vector<34x32xf32>
    %cst_23 = arith.constant dense<0.000000e+00> : vector<34x32xf32>
    %48 = tpu.matmul %46, %15, %cst_23 {dimension_numbers = #tpu.dot_dimension_numbers<[1], [0], [0], [1], [0, 0, 1, 1], [], []>} : vector<34x4xf32>, vector<4x32xf32>, vector<34x32xf32> -> vector<34x32xf32>
    %49 = arith.addf %47, %48 : vector<34x32xf32>
    %cst_24 = arith.constant dense<0.000000e+00> : vector<34x32xf32>
    %50 = tpu.matmul %49, %0, %cst_24 {dimension_numbers = #tpu.dot_dimension_numbers<[1], [0], [0], [1], [0, 0, 1, 1], [], []>} : vector<34x32xf32>, vector<32x32xf32>, vector<34x32xf32> -> vector<34x32xf32>
    %cst_25 = arith.constant 3.125000e-02 : f32
    %51 = vector.broadcast %cst_25 : f32 to vector<34x32xf32>
    %52 = arith.mulf %50, %51 : vector<34x32xf32>
    %53 = arith.mulf %49, %49 : vector<34x32xf32>
    %cst_26 = arith.constant dense<0.000000e+00> : vector<34x32xf32>
    %54 = tpu.matmul %53, %0, %cst_26 {dimension_numbers = #tpu.dot_dimension_numbers<[1], [0], [0], [1], [0, 0, 1, 1], [], []>} : vector<34x32xf32>, vector<32x32xf32>, vector<34x32xf32> -> vector<34x32xf32>
    %cst_27 = arith.constant 3.125000e-02 : f32
    %55 = vector.broadcast %cst_27 : f32 to vector<34x32xf32>
    %56 = arith.mulf %54, %55 : vector<34x32xf32>
    %57 = arith.mulf %52, %52 : vector<34x32xf32>
    %58 = arith.subf %56, %57 : vector<34x32xf32>
    %cst_28 = arith.constant 0.000000e+00 : f32
    %59 = vector.broadcast %cst_28 : f32 to vector<34x32xf32>
    %60 = arith.maximumf %58, %59 : vector<34x32xf32>
    %61 = arith.subf %49, %52 : vector<34x32xf32>
    %cst_29 = arith.constant 9.99999974E-6 : f32
    %62 = vector.broadcast %cst_29 : f32 to vector<34x32xf32>
    %63 = arith.addf %60, %62 : vector<34x32xf32>
    %64 = math.rsqrt %63 : vector<34x32xf32>
    %65 = arith.mulf %61, %64 : vector<34x32xf32>
    %66 = vector.broadcast %16 : vector<1x32xf32> to vector<34x32xf32>
    %67 = arith.mulf %65, %66 : vector<34x32xf32>
    %68 = vector.broadcast %17 : vector<1x32xf32> to vector<34x32xf32>
    %69 = arith.addf %67, %68 : vector<34x32xf32>
    %cst_30 = arith.constant dense<0.000000e+00> : vector<34x16xf32>
    %70 = tpu.matmul %69, %18, %cst_30 {dimension_numbers = #tpu.dot_dimension_numbers<[1], [0], [0], [1], [0, 0, 1, 1], [], []>} : vector<34x32xf32>, vector<32x16xf32>, vector<34x16xf32> -> vector<34x16xf32>
    %c0_31 = arith.constant 0 : index
    %c0_32 = arith.constant 0 : index
    %71 = vector.load %arg1[%c0_31, %c0_32] : memref<392x32xf32, #tpu.memory_space<vmem>>, vector<1x32xf32>
    %c1 = arith.constant 1 : index
    %c0_33 = arith.constant 0 : index
    %72 = vector.load %arg1[%c1, %c0_33] : memref<392x32xf32, #tpu.memory_space<vmem>>, vector<1x32xf32>
    %c128 = arith.constant 128 : index
    %c0_34 = arith.constant 0 : index
    %73 = vector.load %arg1[%c128, %c0_34] : memref<392x32xf32, #tpu.memory_space<vmem>>, vector<16x32xf32>
    %c144 = arith.constant 144 : index
    %c0_35 = arith.constant 0 : index
    %74 = vector.load %arg1[%c144, %c0_35] : memref<392x32xf32, #tpu.memory_space<vmem>>, vector<1x32xf32>
    %c152 = arith.constant 152 : index
    %c0_36 = arith.constant 0 : index
    %75 = vector.load %arg1[%c152, %c0_36] : memref<392x32xf32, #tpu.memory_space<vmem>>, vector<1x32xf32>
    %c168 = arith.constant 168 : index
    %c0_37 = arith.constant 0 : index
    %76 = vector.load %arg1[%c168, %c0_37] : memref<392x32xf32, #tpu.memory_space<vmem>>, vector<1x32xf32>
    %c176 = arith.constant 176 : index
    %c0_38 = arith.constant 0 : index
    %77 = vector.load %arg1[%c176, %c0_38] : memref<392x32xf32, #tpu.memory_space<vmem>>, vector<1x32xf32>
    %c184 = arith.constant 184 : index
    %c0_39 = arith.constant 0 : index
    %78 = vector.load %arg1[%c184, %c0_39] : memref<392x32xf32, #tpu.memory_space<vmem>>, vector<32x16xf32>
    %cst_40 = arith.constant dense<0.000000e+00> : vector<34x32xf32>
    %79 = tpu.matmul %70, %73, %cst_40 {dimension_numbers = #tpu.dot_dimension_numbers<[1], [0], [0], [1], [0, 0, 1, 1], [], []>} : vector<34x16xf32>, vector<16x32xf32>, vector<34x32xf32> -> vector<34x32xf32>
    %cst_41 = arith.constant 0.000000e+00 : f32
    %80 = vector.broadcast %cst_41 : f32 to vector<34x32xf32>
    %81 = arith.cmpf oge, %79, %80 : vector<34x32xf32>
    %82 = vector.broadcast %71 : vector<1x32xf32> to vector<34x32xf32>
    %83 = arith.mulf %82, %79 : vector<34x32xf32>
    %84 = arith.select %81, %79, %83 : vector<34x32xi1>, vector<34x32xf32>
    %cst_42 = arith.constant dense<0.000000e+00> : vector<34x32xf32>
    %85 = tpu.matmul %84, %0, %cst_42 {dimension_numbers = #tpu.dot_dimension_numbers<[1], [0], [0], [1], [0, 0, 1, 1], [], []>} : vector<34x32xf32>, vector<32x32xf32>, vector<34x32xf32> -> vector<34x32xf32>
    %cst_43 = arith.constant 3.125000e-02 : f32
    %86 = vector.broadcast %cst_43 : f32 to vector<34x32xf32>
    %87 = arith.mulf %85, %86 : vector<34x32xf32>
    %88 = arith.mulf %84, %84 : vector<34x32xf32>
    %cst_44 = arith.constant dense<0.000000e+00> : vector<34x32xf32>
    %89 = tpu.matmul %88, %0, %cst_44 {dimension_numbers = #tpu.dot_dimension_numbers<[1], [0], [0], [1], [0, 0, 1, 1], [], []>} : vector<34x32xf32>, vector<32x32xf32>, vector<34x32xf32> -> vector<34x32xf32>
    %cst_45 = arith.constant 3.125000e-02 : f32
    %90 = vector.broadcast %cst_45 : f32 to vector<34x32xf32>
    %91 = arith.mulf %89, %90 : vector<34x32xf32>
    %92 = arith.mulf %87, %87 : vector<34x32xf32>
    %93 = arith.subf %91, %92 : vector<34x32xf32>
    %cst_46 = arith.constant 0.000000e+00 : f32
    %94 = vector.broadcast %cst_46 : f32 to vector<34x32xf32>
    %95 = arith.maximumf %93, %94 : vector<34x32xf32>
    %96 = arith.subf %84, %87 : vector<34x32xf32>
    %cst_47 = arith.constant 9.99999974E-6 : f32
    %97 = vector.broadcast %cst_47 : f32 to vector<34x32xf32>
    %98 = arith.addf %95, %97 : vector<34x32xf32>
    %99 = math.rsqrt %98 : vector<34x32xf32>
    %100 = arith.mulf %96, %99 : vector<34x32xf32>
    %101 = vector.broadcast %74 : vector<1x32xf32> to vector<34x32xf32>
    %102 = arith.mulf %100, %101 : vector<34x32xf32>
    %103 = vector.broadcast %75 : vector<1x32xf32> to vector<34x32xf32>
    %104 = arith.addf %102, %103 : vector<34x32xf32>
    %c162 = arith.constant 162 : index
    %c0_48 = arith.constant 0 : index
    %105 = vector.load %arg1[%c162, %c0_48] : memref<392x32xf32, #tpu.memory_space<vmem>>, vector<1x32xf32>
    %106 = vector.broadcast %105 : vector<1x32xf32> to vector<34x32xf32>
    %107 = arith.mulf %104, %106 : vector<34x32xf32>
    %108 = arith.subi %1, %2 : vector<34x34xi32>
    %c2_i32 = arith.constant 2 : i32
    %109 = vector.broadcast %c2_i32 : i32 to vector<34x34xi32>
    %110 = arith.cmpi eq, %108, %109 : vector<34x34xi32>
    %c2_i32_49 = arith.constant 2 : i32
    %111 = vector.broadcast %c2_i32_49 : i32 to vector<34x34xi32>
    %112 = arith.cmpi sge, %7, %111 : vector<34x34xi32>
    %113 = arith.andi %110, %112 : vector<34x34xi1>
    %cst_50 = arith.constant 1.000000e+00 : f32
    %cst_51 = arith.constant 0.000000e+00 : f32
    %114 = vector.broadcast %cst_50 : f32 to vector<34x34xf32>
    %115 = vector.broadcast %cst_51 : f32 to vector<34x34xf32>
    %116 = arith.select %113, %114, %115 : vector<34x34xi1>, vector<34x34xf32>
    %cst_52 = arith.constant dense<0.000000e+00> : vector<34x32xf32>
    %117 = tpu.matmul %116, %104, %cst_52 {dimension_numbers = #tpu.dot_dimension_numbers<[1], [0], [0], [1], [0, 0, 1, 1], [], []>} : vector<34x34xf32>, vector<34x32xf32>, vector<34x32xf32> -> vector<34x32xf32>
    %c160 = arith.constant 160 : index
    %c0_53 = arith.constant 0 : index
    %118 = vector.load %arg1[%c160, %c0_53] : memref<392x32xf32, #tpu.memory_space<vmem>>, vector<1x32xf32>
    %119 = vector.broadcast %118 : vector<1x32xf32> to vector<34x32xf32>
    %120 = arith.mulf %117, %119 : vector<34x32xf32>
    %121 = arith.addf %107, %120 : vector<34x32xf32>
    %122 = arith.subi %1, %2 : vector<34x34xi32>
    %c1_i32_54 = arith.constant 1 : i32
    %123 = vector.broadcast %c1_i32_54 : i32 to vector<34x34xi32>
    %124 = arith.cmpi eq, %122, %123 : vector<34x34xi32>
    %c1_i32_55 = arith.constant 1 : i32
    %125 = vector.broadcast %c1_i32_55 : i32 to vector<34x34xi32>
    %126 = arith.cmpi sge, %7, %125 : vector<34x34xi32>
    %127 = arith.andi %124, %126 : vector<34x34xi1>
    %cst_56 = arith.constant 1.000000e+00 : f32
    %cst_57 = arith.constant 0.000000e+00 : f32
    %128 = vector.broadcast %cst_56 : f32 to vector<34x34xf32>
    %129 = vector.broadcast %cst_57 : f32 to vector<34x34xf32>
    %130 = arith.select %127, %128, %129 : vector<34x34xi1>, vector<34x34xf32>
    %cst_58 = arith.constant dense<0.000000e+00> : vector<34x32xf32>
    %131 = tpu.matmul %130, %104, %cst_58 {dimension_numbers = #tpu.dot_dimension_numbers<[1], [0], [0], [1], [0, 0, 1, 1], [], []>} : vector<34x34xf32>, vector<34x32xf32>, vector<34x32xf32> -> vector<34x32xf32>
    %c161 = arith.constant 161 : index
    %c0_59 = arith.constant 0 : index
    %132 = vector.load %arg1[%c161, %c0_59] : memref<392x32xf32, #tpu.memory_space<vmem>>, vector<1x32xf32>
    %133 = vector.broadcast %132 : vector<1x32xf32> to vector<34x32xf32>
    %134 = arith.mulf %131, %133 : vector<34x32xf32>
    %135 = arith.addf %121, %134 : vector<34x32xf32>
    %cst_60 = arith.constant 0.000000e+00 : f32
    %136 = vector.broadcast %cst_60 : f32 to vector<34x32xf32>
    %137 = arith.cmpf oge, %135, %136 : vector<34x32xf32>
    %138 = vector.broadcast %72 : vector<1x32xf32> to vector<34x32xf32>
    %139 = arith.mulf %138, %135 : vector<34x32xf32>
    %140 = arith.select %137, %135, %139 : vector<34x32xi1>, vector<34x32xf32>
    %cst_61 = arith.constant dense<0.000000e+00> : vector<34x32xf32>
    %141 = tpu.matmul %140, %0, %cst_61 {dimension_numbers = #tpu.dot_dimension_numbers<[1], [0], [0], [1], [0, 0, 1, 1], [], []>} : vector<34x32xf32>, vector<32x32xf32>, vector<34x32xf32> -> vector<34x32xf32>
    %cst_62 = arith.constant 3.125000e-02 : f32
    %142 = vector.broadcast %cst_62 : f32 to vector<34x32xf32>
    %143 = arith.mulf %141, %142 : vector<34x32xf32>
    %144 = arith.mulf %140, %140 : vector<34x32xf32>
    %cst_63 = arith.constant dense<0.000000e+00> : vector<34x32xf32>
    %145 = tpu.matmul %144, %0, %cst_63 {dimension_numbers = #tpu.dot_dimension_numbers<[1], [0], [0], [1], [0, 0, 1, 1], [], []>} : vector<34x32xf32>, vector<32x32xf32>, vector<34x32xf32> -> vector<34x32xf32>
    %cst_64 = arith.constant 3.125000e-02 : f32
    %146 = vector.broadcast %cst_64 : f32 to vector<34x32xf32>
    %147 = arith.mulf %145, %146 : vector<34x32xf32>
    %148 = arith.mulf %143, %143 : vector<34x32xf32>
    %149 = arith.subf %147, %148 : vector<34x32xf32>
    %cst_65 = arith.constant 0.000000e+00 : f32
    %150 = vector.broadcast %cst_65 : f32 to vector<34x32xf32>
    %151 = arith.maximumf %149, %150 : vector<34x32xf32>
    %152 = arith.subf %140, %143 : vector<34x32xf32>
    %cst_66 = arith.constant 9.99999974E-6 : f32
    %153 = vector.broadcast %cst_66 : f32 to vector<34x32xf32>
    %154 = arith.addf %151, %153 : vector<34x32xf32>
    %155 = math.rsqrt %154 : vector<34x32xf32>
    %156 = arith.mulf %152, %155 : vector<34x32xf32>
    %157 = vector.broadcast %76 : vector<1x32xf32> to vector<34x32xf32>
    %158 = arith.mulf %156, %157 : vector<34x32xf32>
    %159 = vector.broadcast %77 : vector<1x32xf32> to vector<34x32xf32>
    %160 = arith.addf %158, %159 : vector<34x32xf32>
    %cst_67 = arith.constant dense<0.000000e+00> : vector<34x16xf32>
    %161 = tpu.matmul %160, %78, %cst_67 {dimension_numbers = #tpu.dot_dimension_numbers<[1], [0], [0], [1], [0, 0, 1, 1], [], []>} : vector<34x32xf32>, vector<32x16xf32>, vector<34x16xf32> -> vector<34x16xf32>
    %162 = arith.addf %70, %161 : vector<34x16xf32>
    %c2 = arith.constant 2 : index
    %c0_68 = arith.constant 0 : index
    %163 = vector.load %arg1[%c2, %c0_68] : memref<392x32xf32, #tpu.memory_space<vmem>>, vector<1x32xf32>
    %c3 = arith.constant 3 : index
    %c0_69 = arith.constant 0 : index
    %164 = vector.load %arg1[%c3, %c0_69] : memref<392x32xf32, #tpu.memory_space<vmem>>, vector<1x32xf32>
    %c216 = arith.constant 216 : index
    %c0_70 = arith.constant 0 : index
    %165 = vector.load %arg1[%c216, %c0_70] : memref<392x32xf32, #tpu.memory_space<vmem>>, vector<16x32xf32>
    %c232 = arith.constant 232 : index
    %c0_71 = arith.constant 0 : index
    %166 = vector.load %arg1[%c232, %c0_71] : memref<392x32xf32, #tpu.memory_space<vmem>>, vector<1x32xf32>
    %c240 = arith.constant 240 : index
    %c0_72 = arith.constant 0 : index
    %167 = vector.load %arg1[%c240, %c0_72] : memref<392x32xf32, #tpu.memory_space<vmem>>, vector<1x32xf32>
    %c256 = arith.constant 256 : index
    %c0_73 = arith.constant 0 : index
    %168 = vector.load %arg1[%c256, %c0_73] : memref<392x32xf32, #tpu.memory_space<vmem>>, vector<1x32xf32>
    %c264 = arith.constant 264 : index
    %c0_74 = arith.constant 0 : index
    %169 = vector.load %arg1[%c264, %c0_74] : memref<392x32xf32, #tpu.memory_space<vmem>>, vector<1x32xf32>
    %c272 = arith.constant 272 : index
    %c0_75 = arith.constant 0 : index
    %170 = vector.load %arg1[%c272, %c0_75] : memref<392x32xf32, #tpu.memory_space<vmem>>, vector<32x16xf32>
    %cst_76 = arith.constant dense<0.000000e+00> : vector<34x32xf32>
    %171 = tpu.matmul %162, %165, %cst_76 {dimension_numbers = #tpu.dot_dimension_numbers<[1], [0], [0], [1], [0, 0, 1, 1], [], []>} : vector<34x16xf32>, vector<16x32xf32>, vector<34x32xf32> -> vector<34x32xf32>
    %cst_77 = arith.constant 0.000000e+00 : f32
    %172 = vector.broadcast %cst_77 : f32 to vector<34x32xf32>
    %173 = arith.cmpf oge, %171, %172 : vector<34x32xf32>
    %174 = vector.broadcast %163 : vector<1x32xf32> to vector<34x32xf32>
    %175 = arith.mulf %174, %171 : vector<34x32xf32>
    %176 = arith.select %173, %171, %175 : vector<34x32xi1>, vector<34x32xf32>
    %cst_78 = arith.constant dense<0.000000e+00> : vector<34x32xf32>
    %177 = tpu.matmul %176, %0, %cst_78 {dimension_numbers = #tpu.dot_dimension_numbers<[1], [0], [0], [1], [0, 0, 1, 1], [], []>} : vector<34x32xf32>, vector<32x32xf32>, vector<34x32xf32> -> vector<34x32xf32>
    %cst_79 = arith.constant 3.125000e-02 : f32
    %178 = vector.broadcast %cst_79 : f32 to vector<34x32xf32>
    %179 = arith.mulf %177, %178 : vector<34x32xf32>
    %180 = arith.mulf %176, %176 : vector<34x32xf32>
    %cst_80 = arith.constant dense<0.000000e+00> : vector<34x32xf32>
    %181 = tpu.matmul %180, %0, %cst_80 {dimension_numbers = #tpu.dot_dimension_numbers<[1], [0], [0], [1], [0, 0, 1, 1], [], []>} : vector<34x32xf32>, vector<32x32xf32>, vector<34x32xf32> -> vector<34x32xf32>
    %cst_81 = arith.constant 3.125000e-02 : f32
    %182 = vector.broadcast %cst_81 : f32 to vector<34x32xf32>
    %183 = arith.mulf %181, %182 : vector<34x32xf32>
    %184 = arith.mulf %179, %179 : vector<34x32xf32>
    %185 = arith.subf %183, %184 : vector<34x32xf32>
    %cst_82 = arith.constant 0.000000e+00 : f32
    %186 = vector.broadcast %cst_82 : f32 to vector<34x32xf32>
    %187 = arith.maximumf %185, %186 : vector<34x32xf32>
    %188 = arith.subf %176, %179 : vector<34x32xf32>
    %cst_83 = arith.constant 9.99999974E-6 : f32
    %189 = vector.broadcast %cst_83 : f32 to vector<34x32xf32>
    %190 = arith.addf %187, %189 : vector<34x32xf32>
    %191 = math.rsqrt %190 : vector<34x32xf32>
    %192 = arith.mulf %188, %191 : vector<34x32xf32>
    %193 = vector.broadcast %166 : vector<1x32xf32> to vector<34x32xf32>
    %194 = arith.mulf %192, %193 : vector<34x32xf32>
    %195 = vector.broadcast %167 : vector<1x32xf32> to vector<34x32xf32>
    %196 = arith.addf %194, %195 : vector<34x32xf32>
    %c250 = arith.constant 250 : index
    %c0_84 = arith.constant 0 : index
    %197 = vector.load %arg1[%c250, %c0_84] : memref<392x32xf32, #tpu.memory_space<vmem>>, vector<1x32xf32>
    %198 = vector.broadcast %197 : vector<1x32xf32> to vector<34x32xf32>
    %199 = arith.mulf %196, %198 : vector<34x32xf32>
    %200 = arith.subi %1, %2 : vector<34x34xi32>
    %c4_i32 = arith.constant 4 : i32
    %201 = vector.broadcast %c4_i32 : i32 to vector<34x34xi32>
    %202 = arith.cmpi eq, %200, %201 : vector<34x34xi32>
    %c4_i32_85 = arith.constant 4 : i32
    %203 = vector.broadcast %c4_i32_85 : i32 to vector<34x34xi32>
    %204 = arith.cmpi sge, %7, %203 : vector<34x34xi32>
    %205 = arith.andi %202, %204 : vector<34x34xi1>
    %cst_86 = arith.constant 1.000000e+00 : f32
    %cst_87 = arith.constant 0.000000e+00 : f32
    %206 = vector.broadcast %cst_86 : f32 to vector<34x34xf32>
    %207 = vector.broadcast %cst_87 : f32 to vector<34x34xf32>
    %208 = arith.select %205, %206, %207 : vector<34x34xi1>, vector<34x34xf32>
    %cst_88 = arith.constant dense<0.000000e+00> : vector<34x32xf32>
    %209 = tpu.matmul %208, %196, %cst_88 {dimension_numbers = #tpu.dot_dimension_numbers<[1], [0], [0], [1], [0, 0, 1, 1], [], []>} : vector<34x34xf32>, vector<34x32xf32>, vector<34x32xf32> -> vector<34x32xf32>
    %c248 = arith.constant 248 : index
    %c0_89 = arith.constant 0 : index
    %210 = vector.load %arg1[%c248, %c0_89] : memref<392x32xf32, #tpu.memory_space<vmem>>, vector<1x32xf32>
    %211 = vector.broadcast %210 : vector<1x32xf32> to vector<34x32xf32>
    %212 = arith.mulf %209, %211 : vector<34x32xf32>
    %213 = arith.addf %199, %212 : vector<34x32xf32>
    %214 = arith.subi %1, %2 : vector<34x34xi32>
    %c2_i32_90 = arith.constant 2 : i32
    %215 = vector.broadcast %c2_i32_90 : i32 to vector<34x34xi32>
    %216 = arith.cmpi eq, %214, %215 : vector<34x34xi32>
    %c2_i32_91 = arith.constant 2 : i32
    %217 = vector.broadcast %c2_i32_91 : i32 to vector<34x34xi32>
    %218 = arith.cmpi sge, %7, %217 : vector<34x34xi32>
    %219 = arith.andi %216, %218 : vector<34x34xi1>
    %cst_92 = arith.constant 1.000000e+00 : f32
    %cst_93 = arith.constant 0.000000e+00 : f32
    %220 = vector.broadcast %cst_92 : f32 to vector<34x34xf32>
    %221 = vector.broadcast %cst_93 : f32 to vector<34x34xf32>
    %222 = arith.select %219, %220, %221 : vector<34x34xi1>, vector<34x34xf32>
    %cst_94 = arith.constant dense<0.000000e+00> : vector<34x32xf32>
    %223 = tpu.matmul %222, %196, %cst_94 {dimension_numbers = #tpu.dot_dimension_numbers<[1], [0], [0], [1], [0, 0, 1, 1], [], []>} : vector<34x34xf32>, vector<34x32xf32>, vector<34x32xf32> -> vector<34x32xf32>
    %c249 = arith.constant 249 : index
    %c0_95 = arith.constant 0 : index
    %224 = vector.load %arg1[%c249, %c0_95] : memref<392x32xf32, #tpu.memory_space<vmem>>, vector<1x32xf32>
    %225 = vector.broadcast %224 : vector<1x32xf32> to vector<34x32xf32>
    %226 = arith.mulf %223, %225 : vector<34x32xf32>
    %227 = arith.addf %213, %226 : vector<34x32xf32>
    %cst_96 = arith.constant 0.000000e+00 : f32
    %228 = vector.broadcast %cst_96 : f32 to vector<34x32xf32>
    %229 = arith.cmpf oge, %227, %228 : vector<34x32xf32>
    %230 = vector.broadcast %164 : vector<1x32xf32> to vector<34x32xf32>
    %231 = arith.mulf %230, %227 : vector<34x32xf32>
    %232 = arith.select %229, %227, %231 : vector<34x32xi1>, vector<34x32xf32>
    %cst_97 = arith.constant dense<0.000000e+00> : vector<34x32xf32>
    %233 = tpu.matmul %232, %0, %cst_97 {dimension_numbers = #tpu.dot_dimension_numbers<[1], [0], [0], [1], [0, 0, 1, 1], [], []>} : vector<34x32xf32>, vector<32x32xf32>, vector<34x32xf32> -> vector<34x32xf32>
    %cst_98 = arith.constant 3.125000e-02 : f32
    %234 = vector.broadcast %cst_98 : f32 to vector<34x32xf32>
    %235 = arith.mulf %233, %234 : vector<34x32xf32>
    %236 = arith.mulf %232, %232 : vector<34x32xf32>
    %cst_99 = arith.constant dense<0.000000e+00> : vector<34x32xf32>
    %237 = tpu.matmul %236, %0, %cst_99 {dimension_numbers = #tpu.dot_dimension_numbers<[1], [0], [0], [1], [0, 0, 1, 1], [], []>} : vector<34x32xf32>, vector<32x32xf32>, vector<34x32xf32> -> vector<34x32xf32>
    %cst_100 = arith.constant 3.125000e-02 : f32
    %238 = vector.broadcast %cst_100 : f32 to vector<34x32xf32>
    %239 = arith.mulf %237, %238 : vector<34x32xf32>
    %240 = arith.mulf %235, %235 : vector<34x32xf32>
    %241 = arith.subf %239, %240 : vector<34x32xf32>
    %cst_101 = arith.constant 0.000000e+00 : f32
    %242 = vector.broadcast %cst_101 : f32 to vector<34x32xf32>
    %243 = arith.maximumf %241, %242 : vector<34x32xf32>
    %244 = arith.subf %232, %235 : vector<34x32xf32>
    %cst_102 = arith.constant 9.99999974E-6 : f32
    %245 = vector.broadcast %cst_102 : f32 to vector<34x32xf32>
    %246 = arith.addf %243, %245 : vector<34x32xf32>
    %247 = math.rsqrt %246 : vector<34x32xf32>
    %248 = arith.mulf %244, %247 : vector<34x32xf32>
    %249 = vector.broadcast %168 : vector<1x32xf32> to vector<34x32xf32>
    %250 = arith.mulf %248, %249 : vector<34x32xf32>
    %251 = vector.broadcast %169 : vector<1x32xf32> to vector<34x32xf32>
    %252 = arith.addf %250, %251 : vector<34x32xf32>
    %cst_103 = arith.constant dense<0.000000e+00> : vector<34x16xf32>
    %253 = tpu.matmul %252, %170, %cst_103 {dimension_numbers = #tpu.dot_dimension_numbers<[1], [0], [0], [1], [0, 0, 1, 1], [], []>} : vector<34x32xf32>, vector<32x16xf32>, vector<34x16xf32> -> vector<34x16xf32>
    %254 = arith.addf %162, %253 : vector<34x16xf32>
    %c4 = arith.constant 4 : index
    %c0_104 = arith.constant 0 : index
    %255 = vector.load %arg1[%c4, %c0_104] : memref<392x32xf32, #tpu.memory_space<vmem>>, vector<1x32xf32>
    %c5 = arith.constant 5 : index
    %c0_105 = arith.constant 0 : index
    %256 = vector.load %arg1[%c5, %c0_105] : memref<392x32xf32, #tpu.memory_space<vmem>>, vector<1x32xf32>
    %c304 = arith.constant 304 : index
    %c0_106 = arith.constant 0 : index
    %257 = vector.load %arg1[%c304, %c0_106] : memref<392x32xf32, #tpu.memory_space<vmem>>, vector<16x32xf32>
    %c320 = arith.constant 320 : index
    %c0_107 = arith.constant 0 : index
    %258 = vector.load %arg1[%c320, %c0_107] : memref<392x32xf32, #tpu.memory_space<vmem>>, vector<1x32xf32>
    %c328 = arith.constant 328 : index
    %c0_108 = arith.constant 0 : index
    %259 = vector.load %arg1[%c328, %c0_108] : memref<392x32xf32, #tpu.memory_space<vmem>>, vector<1x32xf32>
    %c344 = arith.constant 344 : index
    %c0_109 = arith.constant 0 : index
    %260 = vector.load %arg1[%c344, %c0_109] : memref<392x32xf32, #tpu.memory_space<vmem>>, vector<1x32xf32>
    %c352 = arith.constant 352 : index
    %c0_110 = arith.constant 0 : index
    %261 = vector.load %arg1[%c352, %c0_110] : memref<392x32xf32, #tpu.memory_space<vmem>>, vector<1x32xf32>
    %c360 = arith.constant 360 : index
    %c0_111 = arith.constant 0 : index
    %262 = vector.load %arg1[%c360, %c0_111] : memref<392x32xf32, #tpu.memory_space<vmem>>, vector<32x16xf32>
    %cst_112 = arith.constant dense<0.000000e+00> : vector<34x32xf32>
    %263 = tpu.matmul %254, %257, %cst_112 {dimension_numbers = #tpu.dot_dimension_numbers<[1], [0], [0], [1], [0, 0, 1, 1], [], []>} : vector<34x16xf32>, vector<16x32xf32>, vector<34x32xf32> -> vector<34x32xf32>
    %cst_113 = arith.constant 0.000000e+00 : f32
    %264 = vector.broadcast %cst_113 : f32 to vector<34x32xf32>
    %265 = arith.cmpf oge, %263, %264 : vector<34x32xf32>
    %266 = vector.broadcast %255 : vector<1x32xf32> to vector<34x32xf32>
    %267 = arith.mulf %266, %263 : vector<34x32xf32>
    %268 = arith.select %265, %263, %267 : vector<34x32xi1>, vector<34x32xf32>
    %cst_114 = arith.constant dense<0.000000e+00> : vector<34x32xf32>
    %269 = tpu.matmul %268, %0, %cst_114 {dimension_numbers = #tpu.dot_dimension_numbers<[1], [0], [0], [1], [0, 0, 1, 1], [], []>} : vector<34x32xf32>, vector<32x32xf32>, vector<34x32xf32> -> vector<34x32xf32>
    %cst_115 = arith.constant 3.125000e-02 : f32
    %270 = vector.broadcast %cst_115 : f32 to vector<34x32xf32>
    %271 = arith.mulf %269, %270 : vector<34x32xf32>
    %272 = arith.mulf %268, %268 : vector<34x32xf32>
    %cst_116 = arith.constant dense<0.000000e+00> : vector<34x32xf32>
    %273 = tpu.matmul %272, %0, %cst_116 {dimension_numbers = #tpu.dot_dimension_numbers<[1], [0], [0], [1], [0, 0, 1, 1], [], []>} : vector<34x32xf32>, vector<32x32xf32>, vector<34x32xf32> -> vector<34x32xf32>
    %cst_117 = arith.constant 3.125000e-02 : f32
    %274 = vector.broadcast %cst_117 : f32 to vector<34x32xf32>
    %275 = arith.mulf %273, %274 : vector<34x32xf32>
    %276 = arith.mulf %271, %271 : vector<34x32xf32>
    %277 = arith.subf %275, %276 : vector<34x32xf32>
    %cst_118 = arith.constant 0.000000e+00 : f32
    %278 = vector.broadcast %cst_118 : f32 to vector<34x32xf32>
    %279 = arith.maximumf %277, %278 : vector<34x32xf32>
    %280 = arith.subf %268, %271 : vector<34x32xf32>
    %cst_119 = arith.constant 9.99999974E-6 : f32
    %281 = vector.broadcast %cst_119 : f32 to vector<34x32xf32>
    %282 = arith.addf %279, %281 : vector<34x32xf32>
    %283 = math.rsqrt %282 : vector<34x32xf32>
    %284 = arith.mulf %280, %283 : vector<34x32xf32>
    %285 = vector.broadcast %258 : vector<1x32xf32> to vector<34x32xf32>
    %286 = arith.mulf %284, %285 : vector<34x32xf32>
    %287 = vector.broadcast %259 : vector<1x32xf32> to vector<34x32xf32>
    %288 = arith.addf %286, %287 : vector<34x32xf32>
    %c338 = arith.constant 338 : index
    %c0_120 = arith.constant 0 : index
    %289 = vector.load %arg1[%c338, %c0_120] : memref<392x32xf32, #tpu.memory_space<vmem>>, vector<1x32xf32>
    %290 = vector.broadcast %289 : vector<1x32xf32> to vector<34x32xf32>
    %291 = arith.mulf %288, %290 : vector<34x32xf32>
    %292 = arith.subi %1, %2 : vector<34x34xi32>
    %c8_i32 = arith.constant 8 : i32
    %293 = vector.broadcast %c8_i32 : i32 to vector<34x34xi32>
    %294 = arith.cmpi eq, %292, %293 : vector<34x34xi32>
    %c8_i32_121 = arith.constant 8 : i32
    %295 = vector.broadcast %c8_i32_121 : i32 to vector<34x34xi32>
    %296 = arith.cmpi sge, %7, %295 : vector<34x34xi32>
    %297 = arith.andi %294, %296 : vector<34x34xi1>
    %cst_122 = arith.constant 1.000000e+00 : f32
    %cst_123 = arith.constant 0.000000e+00 : f32
    %298 = vector.broadcast %cst_122 : f32 to vector<34x34xf32>
    %299 = vector.broadcast %cst_123 : f32 to vector<34x34xf32>
    %300 = arith.select %297, %298, %299 : vector<34x34xi1>, vector<34x34xf32>
    %cst_124 = arith.constant dense<0.000000e+00> : vector<34x32xf32>
    %301 = tpu.matmul %300, %288, %cst_124 {dimension_numbers = #tpu.dot_dimension_numbers<[1], [0], [0], [1], [0, 0, 1, 1], [], []>} : vector<34x34xf32>, vector<34x32xf32>, vector<34x32xf32> -> vector<34x32xf32>
    %c336 = arith.constant 336 : index
    %c0_125 = arith.constant 0 : index
    %302 = vector.load %arg1[%c336, %c0_125] : memref<392x32xf32, #tpu.memory_space<vmem>>, vector<1x32xf32>
    %303 = vector.broadcast %302 : vector<1x32xf32> to vector<34x32xf32>
    %304 = arith.mulf %301, %303 : vector<34x32xf32>
    %305 = arith.addf %291, %304 : vector<34x32xf32>
    %306 = arith.subi %1, %2 : vector<34x34xi32>
    %c4_i32_126 = arith.constant 4 : i32
    %307 = vector.broadcast %c4_i32_126 : i32 to vector<34x34xi32>
    %308 = arith.cmpi eq, %306, %307 : vector<34x34xi32>
    %c4_i32_127 = arith.constant 4 : i32
    %309 = vector.broadcast %c4_i32_127 : i32 to vector<34x34xi32>
    %310 = arith.cmpi sge, %7, %309 : vector<34x34xi32>
    %311 = arith.andi %308, %310 : vector<34x34xi1>
    %cst_128 = arith.constant 1.000000e+00 : f32
    %cst_129 = arith.constant 0.000000e+00 : f32
    %312 = vector.broadcast %cst_128 : f32 to vector<34x34xf32>
    %313 = vector.broadcast %cst_129 : f32 to vector<34x34xf32>
    %314 = arith.select %311, %312, %313 : vector<34x34xi1>, vector<34x34xf32>
    %cst_130 = arith.constant dense<0.000000e+00> : vector<34x32xf32>
    %315 = tpu.matmul %314, %288, %cst_130 {dimension_numbers = #tpu.dot_dimension_numbers<[1], [0], [0], [1], [0, 0, 1, 1], [], []>} : vector<34x34xf32>, vector<34x32xf32>, vector<34x32xf32> -> vector<34x32xf32>
    %c337 = arith.constant 337 : index
    %c0_131 = arith.constant 0 : index
    %316 = vector.load %arg1[%c337, %c0_131] : memref<392x32xf32, #tpu.memory_space<vmem>>, vector<1x32xf32>
    %317 = vector.broadcast %316 : vector<1x32xf32> to vector<34x32xf32>
    %318 = arith.mulf %315, %317 : vector<34x32xf32>
    %319 = arith.addf %305, %318 : vector<34x32xf32>
    %cst_132 = arith.constant 0.000000e+00 : f32
    %320 = vector.broadcast %cst_132 : f32 to vector<34x32xf32>
    %321 = arith.cmpf oge, %319, %320 : vector<34x32xf32>
    %322 = vector.broadcast %256 : vector<1x32xf32> to vector<34x32xf32>
    %323 = arith.mulf %322, %319 : vector<34x32xf32>
    %324 = arith.select %321, %319, %323 : vector<34x32xi1>, vector<34x32xf32>
    %cst_133 = arith.constant dense<0.000000e+00> : vector<34x32xf32>
    %325 = tpu.matmul %324, %0, %cst_133 {dimension_numbers = #tpu.dot_dimension_numbers<[1], [0], [0], [1], [0, 0, 1, 1], [], []>} : vector<34x32xf32>, vector<32x32xf32>, vector<34x32xf32> -> vector<34x32xf32>
    %cst_134 = arith.constant 3.125000e-02 : f32
    %326 = vector.broadcast %cst_134 : f32 to vector<34x32xf32>
    %327 = arith.mulf %325, %326 : vector<34x32xf32>
    %328 = arith.mulf %324, %324 : vector<34x32xf32>
    %cst_135 = arith.constant dense<0.000000e+00> : vector<34x32xf32>
    %329 = tpu.matmul %328, %0, %cst_135 {dimension_numbers = #tpu.dot_dimension_numbers<[1], [0], [0], [1], [0, 0, 1, 1], [], []>} : vector<34x32xf32>, vector<32x32xf32>, vector<34x32xf32> -> vector<34x32xf32>
    %cst_136 = arith.constant 3.125000e-02 : f32
    %330 = vector.broadcast %cst_136 : f32 to vector<34x32xf32>
    %331 = arith.mulf %329, %330 : vector<34x32xf32>
    %332 = arith.mulf %327, %327 : vector<34x32xf32>
    %333 = arith.subf %331, %332 : vector<34x32xf32>
    %cst_137 = arith.constant 0.000000e+00 : f32
    %334 = vector.broadcast %cst_137 : f32 to vector<34x32xf32>
    %335 = arith.maximumf %333, %334 : vector<34x32xf32>
    %336 = arith.subf %324, %327 : vector<34x32xf32>
    %cst_138 = arith.constant 9.99999974E-6 : f32
    %337 = vector.broadcast %cst_138 : f32 to vector<34x32xf32>
    %338 = arith.addf %335, %337 : vector<34x32xf32>
    %339 = math.rsqrt %338 : vector<34x32xf32>
    %340 = arith.mulf %336, %339 : vector<34x32xf32>
    %341 = vector.broadcast %260 : vector<1x32xf32> to vector<34x32xf32>
    %342 = arith.mulf %340, %341 : vector<34x32xf32>
    %343 = vector.broadcast %261 : vector<1x32xf32> to vector<34x32xf32>
    %344 = arith.addf %342, %343 : vector<34x32xf32>
    %cst_139 = arith.constant dense<0.000000e+00> : vector<34x16xf32>
    %345 = tpu.matmul %344, %262, %cst_139 {dimension_numbers = #tpu.dot_dimension_numbers<[1], [0], [0], [1], [0, 0, 1, 1], [], []>} : vector<34x32xf32>, vector<32x16xf32>, vector<34x16xf32> -> vector<34x16xf32>
    %346 = arith.addf %254, %345 : vector<34x16xf32>
    %c64 = arith.constant 64 : index
    %c0_140 = arith.constant 0 : index
    %347 = vector.load %arg1[%c64, %c0_140] : memref<392x32xf32, #tpu.memory_space<vmem>>, vector<16x16xf32>
    %cst_141 = arith.constant dense<0.000000e+00> : vector<34x16xf32>
    %348 = tpu.matmul %346, %347, %cst_141 {dimension_numbers = #tpu.dot_dimension_numbers<[1], [0], [0], [1], [0, 0, 1, 1], [], []>} : vector<34x16xf32>, vector<16x16xf32>, vector<34x16xf32> -> vector<34x16xf32>
    %349 = arith.negf %348 : vector<34x16xf32>
    %350 = math.exp %349 : vector<34x16xf32>
    %cst_142 = arith.constant 1.000000e+00 : f32
    %351 = vector.broadcast %cst_142 : f32 to vector<34x16xf32>
    %352 = arith.addf %351, %350 : vector<34x16xf32>
    %353 = arith.divf %351, %352 : vector<34x16xf32>
    %cst_143 = arith.constant 1.000000e+00 : f32
    %354 = vector.broadcast %cst_143 : f32 to vector<34x16xf32>
    %355 = arith.subf %354, %353 : vector<34x16xf32>
    %356 = arith.mulf %44, %355 : vector<34x16xf32>
    %c80 = arith.constant 80 : index
    %c0_144 = arith.constant 0 : index
    %357 = vector.load %arg1[%c80, %c0_144] : memref<392x32xf32, #tpu.memory_space<vmem>>, vector<16x32xf32>
    %cst_145 = arith.constant dense<0.000000e+00> : vector<34x32xf32>
    %358 = tpu.matmul %356, %357, %cst_145 {dimension_numbers = #tpu.dot_dimension_numbers<[1], [0], [0], [1], [0, 0, 1, 1], [], []>} : vector<34x16xf32>, vector<16x32xf32>, vector<34x32xf32> -> vector<34x32xf32>
    %359 = arith.negf %358 : vector<34x32xf32>
    %360 = math.exp %359 : vector<34x32xf32>
    %cst_146 = arith.constant 1.000000e+00 : f32
    %361 = vector.broadcast %cst_146 : f32 to vector<34x32xf32>
    %362 = arith.addf %361, %360 : vector<34x32xf32>
    %363 = arith.divf %361, %362 : vector<34x32xf32>
    %c96 = arith.constant 96 : index
    %c0_147 = arith.constant 0 : index
    %364 = vector.load %arg1[%c96, %c0_147] : memref<392x32xf32, #tpu.memory_space<vmem>>, vector<32x8xf32>
    %cst_148 = arith.constant dense<0.000000e+00> : vector<34x8xf32>
    %365 = tpu.matmul %363, %364, %cst_148 {dimension_numbers = #tpu.dot_dimension_numbers<[1], [0], [0], [1], [0, 0, 1, 1], [], []>} : vector<34x32xf32>, vector<32x8xf32>, vector<34x8xf32> -> vector<34x8xf32>
    %366 = vector.extract_strided_slice %365 {offsets = [0, 0], sizes = [34, 4], strides = [1, 1]} : vector<34x8xf32> to vector<34x4xf32>
    %367 = vector.extract_strided_slice %365 {offsets = [0, 4], sizes = [34, 4], strides = [1, 1]} : vector<34x8xf32> to vector<34x4xf32>
    %368 = arith.subi %1, %2 : vector<34x34xi32>
    %c1_i32_149 = arith.constant 1 : i32
    %369 = vector.broadcast %c1_i32_149 : i32 to vector<34x34xi32>
    %370 = arith.cmpi eq, %368, %369 : vector<34x34xi32>
    %c1_i32_150 = arith.constant 1 : i32
    %371 = vector.broadcast %c1_i32_150 : i32 to vector<34x34xi32>
    %372 = arith.cmpi sge, %7, %371 : vector<34x34xi32>
    %373 = arith.andi %370, %372 : vector<34x34xi1>
    %cst_151 = arith.constant 1.000000e+00 : f32
    %cst_152 = arith.constant 0.000000e+00 : f32
    %374 = vector.broadcast %cst_151 : f32 to vector<34x34xf32>
    %375 = vector.broadcast %cst_152 : f32 to vector<34x34xf32>
    %376 = arith.select %373, %374, %375 : vector<34x34xi1>, vector<34x34xf32>
    %cst_153 = arith.constant dense<0.000000e+00> : vector<34x4xf32>
    %377 = tpu.matmul %376, %367, %cst_153 {dimension_numbers = #tpu.dot_dimension_numbers<[1], [0], [0], [1], [0, 0, 1, 1], [], []>} : vector<34x34xf32>, vector<34x4xf32>, vector<34x4xf32> -> vector<34x4xf32>
    %378 = tpu.iota {dimensions = array<i32: 0>} : vector<34x4xi32>
    %c17_i32_154 = arith.constant 17 : i32
    %379 = vector.broadcast %c17_i32_154 : i32 to vector<34x4xi32>
    %380 = arith.cmpi sge, %378, %379 : vector<34x4xi32>
    %c17_i32_155 = arith.constant 17 : i32
    %381 = vector.broadcast %c17_i32_155 : i32 to vector<34x4xi32>
    %382 = arith.subi %378, %381 : vector<34x4xi32>
    %383 = arith.select %380, %382, %378 : vector<34x4xi1>, vector<34x4xi32>
    %c16_i32 = arith.constant 16 : i32
    %384 = vector.broadcast %c16_i32 : i32 to vector<34x4xi32>
    %385 = arith.cmpi slt, %383, %384 : vector<34x4xi32>
    %cst_156 = arith.constant 0.000000e+00 : f32
    %386 = vector.broadcast %cst_156 : f32 to vector<34x4xf32>
    %387 = arith.select %385, %366, %386 : vector<34x4xi1>, vector<34x4xf32>
    %388 = arith.addf %387, %377 : vector<34x4xf32>
    %c0_157 = arith.constant 0 : index
    %c0_158 = arith.constant 0 : index
    %389 = vector.load %arg4[%c0_157, %c0_158] : memref<34x4xf32, #tpu.memory_space<vmem>>, vector<34x4xf32>
    tpu.vector_store %arg4[%c0_157, %c0_158], %388 {strides = array<i32>} : memref<34x4xf32, #tpu.memory_space<vmem>>, vector<34x4xf32>,
    return
  }
  func.func @transform_0(%arg0: i32) -> (i32, i32) {
    %c0_i32 = arith.constant 0 : i32
    %c0_i32_0 = arith.constant 0 : i32
    %c0_i32_1 = arith.constant 0 : i32
    return %c0_i32, %c0_i32_0 : i32, i32
  }
  func.func @transform_1(%arg0: i32) -> (i32, i32) {
    %c0_i32 = arith.constant 0 : i32
    %c0_i32_0 = arith.constant 0 : i32
    %c0_i32_1 = arith.constant 0 : i32
    return %c0_i32, %c0_i32_0 : i32, i32
  }
  func.func @transform_2(%arg0: i32) -> (i32, i32) {
    %c0_i32 = arith.constant 0 : i32
    %c0_i32_0 = arith.constant 0 : i32
    %c0_i32_1 = arith.constant 0 : i32
    return %c0_i32, %c0_i32_0 : i32, i32
  }
  func.func @transform_3(%arg0: i32) -> (i32, i32) {
    %c0_i32 = arith.constant 0 : i32
    %c0_i32_0 = arith.constant 0 : i32
    %c0_i32_1 = arith.constant 0 : i32
    return %c0_i32, %c0_i32_0 : i32, i32
  }
}

</mosaic_0001>

<bundles_post_ra>
// kernel: convtasnet_forward.1
= control target key start
LH: loop header
LB: loop body
LE: loop exit
PB: predicated region body
PF: predicated region fallthrough
CT: control target
= control target key end

     0   :  { %v7090_v0 = vmov 0.0|0.0   ;;  %vm7091_vm0 = vmmov 0   ;;  %v7092_v4 = vmov 0.0   ;;  %v14_v5 = vlaneseq  ;;  %s8760_s1 = inlined_call_operand.vmem [shape: f32[34,4], index: 1, kind: input, shape index: {}]   ;;  %s8761_s0 = inlined_call_operand.vmem [shape: f32[392,32], index: 0, kind: input, shape index: {}]   ;;  %s8762_s2 = inlined_call_operand.vmem [shape: f32[34,4], index: 2, kind: input, shape index: {}]   ;;  %s8763_s3 = inlined_call_operand.vmem [shape: f32[34,4], index: 3, kind: output, shape index: {}]  }
   0x1   :  { %6762 = vmatprep.subr.bf16.mxu0 %v7090_v0  ;;  %v7119_v1 = vld [vmem:[%s8760_s1] sm:$0xff]  ;;  %v7124_v2 = vld [vmem:[%s8760_s1 + $0x8] sm:$0xff]  ;;  %v7129_v3 = vld [vmem:[%s8760_s1 + $0x10] sm:$0xff]  ;;  %5878 = vmatprep.mubr.msk.f32.mxu0 %vm7091_vm0, %v7092_v4  ;;  %vm81_vm2 = vcmask 1041408   ;;  %vm65_vm3 = vcmask 277504   ;;  %vm191_vm8 = vcmask 1043456  }
   0x2   :  { %v6763_v6 = vpack.c.bf16 %v7124_v2, %v7119_v1  ;;  %v7138_v7 = vld [vmem:[%s8760_s1 + $0x18] sm:$0xff]  ;;  %5893 = vmatprep.subr.mxu1 %v7092_v4  ;;  %5895 = vmatprep.mubr.msk.f32.mxu1 %vm7091_vm0, %v7092_v4  ;;  %v7143_v8 = vshrl.u32 %v14_v5, 7  ;;  %v7145_v9 = vand.u32 127, %v14_v5  ;;  %v7164_v15 = vld [vmem:[%s8760_s1 + $0x20] sm:$0x3]  ;;  %vm175_vm9 = vcmask 31744  }
   0x3   :  { %v6766_v10 = vpack.c.bf16 %v7138_v7, %v7129_v3  ;;  %v7219_v26 = vld [vmem:[%s8761_s0 + $0xc] sm:$0xf]  ;;  %v7093_v27 = vmov 1.0|1.0   ;;  %v7231_v28 = vld [vmem:[%s8761_s0 + $0x8] sm:$0xf] }
   0x4   :  { %6764 = vmatpush3.bf16.msra.mxu0 %v6763_v6  ;;  %v37_v11 = vsub.s32 %v7145_v9, %v7143_v8  ;;  %v7153_v12 = vadd.s32 8, %v7143_v8  ;;  %v7158_v14 = vadd.s32 16, %v7143_v8  ;;  %v7172_v18 = vadd.s32 24, %v7143_v8  ;;  %5894 = vmatpush3.msk.msra.mxu1 %vm191_vm8, %v7219_v26  ;;  %v7278_v39 = vld [vmem:[%s8762_s2] sm:$0xff]  ;;  %v7283_v40 = vld [vmem:[%s8762_s2 + $0x8] sm:$0xff]  ;;  %v7296_v45 = vld [vmem:[%s8762_s2 + $0x10] sm:$0xff] }
   0x5   :  { %6765 = vmatprep.subr.bf16.mxu0 %v7090_v0  ;;  %v7187_v21 = vadd.s32 32, %v7143_v8  ;;  %5910 = vmatprep.subr.mxu1 %v7092_v4  ;;  %vm392_vm10 = vcmask 261120   ;;  %v6783_v42 = vpack.c.bf16 %v7283_v40, %v7278_v39  ;;  %v7301_v46 = vld [vmem:[%s8762_s2 + $0x18] sm:$0xff]  ;;  %v7332_v54 = vld [vmem:[%s8762_s2 + $0x20] sm:$0x3]  ;;  %v57_v62 = vld [vmem:[%s8761_s0 + $0x28] sm:$0xff] }
   0x6   :  { %vm42_vm1 = vcmp.eq.s32.totalorder %v37_v11, 1  ;;  %v38_v13 = vsub.s32 %v7145_v9, %v7153_v12  ;;  %v39_v17 = vsub.s32 %v7145_v9, %v7158_v14  ;;  %v40_v20 = vsub.s32 %v7145_v9, %v7172_v18  ;;  %v56_v61 = vld [vmem:[%s8761_s0 + $0x20] sm:$0xff] }
   0x7   :  { %v7167_v16 = vsel %vm42_vm1, 1.0, %v7092_v4  ;;  %v41_v23 = vsub.s32 %v7145_v9, %v7187_v21  ;;  %v6786_v48 = vpack.c.bf16 %v7301_v46, %v7296_v45  ;;  %v7394_v63 = vpack.c.bf16 %v57_v62, %v56_v61 }
   0x8   :  { %6767 = vmatpush3.bf16.msra.mxu0 %v6766_v10  ;;  %vm43_vm4 = vcmp.eq.s32.totalorder %v38_v13, 1  ;;  %vm44_vm5 = vcmp.eq.s32.totalorder %v39_v17, 1  ;;  %vm45_vm6 = vcmp.eq.s32.totalorder %v40_v20, 1  ;;  %vm1470_vm11 = vcmask 130048  }
   0x9   :  { %5876 = vmatprep.subr.mxu0 %v7092_v4  ;;  %v7182_v19 = vsel %vm43_vm4, 1.0, %v7092_v4  ;;  %v7194_v22 = vsel %vm44_vm5, 1.0, %v7092_v4  ;;  %v7203_v24 = vsel %vm45_vm6, 1.0, %v7092_v4  ;;  %vm46_vm7 = vcmp.eq.s32.totalorder %v41_v23, 1 }
   0xa   :  { %v7210_v25 = vsel %vm46_vm7, 1.0, %v7092_v4  ;;  %vm1893_vm5 = vcmp.ge.s32.totalorder %v7143_v8, 2  ;;  %vm2036_vm7 = vcmp.ge.s32.totalorder %v7143_v8, 1 }
   0xc   :  { %5877 = vmatpush3.msk.msra.mxu0 %vm81_vm2, %v7164_v15 }
   0xd   :  { %5879 = vmatmul.mubr.msk.f32.vlgmr.msra.gmra.mrb[0].mxu0 %vm65_vm3, %v7167_v16  ;;  %6768 = vmatprep.subr.bf16.mxu0 %v7090_v0 }
   0xe   :  { %5881 = vmatprep.mubr.msk.f32.mxu0 %vm7091_vm0, %v7092_v4  ;;  %6769 = vmatpush3.bf16.msra.mxu0 %v7093_v27 }
   0xf   :  { %6770 = vmatprep.subr.bf16.mxu0 %v7090_v0 }
  0x11   :  { %5882 = vmatmul.mubr.msk.f32.gmra.mrb[2].mxu0 %vm65_vm3, %v7182_v19 }
  0x12   :  { %5884 = vmatprep.mubr.msk.f32.mxu0 %vm7091_vm0, %v7092_v4  ;;  %6771 = vmatpush3.bf16.msra.mxu0 %v7093_v27 }
  0x13   :  { %6776 = vmatprep.subr.bf16.mxu0 %v7090_v0 }
  0x15   :  { %5885 = vmatmul.mubr.msk.f32.gmra.mrb[4].mxu0 %vm65_vm3, %v7194_v22 }
  0x16   :  { %5887 = vmatprep.mubr.msk.f32.mxu0 %vm7091_vm0, %v7092_v4 }
  0x19   :  { %5888 = vmatmul.mubr.msk.f32.gmra.mrb[6].mxu0 %vm65_vm3, %v7203_v24 }
  0x1a   :  { %5890 = vmatprep.mubr.msk.f32.mxu0 %vm7091_vm0, %v7092_v4 }
  0x1d   :  { %5891 = vmatmul.mubr.msk.f32.gmra.mrb[8].mxu0 %vm65_vm3, %v7210_v25 }
  0x1e   :  { %5935 = vmatprep.mubr.msk.f32.mxu0 %vm7091_vm0, %v7092_v4 }
  0xe0   :  { %v151_v29 = vpop.f32.mrb[0].mxu0 }
  0xe1   :  { %v5880_v30 = vpop.f32.mrb[1].mxu0  ;;  %5896 = vmatmul.mubr.msk.f32.vlgmr.msra.gmra.mrb[0].mxu1 %vm175_vm9, %v151_v29 }
  0xe2   :  { %5898 = vmatprep.mubr.msk.f32.mxu1 %vm7091_vm0, %v7092_v4  ;;  %5911 = vmatpush3.msk.msra.mxu1 %vm191_vm8, %v7231_v28 }
  0xe3   :  { %6772 = vmatprep.subr.bf16.mxu1 %v7090_v0 }
  0xe4   :  { %v156_v31 = vpop.f32.mrb[2].mxu0 }
  0xe5   :  { %v5883_v32 = vpop.f32.mrb[3].mxu0  ;;  %5899 = vmatmul.mubr.msk.f32.gmra.mrb[2].mxu1 %vm175_vm9, %v156_v31 }
  0xe6   :  { %5901 = vmatprep.mubr.msk.f32.mxu1 %vm7091_vm0, %v7092_v4 }
  0xe8   :  { %v161_v33 = vpop.f32.mrb[4].mxu0 }
  0xe9   :  { %v5886_v34 = vpop.f32.mrb[5].mxu0  ;;  %5902 = vmatmul.mubr.msk.f32.gmra.mrb[4].mxu1 %vm175_vm9, %v161_v33 }
  0xea   :  { %5904 = vmatprep.mubr.msk.f32.mxu1 %vm7091_vm0, %v7092_v4 }
  0xec   :  { %v166_v35 = vpop.f32.mrb[6].mxu0 }
  0xed   :  { %v5889_v36 = vpop.f32.mrb[7].mxu0  ;;  %5905 = vmatmul.mubr.msk.f32.gmra.mrb[6].mxu1 %vm175_vm9, %v166_v35 }
  0xee   :  { %5907 = vmatprep.mubr.msk.f32.mxu1 %vm7091_vm0, %v7092_v4 }
  0xf0   :  { %v171_v37 = vpop.f32.mrb[8].mxu0 }
  0xf1   :  { %v5892_v38 = vpop.f32.mrb[9].mxu0  ;;  %5908 = vmatmul.mubr.msk.f32.gmra.mrb[8].mxu1 %vm175_vm9, %v171_v37 }
  0xf2   :  { %5912 = vmatprep.mubr.msk.f32.mxu1 %vm7091_vm0, %v7092_v4 }
  0xf5   :  { %5913 = vmatmul.mubr.msk.f32.vlgmr.msra.gmra.mrb[0].mxu1 %vm175_vm9, %v7119_v1  ;;  %v58_v1 = vld [vmem:[%s8761_s0 + $0x30] sm:$0xff] }
  0xf6   :  { %5915 = vmatprep.mubr.msk.f32.mxu1 %vm7091_vm0, %v7092_v4  ;;  %6773 = vmatpush3.bf16.msra.mxu1 %v7093_v27 }
  0xf7   :  { %6774 = vmatprep.subr.bf16.mxu1 %v7090_v0 }
  0xf9   :  { %5916 = vmatmul.mubr.msk.f32.gmra.mrb[2].mxu1 %vm175_vm9, %v7124_v2  ;;  %v59_v2 = vld [vmem:[%s8761_s0 + $0x38] sm:$0xff] }
  0xfa   :  { %5918 = vmatprep.mubr.msk.f32.mxu1 %vm7091_vm0, %v7092_v4  ;;  %6775 = vmatpush3.bf16.msra.mxu1 %v7093_v27 }
  0xfb   :  { %6782 = vmatprep.subr.bf16.mxu1 %v7090_v0 }
  0xfd   :  { %5919 = vmatmul.mubr.msk.f32.gmra.mrb[4].mxu1 %vm175_vm9, %v7129_v3  ;;  %v7404_v3 = vpack.c.bf16 %v59_v2, %v58_v1 }
  0xfe   :  { %5921 = vmatprep.mubr.msk.f32.mxu1 %vm7091_vm0, %v7092_v4 }
 0x101   :  { %5922 = vmatmul.mubr.msk.f32.gmra.mrb[6].mxu1 %vm175_vm9, %v7138_v7 }
 0x102   :  { %5924 = vmatprep.mubr.msk.f32.mxu1 %vm7091_vm0, %v7092_v4 }
 0x105   :  { %5925 = vmatmul.mubr.msk.f32.gmra.mrb[8].mxu1 %vm175_vm9, %v7164_v15 }
 0x106   :  { %5958 = vmatprep.mubr.msk.f32.mxu1 %vm7091_vm0, %v7092_v4 }
 0x1c8   :  { %v7285_v41 = vpop.f32.mrb[0].mxu1 }
 0x1c9   :  { %v503_v43 = vmul.f32 %v7285_v41, %v7285_v41  ;;  %v5914_v44 = vpop.f32.mrb[1].mxu1  ;;  %5936 = vmatmul.mubr.msk.f32.vlgmr.msra.gmra.mrb[10].mxu0 %vm392_vm10, %v7285_v41 }
 0x1ca   :  { %5938 = vmatprep.mubr.msk.f32.mxu0 %vm7091_vm0, %v7092_v4  ;;  %6778 = vmatpush3.bf16.msra.mxu0 %v7394_v63 }
 0x1cb   :  { %5959 = vmatmul.mubr.msk.f32.vlgmr.msra.gmra.mrb[10].mxu1 %vm392_vm10, %v503_v43  ;;  %6779 = vmatprep.subr.bf16.mxu0 %v7090_v0 }
 0x1cc   :  { %v7306_v47 = vpop.f32.mrb[2].mxu1  ;;  %5961 = vmatprep.mubr.msk.f32.mxu1 %vm7091_vm0, %v7092_v4  ;;  %6784 = vmatpush3.bf16.msra.mxu1 %v6783_v42 }
 0x1cd   :  { %v504_v49 = vmul.f32 %v7306_v47, %v7306_v47  ;;  %v5917_v50 = vpop.f32.mrb[3].mxu1  ;;  %5939 = vmatmul.mubr.msk.f32.gmra.mrb[12].mxu0 %vm392_vm10, %v7306_v47  ;;  %6785 = vmatprep.subr.bf16.mxu1 %v7090_v0 }
 0x1ce   :  { %5941 = vmatprep.mubr.msk.f32.mxu0 %vm7091_vm0, %v7092_v4  ;;  %6781 = vmatpush3.bf16.msra.mxu0 %v7404_v3 }
 0x1cf   :  { %5962 = vmatmul.mubr.msk.f32.gmra.mrb[12].mxu1 %vm392_vm10, %v504_v49  ;;  %6021 = vmatprep.subr.mxu0 %v7092_v4 }
 0x1d0   :  { %v7320_v51 = vpop.f32.mrb[4].mxu1  ;;  %5964 = vmatprep.mubr.msk.f32.mxu1 %vm7091_vm0, %v7092_v4  ;;  %6787 = vmatpush3.bf16.msra.mxu1 %v6786_v48 }
 0x1d1   :  { %v505_v52 = vmul.f32 %v7320_v51, %v7320_v51  ;;  %v5920_v53 = vpop.f32.mrb[5].mxu1  ;;  %5942 = vmatmul.mubr.msk.f32.gmra.mrb[14].mxu0 %vm392_vm10, %v7320_v51  ;;  %6004 = vmatprep.subr.mxu1 %v7092_v4 }
 0x1d2   :  { %5944 = vmatprep.mubr.msk.f32.mxu0 %vm7091_vm0, %v7092_v4 }
 0x1d3   :  { %5965 = vmatmul.mubr.msk.f32.gmra.mrb[14].mxu1 %vm392_vm10, %v505_v52 }
 0x1d4   :  { %v7337_v55 = vpop.f32.mrb[6].mxu1  ;;  %5967 = vmatprep.mubr.msk.f32.mxu1 %vm7091_vm0, %v7092_v4  ;;  %6005 = vmatpush3.msk.msra.mxu1 %vm81_vm2, %v7332_v54 }
 0x1d5   :  { %v506_v56 = vmul.f32 %v7337_v55, %v7337_v55  ;;  %v5923_v57 = vpop.f32.mrb[7].mxu1  ;;  %5945 = vmatmul.mubr.msk.f32.gmra.mrb[16].mxu0 %vm392_vm10, %v7337_v55  ;;  %6788 = vmatprep.subr.bf16.mxu1 %v7090_v0 }
 0x1d6   :  { %5947 = vmatprep.mubr.msk.f32.mxu0 %vm7091_vm0, %v7092_v4 }
 0x1d7   :  { %5968 = vmatmul.mubr.msk.f32.gmra.mrb[16].mxu1 %vm392_vm10, %v506_v56 }
 0x1d8   :  { %v7351_v58 = vpop.f32.mrb[8].mxu1  ;;  %5970 = vmatprep.mubr.msk.f32.mxu1 %vm7091_vm0, %v7092_v4 }
 0x1d9   :  { %v507_v59 = vmul.f32 %v7351_v58, %v7351_v58  ;;  %v5926_v60 = vpop.f32.mrb[9].mxu1  ;;  %5948 = vmatmul.mubr.msk.f32.gmra.mrb[18].mxu0 %vm392_vm10, %v7351_v58 }
 0x1da   :  { %5981 = vmatprep.mubr.msk.f32.mxu0 %vm7091_vm0, %v7092_v4 }
 0x1db   :  { %5971 = vmatmul.mubr.msk.f32.gmra.mrb[18].mxu1 %vm392_vm10, %v507_v59 }
 0x1dc   :  { %6006 = vmatprep.mubr.msk.f32.mxu1 %vm7091_vm0, %v7092_v4 }
 0x1df   :  { %6007 = vmatmul.mubr.msk.f32.vlgmr.msra.gmra.mrb[20].mxu1 %vm65_vm3, %v7167_v16 }
 0x1e0   :  { %6009 = vmatprep.mubr.msk.f32.mxu1 %vm7091_vm0, %v7092_v4  ;;  %6789 = vmatpush3.bf16.msra.mxu1 %v7093_v27 }
 0x1e1   :  { %6790 = vmatprep.subr.bf16.mxu1 %v7090_v0 }
 0x1e3   :  { %6010 = vmatmul.mubr.msk.f32.gmra.mrb[22].mxu1 %vm65_vm3, %v7182_v19 }
 0x1e4   :  { %6012 = vmatprep.mubr.msk.f32.mxu1 %vm7091_vm0, %v7092_v4  ;;  %6791 = vmatpush3.bf16.msra.mxu1 %v7093_v27 }
 0x1e5   :  { %6792 = vmatprep.subr.bf16.mxu1 %v7090_v0 }
 0x1e7   :  { %6013 = vmatmul.mubr.msk.f32.gmra.mrb[24].mxu1 %vm65_vm3, %v7194_v22 }
 0x1e8   :  { %6015 = vmatprep.mubr.msk.f32.mxu1 %vm7091_vm0, %v7092_v4 }
 0x1eb   :  { %6016 = vmatmul.mubr.msk.f32.gmra.mrb[26].mxu1 %vm65_vm3, %v7203_v24 }
 0x1ec   :  { %6018 = vmatprep.mubr.msk.f32.mxu1 %vm7091_vm0, %v7092_v4 }
 0x1ef   :  { %6019 = vmatmul.mubr.msk.f32.gmra.mrb[28].mxu1 %vm65_vm3, %v7210_v25 }
 0x1f0   :  { %6063 = vmatprep.mubr.msk.f32.mxu1 %vm7091_vm0, %v7092_v4 }
 0x29c   :  { %v474_v5 = vpop.f32.mrb[10].mxu0 }
 0x29d   :  { %v498_v6 = vmul.f32 0.03125, %v474_v5  ;;  %v5937_v7 = vpop.f32.mrb[11].mxu0 }
 0x29e   :  { %v589_v10 = vpop.f32.mrb[10].mxu1 }
 0x29f   :  { %v618_v11 = vmul.f32 %v498_v6, %v498_v6  ;;  %v633_v13 = vsub.f32 %v7285_v41, %v498_v6  ;;  %v613_v15 = vmul.f32 0.03125, %v589_v10  ;;  %v5960_v16 = vpop.f32.mrb[11].mxu1 }
 0x2a0   :  { %v479_v17 = vpop.f32.mrb[12].mxu0 }
 0x2a1   :  { %v623_v19 = vsub.f32 %v613_v15, %v618_v11  ;;  %v499_v20 = vmul.f32 0.03125, %v479_v17  ;;  %v5940_v22 = vpop.f32.mrb[13].mxu0 }
 0x2a2   :  { %v594_v23 = vpop.f32.mrb[12].mxu1 }
 0x2a3   :  { %v628_v24 = vmax.f32 %v623_v19, 0.0  ;;  %v619_v25 = vmul.f32 %v499_v20, %v499_v20  ;;  %v634_v29 = vsub.f32 %v7306_v47, %v499_v20  ;;  %v614_v30 = vmul.f32 0.03125, %v594_v23  ;;  %v5963_v31 = vpop.f32.mrb[13].mxu1 }
 0x2a4   :  { %v484_v32 = vpop.f32.mrb[14].mxu0 }
 0x2a5   :  { %v638_v33 = vadd.f32 1e-05, %v628_v24  ;;  %v624_v34 = vsub.f32 %v614_v30, %v619_v25  ;;  %v500_v35 = vmul.f32 0.03125, %v484_v32  ;;  %v5943_v36 = vpop.f32.mrb[15].mxu0  ;;  %v7421_v25 = vld [vmem:[%s8761_s0 + $0x18] ss:$0 sm:$0xff] }
 0x2a6   :  { %v599_v37 = vpop.f32.mrb[14].mxu1 }
 0x2a7   :  { %6970 = vrsqrt.f32 %v638_v33  ;;  %v629_v38 = vmax.f32 %v624_v34, 0.0  ;;  %v620_v41 = vmul.f32 %v500_v35, %v500_v35  ;;  %v635_v42 = vsub.f32 %v7320_v51, %v500_v35  ;;  %v5966_v43 = vpop.f32.mrb[15].mxu1 }
 0x2a8   :  { %v615_v44 = vmul.f32 0.03125, %v599_v37  ;;  %v489_v48 = vpop.f32.mrb[16].mxu0 }
 0x2a9   :  { %v639_v49 = vadd.f32 1e-05, %v629_v38  ;;  %v501_v50 = vmul.f32 0.03125, %v489_v48  ;;  %v5946_v52 = vpop.f32.mrb[17].mxu0 }
 0x2aa   :  { %v625_v47 = vsub.f32 %v615_v44, %v620_v41  ;;  %v604_v53 = vpop.f32.mrb[16].mxu1 }
 0x2ab   :  { %6972 = vrsqrt.f32 %v639_v49  ;;  %v621_v56 = vmul.f32 %v501_v50, %v501_v50  ;;  %v636_v57 = vsub.f32 %v7337_v55, %v501_v50  ;;  %v616_v59 = vmul.f32 0.03125, %v604_v53  ;;  %v5969_v60 = vpop.f32.mrb[17].mxu1  ;;  %v7416_v55 = vld [vmem:[%s8761_s0 + $0x10] ss:$0 sm:$0xff] }
 0x2ac   :  { %v630_v61 = vmax.f32 %v625_v47, 0.0  ;;  %v494_v62 = vpop.f32.mrb[18].mxu0 }
 0x2ad   :  { %v626_v1 = vsub.f32 %v616_v59, %v621_v56  ;;  %v502_v2 = vmul.f32 0.03125, %v494_v62  ;;  %v5949_v5 = vpop.f32.mrb[19].mxu0 }
 0x2ae   :  { %v640_v51 = vadd.f32 1e-05, %v630_v61  ;;  %v609_v6 = vpop.f32.mrb[18].mxu1 }
 0x2af   :  { %v631_v7 = vmax.f32 %v626_v1, 0.0  ;;  %v622_v10 = vmul.f32 %v502_v2, %v502_v2  ;;  %v637_v11 = vsub.f32 %v7351_v58, %v502_v2  ;;  %v617_v15 = vmul.f32 0.03125, %v609_v6  ;;  %v5972_v16 = vpop.f32.mrb[19].mxu1 }
 0x2b0   :  { %6974 = vrsqrt.f32 %v640_v51 }
 0x2b1   :  { %v6971_v17 = vpop.eup %6970  ;;  %v641_v19 = vadd.f32 1e-05, %v631_v7  ;;  %v627_v20 = vsub.f32 %v617_v15, %v622_v10 }
 0x2b2   :  { %v648_v22 = vmul.f32 %v6971_v17, %v633_v13  ;;  %v850_v23 = vpop.f32.mrb[20].mxu1 }
 0x2b3   :  { %6976 = vrsqrt.f32 %v641_v19  ;;  %v632_v24 = vmax.f32 %v627_v20, 0.0  ;;  %v6008_v58 = vpop.f32.mrb[21].mxu1 }
 0x2b4   :  { %v657_v30 = vmul.f32 %v7416_v55, %v648_v22 }
 0x2b5   :  { %v6973_v31 = vpop.eup %6972  ;;  %v642_v32 = vadd.f32 1e-05, %v632_v24 }
 0x2b6   :  { %v666_v33 = vadd.f32 %v7421_v25, %v657_v30  ;;  %v649_v34 = vmul.f32 %v6973_v31, %v634_v29  ;;  %v855_v35 = vpop.f32.mrb[22].mxu1 }
 0x2b7   :  { %6978 = vrsqrt.f32 %v642_v32  ;;  %v6011_v36 = vpop.f32.mrb[23].mxu1 }
 0x2b8   :  { %5982 = vmatmul.mubr.msk.f32.vlgmr.msra.gmra.mrb[20].mxu0 %vm392_vm10, %v666_v33  ;;  %v658_v13 = vmul.f32 %v7416_v55, %v649_v34 }
 0x2b9   :  { %5984 = vmatprep.mubr.msk.f32.mxu0 %vm7091_vm0, %v7092_v4  ;;  %6022 = vmatpush3.msk.msra.mxu0 %vm191_vm8, %v7219_v26 }
 0x2ba   :  { %v6975_v37 = vpop.eup %6974  ;;  %v667_v38 = vadd.f32 %v7421_v25, %v658_v13  ;;  %v860_v41 = vpop.f32.mrb[24].mxu1  ;;  %6038 = vmatprep.subr.mxu0 %v7092_v4 }
 0x2bb   :  { %v650_v29 = vmul.f32 %v6975_v37, %v635_v42  ;;  %v6014_v43 = vpop.f32.mrb[25].mxu1 }
 0x2bc   :  { %5985 = vmatmul.mubr.msk.f32.gmra.mrb[22].mxu0 %vm392_vm10, %v667_v38 }
 0x2bd   :  { %v6977_v44 = vpop.eup %6976  ;;  %5987 = vmatprep.mubr.msk.f32.mxu0 %vm7091_vm0, %v7092_v4  ;;  %v659_v48 = vmul.f32 %v7416_v55, %v650_v29 }
 0x2be   :  { %v651_v49 = vmul.f32 %v6977_v44, %v636_v57  ;;  %v865_v50 = vpop.f32.mrb[26].mxu1 }
 0x2bf   :  { %v668_v26 = vadd.f32 %v7421_v25, %v659_v48  ;;  %v6017_v52 = vpop.f32.mrb[27].mxu1 }
 0x2c0   :  { %v660_v47 = vmul.f32 %v7416_v55, %v651_v49 }
 0x2c1   :  { %v6979_v53 = vpop.eup %6978  ;;  %5988 = vmatmul.mubr.msk.f32.gmra.mrb[24].mxu0 %vm392_vm10, %v668_v26 }
 0x2c2   :  { %5990 = vmatprep.mubr.msk.f32.mxu0 %vm7091_vm0, %v7092_v4  ;;  %v669_v42 = vadd.f32 %v7421_v25, %v660_v47  ;;  %v652_v56 = vmul.f32 %v6979_v53, %v637_v11  ;;  %v870_v59 = vpop.f32.mrb[28].mxu1 }
 0x2c3   :  { %v6020_v60 = vpop.f32.mrb[29].mxu1 }
 0x2c4   :  { %v661_v61 = vmul.f32 %v7416_v55, %v652_v56 }
 0x2c5   :  { %5991 = vmatmul.mubr.msk.f32.gmra.mrb[26].mxu0 %vm392_vm10, %v669_v42 }
 0x2c6   :  { %5993 = vmatprep.mubr.msk.f32.mxu0 %vm7091_vm0, %v7092_v4  ;;  %v670_v57 = vadd.f32 %v7421_v25, %v661_v61 }
 0x2c9   :  { %5994 = vmatmul.mubr.msk.f32.gmra.mrb[28].mxu0 %vm392_vm10, %v670_v57 }
 0x2ca   :  { %6023 = vmatprep.mubr.msk.f32.mxu0 %vm7091_vm0, %v7092_v4 }
 0x2cd   :  { %6024 = vmatmul.mubr.msk.f32.vlgmr.msra.gmra.mrb[30].mxu0 %vm175_vm9, %v850_v23 }
 0x2ce   :  { %6026 = vmatprep.mubr.msk.f32.mxu0 %vm7091_vm0, %v7092_v4  ;;  %6039 = vmatpush3.msk.msra.mxu0 %vm191_vm8, %v7231_v28  ;;  %vm24_vm8 = vcmp.ge.s32.totalorder %v7158_v14, 17 }
 0x2cf   :  { %6796 = vmatprep.subr.bf16.mxu0 %v7090_v0 }
 0x2d1   :  { %6027 = vmatmul.mubr.msk.f32.gmra.mrb[32].mxu0 %vm175_vm9, %v855_v35 }
 0x2d2   :  { %6029 = vmatprep.mubr.msk.f32.mxu0 %vm7091_vm0, %v7092_v4 }
 0x2d5   :  { %6030 = vmatmul.mubr.msk.f32.gmra.mrb[34].mxu0 %vm175_vm9, %v860_v41 }
 0x2d6   :  { %6032 = vmatprep.mubr.msk.f32.mxu0 %vm7091_vm0, %v7092_v4 }
 0x2d9   :  { %6033 = vmatmul.mubr.msk.f32.gmra.mrb[36].mxu0 %vm175_vm9, %v865_v50 }
 0x2da   :  { %6035 = vmatprep.mubr.msk.f32.mxu0 %vm7091_vm0, %v7092_v4 }
 0x2dd   :  { %6036 = vmatmul.mubr.msk.f32.gmra.mrb[38].mxu0 %vm175_vm9, %v870_v59 }
 0x2de   :  { %6040 = vmatprep.mubr.msk.f32.mxu0 %vm7091_vm0, %v7092_v4 }
 0x2e1   :  { %6041 = vmatmul.mubr.msk.f32.vlgmr.msra.gmra.mrb[30].mxu0 %vm175_vm9, %v7278_v39 }
 0x2e2   :  { %6043 = vmatprep.mubr.msk.f32.mxu0 %vm7091_vm0, %v7092_v4  ;;  %6798 = vmatpush3.bf16.msra.mxu0 %v7394_v63 }
 0x2e3   :  { %6799 = vmatprep.subr.bf16.mxu0 %v7090_v0 }
 0x2e5   :  { %6044 = vmatmul.mubr.msk.f32.gmra.mrb[32].mxu0 %vm175_vm9, %v7283_v40 }
 0x2e6   :  { %6046 = vmatprep.mubr.msk.f32.mxu0 %vm7091_vm0, %v7092_v4  ;;  %6801 = vmatpush3.bf16.msra.mxu0 %v7404_v3 }
 0x2e7   :  { %6805 = vmatprep.subr.bf16.mxu0 %v7090_v0 }
 0x2e9   :  { %6047 = vmatmul.mubr.msk.f32.gmra.mrb[34].mxu0 %vm175_vm9, %v7296_v45 }
 0x2ea   :  { %6049 = vmatprep.mubr.msk.f32.mxu0 %vm7091_vm0, %v7092_v4 }
 0x2ed   :  { %6050 = vmatmul.mubr.msk.f32.gmra.mrb[36].mxu0 %vm175_vm9, %v7301_v46 }
 0x2ee   :  { %6052 = vmatprep.mubr.msk.f32.mxu0 %vm7091_vm0, %v7092_v4 }
 0x2f1   :  { %6053 = vmatmul.mubr.msk.f32.gmra.mrb[38].mxu0 %vm175_vm9, %v7332_v54 }
 0x2f2   :  { %6109 = vmatprep.mubr.msk.f32.mxu0 %vm7091_vm0, %v7092_v4 }
 0x38b   :  { %v7493_v28 = vpop.f32.mrb[20].mxu0 }
 0x38c   :  { %v5983_v39 = vpop.f32.mrb[21].mxu0 }
 0x38f   :  { %v7495_v40 = vpop.f32.mrb[22].mxu0 }
 0x390   :  { %v5986_v45 = vpop.f32.mrb[23].mxu0 }
 0x394   :  { %v7497_v62 = vpop.f32.mrb[24].mxu0 }
 0x395   :  { %v5989_v1 = vpop.f32.mrb[25].mxu0 }
 0x398   :  { %v7499_v2 = vpop.f32.mrb[26].mxu0 }
 0x399   :  { %v5992_v46 = vpop.f32.mrb[27].mxu0 }
 0x39c   :  { %v7501_v5 = vpop.f32.mrb[28].mxu0 }
 0x39d   :  { %v5995_v51 = vpop.f32.mrb[29].mxu0 }
 0x3b4   :  { %v7503_v6 = vpop.f32.mrb[30].mxu0 }
 0x3b5   :  { %v6042_v54 = vpop.f32.mrb[31].mxu0  ;;  %6064 = vmatmul.mubr.msk.f32.vlgmr.msra.gmra.mrb[30].mxu1 %vm392_vm10, %v7503_v6  ;;  %v1193_v22 = vmul.f32 %v7503_v6, %v7503_v6 }
 0x3b6   :  { %6066 = vmatprep.mubr.msk.f32.mxu1 %vm7091_vm0, %v7092_v4  ;;  %6793 = vmatpush3.bf16.msra.mxu1 %v7093_v27 }
 0x3b7   :  { %6794 = vmatprep.subr.bf16.mxu1 %v7090_v0 }
 0x3b8   :  { %v7511_v7 = vpop.f32.mrb[32].mxu0 }
 0x3b9   :  { %v6045_v10 = vpop.f32.mrb[33].mxu0  ;;  %6067 = vmatmul.mubr.msk.f32.gmra.mrb[32].mxu1 %vm392_vm10, %v7511_v7  ;;  %v1194_v23 = vmul.f32 %v7511_v7, %v7511_v7 }
 0x3ba   :  { %6069 = vmatprep.mubr.msk.f32.mxu1 %vm7091_vm0, %v7092_v4  ;;  %6795 = vmatpush3.bf16.msra.mxu1 %v7093_v27 }
 0x3bb   :  { %6931 = vmatprep.subr.bf16.mxu1 %v7090_v0 }
 0x3bc   :  { %v7519_v11 = vpop.f32.mrb[34].mxu0 }
 0x3bd   :  { %v6048_v15 = vpop.f32.mrb[35].mxu0  ;;  %6070 = vmatmul.mubr.msk.f32.gmra.mrb[34].mxu1 %vm392_vm10, %v7519_v11  ;;  %v1195_v24 = vmul.f32 %v7519_v11, %v7519_v11 }
 0x3be   :  { %6072 = vmatprep.mubr.msk.f32.mxu1 %vm7091_vm0, %v7092_v4 }
 0x3c0   :  { %v7525_v16 = vpop.f32.mrb[36].mxu0 }
 0x3c1   :  { %v6051_v17 = vpop.f32.mrb[37].mxu0  ;;  %6073 = vmatmul.mubr.msk.f32.gmra.mrb[36].mxu1 %vm392_vm10, %v7525_v16 }
 0x3c2   :  { %6075 = vmatprep.mubr.msk.f32.mxu1 %vm7091_vm0, %v7092_v4 }
 0x3c4   :  { %v7531_v19 = vpop.f32.mrb[38].mxu0 }
 0x3c5   :  { %v6054_v20 = vpop.f32.mrb[39].mxu0  ;;  %6076 = vmatmul.mubr.msk.f32.gmra.mrb[38].mxu1 %vm392_vm10, %v7531_v19 }
 0x3c6   :  { %6086 = vmatprep.mubr.msk.f32.mxu1 %vm7091_vm0, %v7092_v4 }
 0x3c9   :  { %6087 = vmatmul.mubr.msk.f32.vlgmr.msra.gmra.mrb[40].mxu1 %vm392_vm10, %v1193_v22 }
 0x3ca   :  { %6089 = vmatprep.mubr.msk.f32.mxu1 %vm7091_vm0, %v7092_v4  ;;  %6933 = vmatpush3.bf16.msra.mxu1 %v7394_v63  ;;  %v1196_v63 = vmul.f32 %v7525_v16, %v7525_v16 }
 0x3cb   :  { %6932 = vmatprep.subr.bf16.mxu1 %v7090_v0 }
 0x3cd   :  { %6090 = vmatmul.mubr.msk.f32.gmra.mrb[42].mxu1 %vm392_vm10, %v1194_v23 }
 0x3ce   :  { %6092 = vmatprep.mubr.msk.f32.mxu1 %vm7091_vm0, %v7092_v4  ;;  %6934 = vmatpush3.bf16.msra.mxu1 %v7404_v3  ;;  %v1197_v3 = vmul.f32 %v7531_v19, %v7531_v19 }
 0x3cf   :  { %6802 = vmatprep.subr.bf16.mxu1 %v7090_v0 }
 0x3d1   :  { %6093 = vmatmul.mubr.msk.f32.gmra.mrb[44].mxu1 %vm392_vm10, %v1195_v24 }
 0x3d2   :  { %6095 = vmatprep.mubr.msk.f32.mxu1 %vm7091_vm0, %v7092_v4 }
 0x3d5   :  { %6096 = vmatmul.mubr.msk.f32.gmra.mrb[46].mxu1 %vm392_vm10, %v1196_v63 }
 0x3d6   :  { %6098 = vmatprep.mubr.msk.f32.mxu1 %vm7091_vm0, %v7092_v4 }
 0x3d9   :  { %6099 = vmatmul.mubr.msk.f32.gmra.mrb[48].mxu1 %vm392_vm10, %v1197_v3 }
 0x3da   :  { %6121 = vmatprep.mubr.msk.f32.mxu1 %vm7091_vm0, %v7092_v4 }
 0x488   :  { %v1164_v58 = vpop.f32.mrb[30].mxu1 }
 0x489   :  { %v1188_v30 = vmul.f32 0.03125, %v1164_v58  ;;  %v6065_v31 = vpop.f32.mrb[31].mxu1 }
 0x48b   :  { %v1323_v32 = vsub.f32 %v7503_v6, %v1188_v30  ;;  %v1308_v53 = vmul.f32 %v1188_v30, %v1188_v30 }
 0x48c   :  { %v1169_v33 = vpop.f32.mrb[32].mxu1 }
 0x48d   :  { %v1189_v34 = vmul.f32 0.03125, %v1169_v33  ;;  %v6068_v35 = vpop.f32.mrb[33].mxu1 }
 0x48f   :  { %v1324_v36 = vsub.f32 %v7511_v7, %v1189_v34  ;;  %v1309_v61 = vmul.f32 %v1189_v34, %v1189_v34 }
 0x490   :  { %v1174_v13 = vpop.f32.mrb[34].mxu1 }
 0x491   :  { %v7568_v37 = vmul.f32 0.03125, %v1174_v13  ;;  %v6071_v38 = vpop.f32.mrb[35].mxu1 }
 0x493   :  { %v1325_v41 = vsub.f32 %v7519_v11, %v7568_v37  ;;  %v1310_v6 = vmul.f32 %v7568_v37, %v7568_v37 }
 0x494   :  { %v1179_v29 = vpop.f32.mrb[36].mxu1 }
 0x495   :  { %v7572_v43 = vmul.f32 0.03125, %v1179_v29  ;;  %v6074_v44 = vpop.f32.mrb[37].mxu1 }
 0x497   :  { %v1326_v48 = vsub.f32 %v7525_v16, %v7572_v43  ;;  %v1311_v20 = vmul.f32 %v7572_v43, %v7572_v43  ;;  %v1460_v16 = vld [vmem:[%s8761_s0 + $0x80] sm:$0xff]  ;;  %v1461_v43 = vld [vmem:[%s8761_s0 + $0x88] sm:$0xff] }
 0x498   :  { %v1184_v49 = vpop.f32.mrb[38].mxu1 }
 0x499   :  { %v7576_v50 = vmul.f32 0.03125, %v1184_v49  ;;  %v6077_v26 = vpop.f32.mrb[39].mxu1 }
 0x49b   :  { %v1327_v52 = vsub.f32 %v7531_v19, %v7576_v50  ;;  %v1312_v30 = vmul.f32 %v7576_v50, %v7576_v50 }
 0x49c   :  { %v1279_v47 = vpop.f32.mrb[40].mxu1 }
 0x49d   :  { %v1303_v42 = vmul.f32 0.03125, %v1279_v47  ;;  %v6088_v56 = vpop.f32.mrb[41].mxu1 }
 0x49f   :  { %v1313_v59 = vsub.f32 %v1303_v42, %v1308_v53 }
 0x4a0   :  { %v1284_v60 = vpop.f32.mrb[42].mxu1 }
 0x4a1   :  { %v1318_v57 = vmax.f32 %v1313_v59, 0.0  ;;  %v1304_v39 = vmul.f32 0.03125, %v1284_v60  ;;  %v6091_v45 = vpop.f32.mrb[43].mxu1 }
 0x4a3   :  { %v1328_v1 = vadd.f32 1e-05, %v1318_v57  ;;  %v1314_v46 = vsub.f32 %v1304_v39, %v1309_v61 }
 0x4a4   :  { %v1289_v51 = vpop.f32.mrb[44].mxu1 }
 0x4a5   :  { %6980 = vrsqrt.f32 %v1328_v1  ;;  %v1319_v54 = vmax.f32 %v1314_v46, 0.0  ;;  %v1305_v7 = vmul.f32 0.03125, %v1289_v51  ;;  %v6094_v10 = vpop.f32.mrb[45].mxu1  ;;  %v6803_v46 = vpack.c.bf16 %v1461_v43, %v1460_v16 }
 0x4a7   :  { %v1329_v11 = vadd.f32 1e-05, %v1319_v54  ;;  %v1315_v15 = vsub.f32 %v1305_v7, %v1310_v6 }
 0x4a8   :  { %v1294_v17 = vpop.f32.mrb[46].mxu1 }
 0x4a9   :  { %6982 = vrsqrt.f32 %v1329_v11  ;;  %v1320_v22 = vmax.f32 %v1315_v15, 0.0  ;;  %v1306_v23 = vmul.f32 0.03125, %v1294_v17  ;;  %v6097_v24 = vpop.f32.mrb[47].mxu1  ;;  %v5343_v15 = vld [vmem:[%s8761_s0] ss:$0 sm:$0xff] }
 0x4ab   :  { %v1330_v63 = vadd.f32 1e-05, %v1320_v22  ;;  %v1316_v3 = vsub.f32 %v1306_v23, %v1311_v20 }
 0x4ac   :  { %v1299_v58 = vpop.f32.mrb[48].mxu1 }
 0x4ad   :  { %6984 = vrsqrt.f32 %v1330_v63  ;;  %v1321_v31 = vmax.f32 %v1316_v3, 0.0  ;;  %v1307_v33 = vmul.f32 0.03125, %v1299_v58  ;;  %v6100_v34 = vpop.f32.mrb[49].mxu1 }
 0x4af   :  { %v6981_v35 = vpop.eup %6980  ;;  %v1331_v13 = vadd.f32 1e-05, %v1321_v31  ;;  %v1317_v37 = vsub.f32 %v1307_v33, %v1312_v30 }
 0x4b0   :  { %v1338_v38 = vmul.f32 %v6981_v35, %v1323_v32 }
 0x4b1   :  { %6986 = vrsqrt.f32 %v1331_v13  ;;  %v1322_v29 = vmax.f32 %v1317_v37, 0.0 }
 0x4b2   :  { %v1343_v44 = vmul.f32 %v7416_v55, %v1338_v38 }
 0x4b3   :  { %v6983_v49 = vpop.eup %6982  ;;  %v1332_v26 = vadd.f32 1e-05, %v1322_v29 }
 0x4b4   :  { %v1348_v47 = vadd.f32 %v7421_v25, %v1343_v44  ;;  %v1339_v53 = vmul.f32 %v6983_v49, %v1324_v36 }
 0x4b5   :  { %6988 = vrsqrt.f32 %v1332_v26 }
 0x4b6   :  { %6110 = vmatmul.mubr.msk.f32.vlgmr.msra.gmra.mrb[40].mxu0 %vm392_vm10, %v1348_v47  ;;  %v1344_v42 = vmul.f32 %v7416_v55, %v1339_v53 }
 0x4b7   :  { %v6985_v56 = vpop.eup %6984  ;;  %6112 = vmatprep.mubr.msk.f32.mxu0 %vm7091_vm0, %v7092_v4  ;;  %6806 = vmatpush3.bf16.msra.mxu0 %v7093_v27 }
 0x4b8   :  { %v1349_v32 = vadd.f32 %v7421_v25, %v1344_v42  ;;  %v1340_v59 = vmul.f32 %v6985_v56, %v1325_v41  ;;  %6807 = vmatprep.subr.bf16.mxu0 %v7090_v0 }
 0x4ba   :  { %6113 = vmatmul.mubr.msk.f32.gmra.mrb[42].mxu0 %vm392_vm10, %v1349_v32  ;;  %v1345_v36 = vmul.f32 %v7416_v55, %v1340_v59 }
 0x4bb   :  { %v6987_v60 = vpop.eup %6986  ;;  %6115 = vmatprep.mubr.msk.f32.mxu0 %vm7091_vm0, %v7092_v4  ;;  %6808 = vmatpush3.bf16.msra.mxu0 %v7093_v27 }
 0x4bc   :  { %v1350_v61 = vadd.f32 %v7421_v25, %v1345_v36  ;;  %v1341_v57 = vmul.f32 %v6987_v60, %v1326_v48  ;;  %6813 = vmatprep.subr.bf16.mxu0 %v7090_v0 }
 0x4be   :  { %6116 = vmatmul.mubr.msk.f32.gmra.mrb[44].mxu0 %vm392_vm10, %v1350_v61  ;;  %v1346_v41 = vmul.f32 %v7416_v55, %v1341_v57 }
 0x4bf   :  { %v6989_v39 = vpop.eup %6988  ;;  %6118 = vmatprep.mubr.msk.f32.mxu0 %vm7091_vm0, %v7092_v4 }
 0x4c0   :  { %v1342_v45 = vmul.f32 %v6989_v39, %v1327_v52  ;;  %v1351_v1 = vadd.f32 %v7421_v25, %v1346_v41 }
 0x4c2   :  { %v1347_v48 = vmul.f32 %v7416_v55, %v1342_v45  ;;  %6119 = vmatmul.mubr.msk.f32.gmra.mrb[46].mxu0 %vm392_vm10, %v1351_v1 }
 0x4c3   :  { %6151 = vmatprep.mubr.msk.f32.mxu0 %vm7091_vm0, %v7092_v4 }
 0x4c4   :  { %v1352_v19 = vadd.f32 %v7421_v25, %v1347_v48 }
 0x4c6   :  { %6122 = vmatmul.mubr.msk.f32.vlgmr.msra.gmra.mrb[50].mxu1 %vm392_vm10, %v1352_v19 }
 0x4c7   :  { %6804 = vmatpush3.bf16.msra.mxu1 %v6803_v46  ;;  %6128 = vmatprep.mubr.msk.f32.mxu1 %vm7091_vm0, %v7092_v4 }
 0x4c8   :  { %6809 = vmatprep.subr.bf16.mxu1 %v7090_v0 }
 0x589   :  { %v7628_v50 = vpop.f32.mrb[40].mxu0 }
 0x58a   :  { %v6111_v55 = vpop.f32.mrb[41].mxu0  ;;  %6129 = vmatmul.mubr.msk.f32.vlgmr.msra.gmra.mrb[52].mxu1 %vm1470_vm11, %v7628_v50 }
 0x58b   :  { %6131 = vmatprep.mubr.msk.f32.mxu1 %vm7091_vm0, %v7092_v4  ;;  %6810 = vmatpush3.bf16.msra.mxu1 %v7093_v27 }
 0x58c   :  { %6811 = vmatprep.subr.bf16.mxu1 %v7090_v0 }
 0x58d   :  { %v7636_v25 = vpop.f32.mrb[42].mxu0 }
 0x58e   :  { %v6114_v52 = vpop.f32.mrb[43].mxu0  ;;  %6132 = vmatmul.mubr.msk.f32.gmra.mrb[54].mxu1 %vm1470_vm11, %v7636_v25 }
 0x58f   :  { %6134 = vmatprep.mubr.msk.f32.mxu1 %vm7091_vm0, %v7092_v4  ;;  %6812 = vmatpush3.bf16.msra.mxu1 %v7093_v27 }
 0x590   :  { %6819 = vmatprep.subr.bf16.mxu1 %v7090_v0 }
 0x591   :  { %v7644_v51 = vpop.f32.mrb[44].mxu0 }
 0x592   :  { %v6117_v6 = vpop.f32.mrb[45].mxu0  ;;  %6135 = vmatmul.mubr.msk.f32.gmra.mrb[56].mxu1 %vm1470_vm11, %v7644_v51 }
 0x593   :  { %6137 = vmatprep.mubr.msk.f32.mxu1 %vm7091_vm0, %v7092_v4 }
 0x595   :  { %v7650_v54 = vpop.f32.mrb[46].mxu0 }
 0x596   :  { %v6120_v7 = vpop.f32.mrb[47].mxu0  ;;  %6138 = vmatmul.mubr.msk.f32.gmra.mrb[58].mxu1 %vm1470_vm11, %v7650_v54 }
 0x597   :  { %6140 = vmatprep.mubr.msk.f32.mxu1 %vm7091_vm0, %v7092_v4 }
 0x599   :  { %v7656_v10 = vpop.f32.mrb[50].mxu1 }
 0x59a   :  { %v6123_v11 = vpop.f32.mrb[51].mxu1  ;;  %6141 = vmatmul.mubr.msk.f32.gmra.mrb[60].mxu1 %vm1470_vm11, %v7656_v10 }
 0x59b   :  { %6174 = vmatprep.mubr.msk.f32.mxu1 %vm7091_vm0, %v7092_v4 }
 0x65d   :  { %v1552_v17 = vpop.f32.mrb[52].mxu1 }
 0x65e   :  { %vm1576_vm12 = vcmp.ge.f32.partialorder %v1552_v17, 0.0  ;;  %v1585_v20 = vmul.f32 %v5343_v15, %v1552_v17  ;;  %v6130_v22 = vpop.f32.mrb[53].mxu1 }
 0x660   :  { %v7665_v23 = vsel %vm1576_vm12, %v1552_v17, %v1585_v20 }
 0x661   :  { %v1705_v24 = vmul.f32 %v7665_v23, %v7665_v23  ;;  %v1557_v63 = vpop.f32.mrb[54].mxu1  ;;  %6152 = vmatmul.mubr.msk.f32.vlgmr.msra.gmra.mrb[48].mxu0 %vm392_vm10, %v7665_v23 }
 0x662   :  { %vm1577_vm13 = vcmp.ge.f32.partialorder %v1557_v63, 0.0  ;;  %v1586_v3 = vmul.f32 %v5343_v15, %v1557_v63  ;;  %v6133_v58 = vpop.f32.mrb[55].mxu1  ;;  %6154 = vmatprep.mubr.msk.f32.mxu0 %vm7091_vm0, %v7092_v4 }
 0x663   :  { %6175 = vmatmul.mubr.msk.f32.vlgmr.msra.gmra.mrb[62].mxu1 %vm392_vm10, %v1705_v24 }
 0x664   :  { %v7674_v30 = vsel %vm1577_vm13, %v1557_v63, %v1586_v3  ;;  %6177 = vmatprep.mubr.msk.f32.mxu1 %vm7091_vm0, %v7092_v4 }
 0x665   :  { %v1562_v31 = vpop.f32.mrb[56].mxu1  ;;  %6155 = vmatmul.mubr.msk.f32.gmra.mrb[50].mxu0 %vm392_vm10, %v7674_v30  ;;  %v1706_v33 = vmul.f32 %v7674_v30, %v7674_v30 }
 0x666   :  { %vm1578_vm14 = vcmp.ge.f32.partialorder %v1562_v31, 0.0  ;;  %v1587_v34 = vmul.f32 %v5343_v15, %v1562_v31  ;;  %v6136_v35 = vpop.f32.mrb[57].mxu1  ;;  %6157 = vmatprep.mubr.msk.f32.mxu0 %vm7091_vm0, %v7092_v4 }
 0x667   :  { %6178 = vmatmul.mubr.msk.f32.gmra.mrb[64].mxu1 %vm392_vm10, %v1706_v33 }
 0x668   :  { %v7685_v13 = vsel %vm1578_vm14, %v1562_v31, %v1587_v34  ;;  %6180 = vmatprep.mubr.msk.f32.mxu1 %vm7091_vm0, %v7092_v4 }
 0x669   :  { %v1567_v37 = vpop.f32.mrb[58].mxu1  ;;  %6158 = vmatmul.mubr.msk.f32.gmra.mrb[52].mxu0 %vm392_vm10, %v7685_v13  ;;  %v1707_v38 = vmul.f32 %v7685_v13, %v7685_v13 }
 0x66a   :  { %vm1579_vm15 = vcmp.ge.f32.partialorder %v1567_v37, 0.0  ;;  %v1588_v29 = vmul.f32 %v5343_v15, %v1567_v37  ;;  %v6139_v44 = vpop.f32.mrb[59].mxu1  ;;  %6160 = vmatprep.mubr.msk.f32.mxu0 %vm7091_vm0, %v7092_v4 }
 0x66b   :  { %6181 = vmatmul.mubr.msk.f32.gmra.mrb[66].mxu1 %vm392_vm10, %v1707_v38 }
 0x66c   :  { %v7696_v49 = vsel %vm1579_vm15, %v1567_v37, %v1588_v29  ;;  %6183 = vmatprep.mubr.msk.f32.mxu1 %vm7091_vm0, %v7092_v4 }
 0x66d   :  { %v1572_v26 = vpop.f32.mrb[60].mxu1  ;;  %6161 = vmatmul.mubr.msk.f32.gmra.mrb[54].mxu0 %vm392_vm10, %v7696_v49  ;;  %v1708_v47 = vmul.f32 %v7696_v49, %v7696_v49 }
 0x66e   :  { %vm1580_vm1 = vcmp.ge.f32.partialorder %v1572_v26, 0.0  ;;  %v1589_v53 = vmul.f32 %v5343_v15, %v1572_v26  ;;  %v6142_v42 = vpop.f32.mrb[61].mxu1  ;;  %6163 = vmatprep.mubr.msk.f32.mxu0 %vm7091_vm0, %v7092_v4 }
 0x66f   :  { %6184 = vmatmul.mubr.msk.f32.gmra.mrb[68].mxu1 %vm392_vm10, %v1708_v47 }
 0x670   :  { %v7707_v56 = vsel %vm1580_vm1, %v1572_v26, %v1589_v53  ;;  %6186 = vmatprep.mubr.msk.f32.mxu1 %vm7091_vm0, %v7092_v4 }
 0x671   :  { %6164 = vmatmul.mubr.msk.f32.gmra.mrb[56].mxu0 %vm392_vm10, %v7707_v56  ;;  %v1709_v32 = vmul.f32 %v7707_v56, %v7707_v56 }
 0x672   :  { %6199 = vmatprep.mubr.msk.f32.mxu0 %vm7091_vm0, %v7092_v4 }
 0x673   :  { %6187 = vmatmul.mubr.msk.f32.gmra.mrb[70].mxu1 %vm392_vm10, %v1709_v32 }
 0x674   :  { %6224 = vmatprep.mubr.msk.f32.mxu1 %vm7091_vm0, %v7092_v4 }
 0x734   :  { %v1676_v59 = vpop.f32.mrb[48].mxu0 }
 0x735   :  { %v1700_v36 = vmul.f32 0.03125, %v1676_v59  ;;  %v6153_v60 = vpop.f32.mrb[49].mxu0 }
 0x736   :  { %v1791_v61 = vpop.f32.mrb[62].mxu1 }
 0x737   :  { %v1820_v57 = vmul.f32 %v1700_v36, %v1700_v36  ;;  %v1815_v41 = vmul.f32 0.03125, %v1791_v61  ;;  %v6176_v39 = vpop.f32.mrb[63].mxu1 }
 0x738   :  { %v1681_v45 = vpop.f32.mrb[50].mxu0 }
 0x739   :  { %v1825_v1 = vsub.f32 %v1815_v41, %v1820_v57  ;;  %v1701_v16 = vmul.f32 0.03125, %v1681_v45  ;;  %v6156_v43 = vpop.f32.mrb[51].mxu0  ;;  %v1835_v45 = vsub.f32 %v7665_v23, %v1700_v36  ;;  %v5355_v23 = vld [vmem:[%s8761_s0 + $0x98] ss:$0 sm:$0xff] }
 0x73a   :  { %v1796_v48 = vpop.f32.mrb[64].mxu1 }
 0x73b   :  { %v1830_v46 = vmax.f32 %v1825_v1, 0.0  ;;  %v1821_v19 = vmul.f32 %v1701_v16, %v1701_v16  ;;  %v1816_v55 = vmul.f32 0.03125, %v1796_v48  ;;  %v6179_v52 = vpop.f32.mrb[65].mxu1 }
 0x73c   :  { %v1686_v6 = vpop.f32.mrb[52].mxu0  ;;  %v1836_v52 = vsub.f32 %v7674_v30, %v1701_v16 }
 0x73d   :  { %v1840_v7 = vadd.f32 1e-05, %v1830_v46  ;;  %v1826_v11 = vsub.f32 %v1816_v55, %v1821_v19  ;;  %v1702_v15 = vmul.f32 0.03125, %v1686_v6  ;;  %v6159_v17 = vpop.f32.mrb[53].mxu0  ;;  %v5354_v55 = vld [vmem:[%s8761_s0 + $0x90] ss:$0 sm:$0xff] }
 0x73e   :  { %v1801_v20 = vpop.f32.mrb[66].mxu1 }
 0x73f   :  { %6990 = vrsqrt.f32 %v1840_v7  ;;  %v1831_v22 = vmax.f32 %v1826_v11, 0.0  ;;  %v1822_v24 = vmul.f32 %v1702_v15, %v1702_v15  ;;  %v6182_v63 = vpop.f32.mrb[67].mxu1  ;;  %v1817_v3 = vmul.f32 0.03125, %v1801_v20 }
 0x740   :  { %v1691_v58 = vpop.f32.mrb[54].mxu0  ;;  %v1837_v20 = vsub.f32 %v7685_v13, %v1702_v15 }
 0x741   :  { %v1841_v31 = vadd.f32 1e-05, %v1831_v22  ;;  %v1703_v33 = vmul.f32 0.03125, %v1691_v58  ;;  %v6162_v34 = vpop.f32.mrb[55].mxu0  ;;  %v1827_v35 = vsub.f32 %v1817_v3, %v1822_v24 }
 0x742   :  { %v1806_v37 = vpop.f32.mrb[68].mxu1 }
 0x743   :  { %6992 = vrsqrt.f32 %v1841_v31  ;;  %v1823_v38 = vmul.f32 %v1703_v33, %v1703_v33  ;;  %v1818_v29 = vmul.f32 0.03125, %v1806_v37  ;;  %v6185_v44 = vpop.f32.mrb[69].mxu1  ;;  %v1832_v26 = vmax.f32 %v1827_v35, 0.0 }
 0x744   :  { %v1696_v47 = vpop.f32.mrb[56].mxu0  ;;  %v1838_v30 = vsub.f32 %v7696_v49, %v1703_v33  ;;  %v7738_v31 = vsub.s32 %v7143_v8, %v7145_v9 }
 0x745   :  { %v1828_v53 = vsub.f32 %v1818_v29, %v1823_v38  ;;  %v1704_v42 = vmul.f32 0.03125, %v1696_v47  ;;  %v6165_v32 = vpop.f32.mrb[57].mxu0  ;;  %v1842_v59 = vadd.f32 1e-05, %v1832_v26  ;;  %v5267_v29 = vadd.s32 4294967279, %v7158_v14 }
 0x746   :  { %v1811_v60 = vpop.f32.mrb[70].mxu1  ;;  %vm1888_vm4 = vcmp.eq.s32.totalorder %v7738_v31, 2  ;;  %vm2031_vm6 = vcmp.eq.s32.totalorder %v7738_v31, 1  ;;  %v7757_v26 = vsub.s32 %v7153_v12, %v7145_v9  ;;  %v7761_v47 = vsub.s32 %v7158_v14, %v7145_v9 }
 0x747   :  { %v1833_v61 = vmax.f32 %v1828_v53, 0.0  ;;  %v1824_v57 = vmul.f32 %v1704_v42, %v1704_v42  ;;  %v1819_v41 = vmul.f32 0.03125, %v1811_v60  ;;  %v6188_v39 = vpop.f32.mrb[71].mxu1  ;;  %6994 = vrsqrt.f32 %v1842_v59  ;;  %vm1898_vm12 = vmand %vm1888_vm4, %vm1893_vm5 }
 0x748   :  { %v1839_v15 = vsub.f32 %v7707_v56, %v1704_v42  ;;  %vm2041_vm13 = vmand %vm2031_vm6, %vm2036_vm7  ;;  %v7764_v53 = vsel %vm24_vm8, %v5267_v29, %v7158_v14  ;;  %v7771_v32 = vsel %vm1898_vm12, 1.0, %v7092_v4  ;;  %vm1889_vm14 = vcmp.eq.s32.totalorder %v7757_v26, 2 }
 0x749   :  { %v6991_v1 = vpop.eup %6990  ;;  %v1843_v43 = vadd.f32 1e-05, %v1833_v61  ;;  %v1829_v48 = vsub.f32 %v1819_v41, %v1824_v57  ;;  %v7774_v12 = vsel %vm2041_vm13, 1.0, %v7092_v4  ;;  %vm2032_vm15 = vcmp.eq.s32.totalorder %v7757_v26, 1 }
 0x74a   :  { %v1850_v46 = vmul.f32 %v6991_v1, %v1835_v45  ;;  %vm1890_vm1 = vcmp.eq.s32.totalorder %v7761_v47, 2  ;;  %vm1895_vm4 = vcmp.ge.s32.totalorder %v7764_v53, 2  ;;  %vm2033_vm5 = vcmp.eq.s32.totalorder %v7761_v47, 1 }
 0x74b   :  { %6996 = vrsqrt.f32 %v1843_v43  ;;  %v1834_v19 = vmax.f32 %v1829_v48, 0.0  ;;  %vm2038_vm6 = vcmp.ge.s32.totalorder %v7764_v53, 1  ;;  %v7793_v14 = vsel %vm1889_vm14, 1.0, %v7092_v4  ;;  %vm1900_vm7 = vmand %vm1890_vm1, %vm1895_vm4  ;;  %v5356_v43 = vld [vmem:[%s8761_s0 + $0xa2] ss:$0 sm:$0xff] }
 0x74c   :  { %v1859_v17 = vmul.f32 %v5354_v55, %v1850_v46  ;;  %v7798_v59 = vsel %vm2032_vm15, 1.0, %v7092_v4  ;;  %vm2043_vm8 = vmand %vm2033_vm5, %vm2038_vm6  ;;  %v7802_v60 = vsub.s32 %v7172_v18, %v7145_v9  ;;  %v7815_v61 = vsel %vm1900_vm7, 1.0, %v7092_v4  ;;  %v5363_v48 = vld [vmem:[%s8761_s0 + $0xa0] ss:$0 sm:$0xff]  ;;  %v5370_v46 = vld [vmem:[%s8761_s0 + $0xa1] ss:$0 sm:$0xff] }
 0x74d   :  { %v6993_v6 = vpop.eup %6992  ;;  %v1844_v7 = vadd.f32 1e-05, %v1834_v19  ;;  %v7820_v57 = vsel %vm2043_vm8, 1.0, %v7092_v4  ;;  %v7826_v41 = vsub.s32 %v7187_v21, %v7145_v9 }
 0x74e   :  { %v1851_v11 = vmul.f32 %v6993_v6, %v1836_v52  ;;  %v7729_v24 = vadd.f32 %v5355_v23, %v1859_v17  ;;  %vm1891_vm12 = vcmp.eq.s32.totalorder %v7802_v60, 2  ;;  %vm2034_vm13 = vcmp.eq.s32.totalorder %v7802_v60, 1 }
 0x74f   :  { %6998 = vrsqrt.f32 %v1844_v7  ;;  %v7839_v9 = vsel %vm1891_vm12, 1.0, %v7092_v4  ;;  %v7844_v39 = vsel %vm2034_vm13, 1.0, %v7092_v4  ;;  %vm1892_vm14 = vcmp.eq.s32.totalorder %v7826_v41, 2 }
 0x750   :  { %v1860_v36 = vmul.f32 %v5354_v55, %v1851_v11  ;;  %vm2035_vm15 = vcmp.eq.s32.totalorder %v7826_v41, 1  ;;  %v7857_v45 = vsel %vm1892_vm14, 1.0, %v7092_v4  ;;  %v1878_v52 = vmul.f32 %v5356_v43, %v7729_v24 }
 0x751   :  { %v6995_v22 = vpop.eup %6994  ;;  %v7862_v1 = vsel %vm2035_vm15, 1.0, %v7092_v4 }
 0x752   :  { %v7731_v63 = vadd.f32 %v5355_v23, %v1860_v36  ;;  %v1852_v3 = vmul.f32 %v6995_v22, %v1837_v20  ;;  %v7885_v36 = vld [vmem:[%s8761_s0 + $0x1] ss:$0 sm:$0xff] }
 0x754   :  { %v6814_v16 = vpack.c.bf16 %v7731_v63, %v7729_v24  ;;  %v1861_v13 = vmul.f32 %v5354_v55, %v1852_v3 }
 0x755   :  { %v6997_v58 = vpop.eup %6996 }
 0x756   :  { %6815 = vmatpush3.bf16.msra.mxu0 %v6814_v16  ;;  %6821 = vmatpush3.bf16.msra.mxu1 %v6814_v16  ;;  %v1853_v34 = vmul.f32 %v6997_v58, %v1838_v30  ;;  %v7747_v37 = vadd.f32 %v5355_v23, %v1861_v13  ;;  %v1879_v30 = vmul.f32 %v5356_v43, %v7731_v63 }
 0x757   :  { %6816 = vmatprep.subr.bf16.mxu0 %v7090_v0  ;;  %6822 = vmatprep.subr.bf16.mxu1 %v7090_v0 }
 0x758   :  { %v1862_v35 = vmul.f32 %v5354_v55, %v1853_v34 }
 0x759   :  { %v6999_v49 = vpop.eup %6998 }
 0x75a   :  { %v1854_v33 = vmul.f32 %v6999_v49, %v1839_v15  ;;  %v7749_v38 = vadd.f32 %v5355_v23, %v1862_v35  ;;  %v1880_v35 = vmul.f32 %v5356_v43, %v7747_v37 }
 0x75c   :  { %v6817_v56 = vpack.c.bf16 %v7749_v38, %v7747_v37  ;;  %v1863_v44 = vmul.f32 %v5354_v55, %v1854_v33  ;;  %v1881_v37 = vmul.f32 %v5356_v43, %v7749_v38 }
 0x75e   :  { %6818 = vmatpush3.bf16.msra.mxu0 %v6817_v56  ;;  %6824 = vmatpush3.bf16.msra.mxu1 %v6817_v56  ;;  %v7768_v42 = vadd.f32 %v5355_v23, %v1863_v44 }
 0x75f   :  { %6197 = vmatprep.subr.mxu0 %v7092_v4  ;;  %6222 = vmatprep.subr.mxu1 %v7092_v4 }
 0x762   :  { %6198 = vmatpush3.msk.msra.mxu0 %vm81_vm2, %v7768_v42  ;;  %6223 = vmatpush3.msk.msra.mxu1 %vm81_vm2, %v7768_v42 }
 0x763   :  { %6200 = vmatmul.mubr.msk.f32.vlgmr.msra.gmra.mrb[58].mxu0 %vm65_vm3, %v7771_v32  ;;  %6225 = vmatmul.mubr.msk.f32.vlgmr.msra.gmra.mrb[72].mxu1 %vm65_vm3, %v7774_v12 }
 0x764   :  { %6202 = vmatprep.mubr.msk.f32.mxu0 %vm7091_vm0, %v7092_v4  ;;  %6227 = vmatprep.mubr.msk.f32.mxu1 %vm7091_vm0, %v7092_v4 }
 0x765   :  { %6825 = vmatprep.subr.bf16.mxu0 %v7090_v0  ;;  %6829 = vmatprep.subr.bf16.mxu1 %v7090_v0 }
 0x766   :  { %6826 = vmatpush3.bf16.msra.mxu0 %v7093_v27  ;;  %6830 = vmatpush3.bf16.msra.mxu1 %v7093_v27 }
 0x767   :  { %6203 = vmatmul.mubr.msk.f32.gmra.mrb[60].mxu0 %vm65_vm3, %v7793_v14  ;;  %6228 = vmatmul.mubr.msk.f32.gmra.mrb[74].mxu1 %vm65_vm3, %v7798_v59 }
 0x768   :  { %6205 = vmatprep.mubr.msk.f32.mxu0 %vm7091_vm0, %v7092_v4  ;;  %6230 = vmatprep.mubr.msk.f32.mxu1 %vm7091_vm0, %v7092_v4 }
 0x769   :  { %6827 = vmatprep.subr.bf16.mxu0 %v7090_v0  ;;  %6831 = vmatprep.subr.bf16.mxu1 %v7090_v0 }
 0x76a   :  { %6828 = vmatpush3.bf16.msra.mxu0 %v7093_v27  ;;  %6832 = vmatpush3.bf16.msra.mxu1 %v7093_v27 }
 0x76b   :  { %6206 = vmatmul.mubr.msk.f32.gmra.mrb[62].mxu0 %vm65_vm3, %v7815_v61  ;;  %6231 = vmatmul.mubr.msk.f32.gmra.mrb[76].mxu1 %vm65_vm3, %v7820_v57 }
 0x76c   :  { %6208 = vmatprep.mubr.msk.f32.mxu0 %vm7091_vm0, %v7092_v4  ;;  %6233 = vmatprep.mubr.msk.f32.mxu1 %vm7091_vm0, %v7092_v4 }
 0x76d   :  { %6833 = vmatprep.subr.bf16.mxu0 %v7090_v0  ;;  %6839 = vmatprep.subr.bf16.mxu1 %v7090_v0 }
 0x76f   :  { %6209 = vmatmul.mubr.msk.f32.gmra.mrb[64].mxu0 %vm65_vm3, %v7839_v9  ;;  %6234 = vmatmul.mubr.msk.f32.gmra.mrb[78].mxu1 %vm65_vm3, %v7844_v39 }
 0x770   :  { %6211 = vmatprep.mubr.msk.f32.mxu0 %vm7091_vm0, %v7092_v4  ;;  %6236 = vmatprep.mubr.msk.f32.mxu1 %vm7091_vm0, %v7092_v4 }
 0x773   :  { %6212 = vmatmul.mubr.msk.f32.gmra.mrb[66].mxu0 %vm65_vm3, %v7857_v45  ;;  %6237 = vmatmul.mubr.msk.f32.gmra.mrb[80].mxu1 %vm65_vm3, %v7862_v1 }
 0x774   :  { %6247 = vmatprep.mubr.msk.f32.mxu0 %vm7091_vm0, %v7092_v4  ;;  %6270 = vmatprep.mubr.msk.f32.mxu1 %vm7091_vm0, %v7092_v4 }
 0x836   :  { %v1992_v19 = vpop.f32.mrb[58].mxu0  ;;  %v2132_v55 = vpop.f32.mrb[72].mxu1 }
 0x837   :  { %v2021_v6 = vmul.f32 %v5363_v48, %v1992_v19  ;;  %v6201_v7 = vpop.f32.mrb[59].mxu0  ;;  %v2161_v11 = vmul.f32 %v5370_v46, %v2132_v55  ;;  %v6226_v17 = vpop.f32.mrb[73].mxu1 }
 0x839   :  { %v2026_v23 = vadd.f32 %v2021_v6, %v1878_v52 }
 0x83a   :  { %v1997_v20 = vpop.f32.mrb[60].mxu0  ;;  %v2137_v22 = vpop.f32.mrb[74].mxu1 }
 0x83b   :  { %v2166_v3 = vadd.f32 %v2161_v11, %v2026_v23  ;;  %v2022_v16 = vmul.f32 %v5363_v48, %v1997_v20  ;;  %v6204_v58 = vpop.f32.mrb[61].mxu0  ;;  %v2162_v34 = vmul.f32 %v5370_v46, %v2137_v22  ;;  %v6229_v13 = vpop.f32.mrb[75].mxu1 }
 0x83c   :  { %v1882_v13 = vmul.f32 %v5356_v43, %v7768_v42 }
 0x83d   :  { %vm2171_vm1 = vcmp.ge.f32.partialorder %v2166_v3, 0.0  ;;  %v2180_v24 = vmul.f32 %v7885_v36, %v2166_v3  ;;  %v2027_v15 = vadd.f32 %v2022_v16, %v1879_v30 }
 0x83e   :  { %v2002_v49 = vpop.f32.mrb[62].mxu0  ;;  %v2142_v33 = vpop.f32.mrb[76].mxu1 }
 0x83f   :  { %v7890_v29 = vsel %vm2171_vm1, %v2166_v3, %v2180_v24  ;;  %v2167_v56 = vadd.f32 %v2162_v34, %v2027_v15  ;;  %v2023_v44 = vmul.f32 %v5363_v48, %v2002_v49  ;;  %v6207_v19 = vpop.f32.mrb[63].mxu0  ;;  %v2163_v55 = vmul.f32 %v5370_v46, %v2142_v33  ;;  %v6232_v52 = vpop.f32.mrb[77].mxu1 }
 0x840   :  { %v2300_v63 = vmul.f32 %v7890_v29, %v7890_v29  ;;  %6248 = vmatmul.mubr.msk.f32.vlgmr.msra.gmra.mrb[68].mxu0 %vm392_vm10, %v7890_v29  ;;  %vm3002_vm1 = vcmp.eq.s32.totalorder %v7738_v31, 4 }
 0x841   :  { %v2181_v6 = vmul.f32 %v7885_v36, %v2167_v56  ;;  %v2028_v7 = vadd.f32 %v2023_v44, %v1880_v35  ;;  %6250 = vmatprep.mubr.msk.f32.mxu0 %vm7091_vm0, %v7092_v4  ;;  %vm2172_vm4 = vcmp.ge.f32.partialorder %v2167_v56, 0.0 }
 0x842   :  { %v2007_v11 = vpop.f32.mrb[64].mxu0  ;;  %6271 = vmatmul.mubr.msk.f32.vlgmr.msra.gmra.mrb[82].mxu1 %vm392_vm10, %v2300_v63  ;;  %v2147_v17 = vpop.f32.mrb[78].mxu1 }
 0x843   :  { %v2168_v23 = vadd.f32 %v2163_v55, %v2028_v7  ;;  %v2024_v20 = vmul.f32 %v5363_v48, %v2007_v11  ;;  %v6210_v22 = vpop.f32.mrb[65].mxu0  ;;  %v2164_v3 = vmul.f32 %v5370_v46, %v2147_v17  ;;  %v6235_v30 = vpop.f32.mrb[79].mxu1  ;;  %v7901_v16 = vsel %vm2172_vm4, %v2167_v56, %v2181_v6  ;;  %6273 = vmatprep.mubr.msk.f32.mxu1 %vm7091_vm0, %v7092_v4  ;;  %v1468_v17 = vld [vmem:[%s8761_s0 + $0xc8] sm:$0xff] }
 0x844   :  { %6251 = vmatmul.mubr.msk.f32.gmra.mrb[70].mxu0 %vm392_vm10, %v7901_v16  ;;  %v2301_v38 = vmul.f32 %v7901_v16, %v7901_v16  ;;  %v2580_v22 = vld [vmem:[%s8761_s0 + $0xd8] sm:$0xff]  ;;  %vm3007_vm4 = vcmp.ge.s32.totalorder %v7143_v8, 4 }
 0x845   :  { %v2182_v58 = vmul.f32 %v7885_v36, %v2168_v23  ;;  %v2029_v34 = vadd.f32 %v2024_v20, %v1881_v37  ;;  %6253 = vmatprep.mubr.msk.f32.mxu0 %vm7091_vm0, %v7092_v4  ;;  %vm2173_vm5 = vcmp.ge.f32.partialorder %v2168_v23, 0.0  ;;  %v1467_v37 = vld [vmem:[%s8761_s0 + $0xc0] sm:$0xff] }
 0x846   :  { %v2012_v24 = vpop.f32.mrb[66].mxu0  ;;  %6274 = vmatmul.mubr.msk.f32.gmra.mrb[84].mxu1 %vm392_vm10, %v2301_v38  ;;  %v2152_v15 = vpop.f32.mrb[80].mxu1 }
 0x847   :  { %v2169_v35 = vadd.f32 %v2164_v3, %v2029_v34  ;;  %v2025_v49 = vmul.f32 %v5363_v48, %v2012_v24  ;;  %v6213_v33 = vpop.f32.mrb[67].mxu0  ;;  %v2165_v56 = vmul.f32 %v5370_v46, %v2152_v15  ;;  %v7914_v44 = vsel %vm2173_vm5, %v2168_v23, %v2182_v58  ;;  %6276 = vmatprep.mubr.msk.f32.mxu1 %vm7091_vm0, %v7092_v4  ;;  %v6238_v19 = vpop.f32.mrb[81].mxu1  ;;  %v1469_v23 = vld [vmem:[%s8761_s0 + $0xd0] sm:$0xff]  ;;  %v2581_v3 = vld [vmem:[%s8761_s0 + $0xe0] sm:$0xff]  ;;  %vm3012_vm5 = vmand %vm3002_vm1, %vm3007_vm4 }
 0x848   :  { %6254 = vmatmul.mubr.msk.f32.gmra.mrb[72].mxu0 %vm392_vm10, %v7914_v44  ;;  %v2302_v42 = vmul.f32 %v7914_v44, %v7914_v44  ;;  %v6837_v20 = vpack.c.bf16 %v1469_v23, %v1468_v17  ;;  %v6840_v30 = vpack.c.bf16 %v2581_v3, %v2580_v22 }
 0x849   :  { %v2183_v43 = vmul.f32 %v7885_v36, %v2169_v35  ;;  %v2030_v55 = vadd.f32 %v2025_v49, %v1882_v13  ;;  %6256 = vmatprep.mubr.msk.f32.mxu0 %vm7091_vm0, %v7092_v4  ;;  %vm2174_vm6 = vcmp.ge.f32.partialorder %v2169_v35, 0.0 }
 0x84a   :  { %6277 = vmatmul.mubr.msk.f32.gmra.mrb[86].mxu1 %vm392_vm10, %v2302_v42 }
 0x84b   :  { %v2170_v48 = vadd.f32 %v2165_v56, %v2030_v55  ;;  %v7926_v46 = vsel %vm2174_vm6, %v2169_v35, %v2183_v43  ;;  %6279 = vmatprep.mubr.msk.f32.mxu1 %vm7091_vm0, %v7092_v4  ;;  %6841 = vmatpush3.bf16.msra.mxu1 %v6840_v30  ;;  %vm3003_vm6 = vcmp.eq.s32.totalorder %v7757_v26, 4 }
 0x84c   :  { %6257 = vmatmul.mubr.msk.f32.gmra.mrb[74].mxu0 %vm392_vm10, %v7926_v46  ;;  %v2303_v52 = vmul.f32 %v7926_v46, %v7926_v46  ;;  %6846 = vmatprep.subr.bf16.mxu1 %v7090_v0  ;;  %v8147_v8 = vsel %vm3003_vm6, 1.0, %v7092_v4 }
 0x84d   :  { %v2184_v63 = vmul.f32 %v7885_v36, %v2170_v48  ;;  %6259 = vmatprep.mubr.msk.f32.mxu0 %vm7091_vm0, %v7092_v4  ;;  %vm2175_vm7 = vcmp.ge.f32.partialorder %v2170_v48, 0.0  ;;  %v1466_v36 = vld [vmem:[%s8761_s0 + $0xb8] sm:$0xff] }
 0x84e   :  { %6280 = vmatmul.mubr.msk.f32.gmra.mrb[88].mxu1 %vm392_vm10, %v2303_v52  ;;  %v6834_v11 = vpack.c.bf16 %v1467_v37, %v1466_v36 }
 0x84f   :  { %v7938_v6 = vsel %vm2175_vm7, %v2170_v48, %v2184_v63  ;;  %6282 = vmatprep.mubr.msk.f32.mxu1 %vm7091_vm0, %v7092_v4  ;;  %vm3004_vm7 = vcmp.eq.s32.totalorder %v7761_v47, 4 }
 0x850   :  { %6260 = vmatmul.mubr.msk.f32.gmra.mrb[76].mxu0 %vm392_vm10, %v7938_v6  ;;  %v2304_v7 = vmul.f32 %v7938_v6, %v7938_v6 }
 0x851   :  { %6293 = vmatprep.mubr.msk.f32.mxu0 %vm7091_vm0, %v7092_v4  ;;  %6835 = vmatpush3.bf16.msra.mxu0 %v6834_v11 }
 0x852   :  { %6283 = vmatmul.mubr.msk.f32.gmra.mrb[90].mxu1 %vm392_vm10, %v2304_v7  ;;  %6836 = vmatprep.subr.bf16.mxu0 %v7090_v0 }
 0x853   :  { %6312 = vmatprep.mubr.msk.f32.mxu1 %vm7091_vm0, %v7092_v4 }
 0x855   :  { %6838 = vmatpush3.bf16.msra.mxu0 %v6837_v20 }
 0x856   :  { %6842 = vmatprep.subr.bf16.mxu0 %v7090_v0 }
 0x913   :  { %v2271_v38 = vpop.f32.mrb[68].mxu0 }
 0x914   :  { %v2295_v58 = vmul.f32 0.03125, %v2271_v38  ;;  %v6249_v34 = vpop.f32.mrb[69].mxu0 }
 0x915   :  { %v2386_v13 = vpop.f32.mrb[82].mxu1 }
 0x916   :  { %v2415_v24 = vmul.f32 %v2295_v58, %v2295_v58  ;;  %v2410_v15 = vmul.f32 0.03125, %v2386_v13  ;;  %v6272_v35 = vpop.f32.mrb[83].mxu1 }
 0x917   :  { %v2276_v49 = vpop.f32.mrb[70].mxu0 }
 0x918   :  { %v2420_v33 = vsub.f32 %v2410_v15, %v2415_v24  ;;  %v2296_v56 = vmul.f32 0.03125, %v2276_v49  ;;  %v6252_v19 = vpop.f32.mrb[71].mxu0 }
 0x919   :  { %v2391_v42 = vpop.f32.mrb[84].mxu1 }
 0x91a   :  { %v2425_v43 = vmax.f32 %v2420_v33, 0.0  ;;  %v2416_v55 = vmul.f32 %v2296_v56, %v2296_v56  ;;  %v2411_v48 = vmul.f32 0.03125, %v2391_v42  ;;  %v6275_v52 = vpop.f32.mrb[85].mxu1 }
 0x91b   :  { %v2281_v63 = vpop.f32.mrb[72].mxu0 }
 0x91c   :  { %v2435_v7 = vadd.f32 1e-05, %v2425_v43  ;;  %v2421_v36 = vsub.f32 %v2411_v48, %v2416_v55  ;;  %v2297_v37 = vmul.f32 0.03125, %v2281_v63  ;;  %v6255_v11 = vpop.f32.mrb[73].mxu0 }
 0x91d   :  { %v2396_v17 = vpop.f32.mrb[86].mxu1 }
 0x91e   :  { %7000 = vrsqrt.f32 %v2435_v7  ;;  %v2426_v23 = vmax.f32 %v2421_v36, 0.0  ;;  %v2417_v20 = vmul.f32 %v2297_v37, %v2297_v37  ;;  %v6278_v22 = vpop.f32.mrb[87].mxu1  ;;  %v2412_v3 = vmul.f32 0.03125, %v2396_v17 }
 0x91f   :  { %v2286_v30 = vpop.f32.mrb[74].mxu0  ;;  %v5382_v22 = vld [vmem:[%s8761_s0 + $0xa8] ss:$0 sm:$0xff] }
 0x920   :  { %v2436_v38 = vadd.f32 1e-05, %v2426_v23  ;;  %v2298_v34 = vmul.f32 0.03125, %v2286_v30  ;;  %v6258_v13 = vpop.f32.mrb[75].mxu0  ;;  %v2422_v24 = vsub.f32 %v2412_v3, %v2417_v20  ;;  %v2430_v23 = vsub.f32 %v7890_v29, %v2295_v58 }
 0x921   :  { %v2401_v15 = vpop.f32.mrb[88].mxu1 }
 0x922   :  { %7002 = vrsqrt.f32 %v2436_v38  ;;  %v2418_v35 = vmul.f32 %v2298_v34, %v2298_v34  ;;  %v2413_v49 = vmul.f32 0.03125, %v2401_v15  ;;  %v6281_v33 = vpop.f32.mrb[89].mxu1  ;;  %v2427_v19 = vmax.f32 %v2422_v24, 0.0  ;;  %v5383_v24 = vld [vmem:[%s8761_s0 + $0xb0] ss:$0 sm:$0xff] }
 0x923   :  { %v2291_v42 = vpop.f32.mrb[76].mxu0 }
 0x924   :  { %v2423_v43 = vsub.f32 %v2413_v49, %v2418_v35  ;;  %v2299_v55 = vmul.f32 0.03125, %v2291_v42  ;;  %v6261_v48 = vpop.f32.mrb[77].mxu0  ;;  %v2437_v52 = vadd.f32 1e-05, %v2427_v19  ;;  %v2431_v35 = vsub.f32 %v7901_v16, %v2296_v56 }
 0x925   :  { %v2406_v63 = vpop.f32.mrb[90].mxu1  ;;  %v2432_v42 = vsub.f32 %v7914_v44, %v2297_v37  ;;  %v2433_v56 = vsub.f32 %v7926_v46, %v2298_v34 }
 0x926   :  { %v2428_v7 = vmax.f32 %v2423_v43, 0.0  ;;  %v2419_v36 = vmul.f32 %v2299_v55, %v2299_v55  ;;  %v2414_v11 = vmul.f32 0.03125, %v2406_v63  ;;  %v6284_v17 = vpop.f32.mrb[91].mxu1  ;;  %7004 = vrsqrt.f32 %v2437_v52 }
 0x928   :  { %v7001_v20 = vpop.eup %7000  ;;  %v2438_v3 = vadd.f32 1e-05, %v2428_v7  ;;  %v2424_v30 = vsub.f32 %v2414_v11, %v2419_v36  ;;  %v2434_v7 = vsub.f32 %v7938_v6, %v2299_v55 }
 0x929   :  { %v2445_v38 = vmul.f32 %v7001_v20, %v2430_v23 }
 0x92a   :  { %7006 = vrsqrt.f32 %v2438_v3  ;;  %v2429_v13 = vmax.f32 %v2424_v30, 0.0 }
 0x92b   :  { %v2454_v15 = vmul.f32 %v5382_v22, %v2445_v38 }
 0x92c   :  { %v7003_v49 = vpop.eup %7002  ;;  %v2439_v29 = vadd.f32 1e-05, %v2429_v13 }
 0x92d   :  { %v2463_v58 = vadd.f32 %v5383_v24, %v2454_v15  ;;  %v2446_v33 = vmul.f32 %v7003_v49, %v2431_v35 }
 0x92e   :  { %7008 = vrsqrt.f32 %v2439_v29 }
 0x92f   :  { %6294 = vmatmul.mubr.msk.f32.vlgmr.msra.gmra.mrb[78].mxu0 %vm392_vm10, %v2463_v58  ;;  %v2455_v19 = vmul.f32 %v5382_v22, %v2446_v33 }
 0x930   :  { %6296 = vmatprep.mubr.msk.f32.mxu0 %vm7091_vm0, %v7092_v4  ;;  %6843 = vmatpush3.bf16.msra.mxu0 %v7093_v27  ;;  %v7005_v43 = vpop.eup %7004 }
 0x931   :  { %v2464_v48 = vadd.f32 %v5383_v24, %v2455_v19  ;;  %6844 = vmatprep.subr.bf16.mxu0 %v7090_v0  ;;  %v2447_v16 = vmul.f32 %v7005_v43, %v2432_v42 }
 0x933   :  { %6297 = vmatmul.mubr.msk.f32.gmra.mrb[80].mxu0 %vm392_vm10, %v2464_v48  ;;  %v2456_v63 = vmul.f32 %v5382_v22, %v2447_v16 }
 0x934   :  { %v7007_v52 = vpop.eup %7006  ;;  %6299 = vmatprep.mubr.msk.f32.mxu0 %vm7091_vm0, %v7092_v4  ;;  %6845 = vmatpush3.bf16.msra.mxu0 %v7093_v27 }
 0x935   :  { %v2448_v44 = vmul.f32 %v7007_v52, %v2433_v56  ;;  %6850 = vmatprep.subr.bf16.mxu0 %v7090_v0  ;;  %v2465_v37 = vadd.f32 %v5383_v24, %v2456_v63 }
 0x937   :  { %v2457_v36 = vmul.f32 %v5382_v22, %v2448_v44  ;;  %6300 = vmatmul.mubr.msk.f32.gmra.mrb[82].mxu0 %vm392_vm10, %v2465_v37 }
 0x938   :  { %v7009_v11 = vpop.eup %7008  ;;  %6302 = vmatprep.mubr.msk.f32.mxu0 %vm7091_vm0, %v7092_v4 }
 0x939   :  { %v2466_v46 = vadd.f32 %v5383_v24, %v2457_v36  ;;  %v2449_v34 = vmul.f32 %v7009_v11, %v2434_v7 }
 0x93b   :  { %v2458_v17 = vmul.f32 %v5382_v22, %v2449_v34  ;;  %6303 = vmatmul.mubr.msk.f32.gmra.mrb[84].mxu0 %vm392_vm10, %v2466_v46 }
 0x93c   :  { %6305 = vmatprep.mubr.msk.f32.mxu0 %vm7091_vm0, %v7092_v4 }
 0x93d   :  { %v2467_v23 = vadd.f32 %v5383_v24, %v2458_v17 }
 0x93f   :  { %6306 = vmatmul.mubr.msk.f32.gmra.mrb[86].mxu0 %vm392_vm10, %v2467_v23 }
 0x940   :  { %6335 = vmatprep.mubr.msk.f32.mxu0 %vm7091_vm0, %v7092_v4 }
 0xa02   :  { %v2549_v6 = vpop.f32.mrb[78].mxu0 }
 0xa03   :  { %v8003_v55 = vadd.f32 %v2549_v6, %v7628_v50  ;;  %v6295_v20 = vpop.f32.mrb[79].mxu0 }
 0xa05   :  { %6313 = vmatmul.mubr.msk.f32.vlgmr.msra.gmra.mrb[92].mxu1 %vm1470_vm11, %v8003_v55 }
 0xa06   :  { %v2554_v22 = vpop.f32.mrb[80].mxu0  ;;  %6315 = vmatprep.mubr.msk.f32.mxu1 %vm7091_vm0, %v7092_v4  ;;  %6847 = vmatpush3.bf16.msra.mxu1 %v7093_v27 }
 0xa07   :  { %v8011_v3 = vadd.f32 %v2554_v22, %v7636_v25  ;;  %v6298_v30 = vpop.f32.mrb[81].mxu0  ;;  %6848 = vmatprep.subr.bf16.mxu1 %v7090_v0 }
 0xa09   :  { %6316 = vmatmul.mubr.msk.f32.gmra.mrb[94].mxu1 %vm1470_vm11, %v8011_v3 }
 0xa0a   :  { %6318 = vmatprep.mubr.msk.f32.mxu1 %vm7091_vm0, %v7092_v4  ;;  %6849 = vmatpush3.bf16.msra.mxu1 %v7093_v27  ;;  %v2559_v50 = vpop.f32.mrb[82].mxu0 }
 0xa0b   :  { %6856 = vmatprep.subr.bf16.mxu1 %v7090_v0  ;;  %v8021_v38 = vadd.f32 %v2559_v50, %v7644_v51  ;;  %v6301_v13 = vpop.f32.mrb[83].mxu0 }
 0xa0d   :  { %6319 = vmatmul.mubr.msk.f32.gmra.mrb[96].mxu1 %vm1470_vm11, %v8021_v38 }
 0xa0e   :  { %v2564_v25 = vpop.f32.mrb[84].mxu0  ;;  %6321 = vmatprep.mubr.msk.f32.mxu1 %vm7091_vm0, %v7092_v4 }
 0xa0f   :  { %v8028_v24 = vadd.f32 %v2564_v25, %v7650_v54  ;;  %v6304_v15 = vpop.f32.mrb[85].mxu0  ;;  %v5394_v54 = vld [vmem:[%s8761_s0 + $0x2] ss:$0 sm:$0xff] }
 0xa11   :  { %6322 = vmatmul.mubr.msk.f32.gmra.mrb[98].mxu1 %vm1470_vm11, %v8028_v24 }
 0xa12   :  { %v2569_v35 = vpop.f32.mrb[86].mxu0  ;;  %6324 = vmatprep.mubr.msk.f32.mxu1 %vm7091_vm0, %v7092_v4 }
 0xa13   :  { %v8035_v51 = vadd.f32 %v2569_v35, %v7656_v10  ;;  %v6307_v49 = vpop.f32.mrb[87].mxu0 }
 0xa15   :  { %6325 = vmatmul.mubr.msk.f32.gmra.mrb[100].mxu1 %vm1470_vm11, %v8035_v51 }
 0xa16   :  { %6358 = vmatprep.mubr.msk.f32.mxu1 %vm7091_vm0, %v7092_v4 }
 0xad8   :  { %v2671_v29 = vpop.f32.mrb[92].mxu1 }
 0xad9   :  { %vm2695_vm8 = vcmp.ge.f32.partialorder %v2671_v29, 0.0  ;;  %v2704_v58 = vmul.f32 %v5394_v54, %v2671_v29  ;;  %v6314_v33 = vpop.f32.mrb[93].mxu1 }
 0xadb   :  { %v8044_v19 = vsel %vm2695_vm8, %v2671_v29, %v2704_v58  ;;  %vm3009_vm8 = vcmp.ge.s32.totalorder %v7764_v53, 4 }
 0xadc   :  { %v2824_v10 = vmul.f32 %v8044_v19, %v8044_v19  ;;  %v2676_v42 = vpop.f32.mrb[94].mxu1  ;;  %6336 = vmatmul.mubr.msk.f32.vlgmr.msra.gmra.mrb[88].mxu0 %vm392_vm10, %v8044_v19 }
 0xadd   :  { %vm2696_vm12 = vcmp.ge.f32.partialorder %v2676_v42, 0.0  ;;  %v2705_v43 = vmul.f32 %v5394_v54, %v2676_v42  ;;  %v6317_v48 = vpop.f32.mrb[95].mxu1  ;;  %6338 = vmatprep.mubr.msk.f32.mxu0 %vm7091_vm0, %v7092_v4 }
 0xade   :  { %6359 = vmatmul.mubr.msk.f32.vlgmr.msra.gmra.mrb[102].mxu1 %vm392_vm10, %v2824_v10 }
 0xadf   :  { %v8053_v16 = vsel %vm2696_vm12, %v2676_v42, %v2705_v43  ;;  %6361 = vmatprep.mubr.msk.f32.mxu1 %vm7091_vm0, %v7092_v4  ;;  %vm3014_vm12 = vmand %vm3004_vm7, %vm3009_vm8 }
 0xae0   :  { %6339 = vmatmul.mubr.msk.f32.gmra.mrb[90].mxu0 %vm392_vm10, %v8053_v16  ;;  %v2825_v56 = vmul.f32 %v8053_v16, %v8053_v16  ;;  %v2681_v52 = vpop.f32.mrb[96].mxu1  ;;  %v8162_v31 = vsel %vm3014_vm12, 1.0, %v7092_v4 }
 0xae1   :  { %6341 = vmatprep.mubr.msk.f32.mxu0 %vm7091_vm0, %v7092_v4  ;;  %vm2697_vm13 = vcmp.ge.f32.partialorder %v2681_v52, 0.0  ;;  %v2706_v63 = vmul.f32 %v5394_v54, %v2681_v52  ;;  %v6320_v44 = vpop.f32.mrb[97].mxu1 }
 0xae2   :  { %6362 = vmatmul.mubr.msk.f32.gmra.mrb[104].mxu1 %vm392_vm10, %v2825_v56 }
 0xae3   :  { %6364 = vmatprep.mubr.msk.f32.mxu1 %vm7091_vm0, %v7092_v4  ;;  %v8066_v37 = vsel %vm2697_vm13, %v2681_v52, %v2706_v63  ;;  %vm3005_vm13 = vcmp.eq.s32.totalorder %v7802_v60, 4 }
 0xae4   :  { %v2686_v7 = vpop.f32.mrb[98].mxu1  ;;  %6342 = vmatmul.mubr.msk.f32.gmra.mrb[92].mxu0 %vm392_vm10, %v8066_v37  ;;  %v2826_v36 = vmul.f32 %v8066_v37, %v8066_v37 }
 0xae5   :  { %vm2698_vm14 = vcmp.ge.f32.partialorder %v2686_v7, 0.0  ;;  %v2707_v11 = vmul.f32 %v5394_v54, %v2686_v7  ;;  %v6323_v46 = vpop.f32.mrb[99].mxu1  ;;  %6344 = vmatprep.mubr.msk.f32.mxu0 %vm7091_vm0, %v7092_v4 }
 0xae6   :  { %6365 = vmatmul.mubr.msk.f32.gmra.mrb[106].mxu1 %vm392_vm10, %v2826_v36 }
 0xae7   :  { %v8075_v34 = vsel %vm2698_vm14, %v2686_v7, %v2707_v11  ;;  %6367 = vmatprep.mubr.msk.f32.mxu1 %vm7091_vm0, %v7092_v4  ;;  %vm3006_vm14 = vcmp.eq.s32.totalorder %v7826_v41, 4 }
 0xae8   :  { %v2691_v17 = vpop.f32.mrb[100].mxu1  ;;  %6345 = vmatmul.mubr.msk.f32.gmra.mrb[94].mxu0 %vm392_vm10, %v8075_v34  ;;  %v2827_v23 = vmul.f32 %v8075_v34, %v8075_v34 }
 0xae9   :  { %vm2699_vm15 = vcmp.ge.f32.partialorder %v2691_v17, 0.0  ;;  %v2708_v6 = vmul.f32 %v5394_v54, %v2691_v17  ;;  %v6326_v20 = vpop.f32.mrb[101].mxu1  ;;  %6347 = vmatprep.mubr.msk.f32.mxu0 %vm7091_vm0, %v7092_v4 }
 0xaea   :  { %6368 = vmatmul.mubr.msk.f32.gmra.mrb[108].mxu1 %vm392_vm10, %v2827_v23 }
 0xaeb   :  { %v8086_v22 = vsel %vm2699_vm15, %v2691_v17, %v2708_v6  ;;  %6370 = vmatprep.mubr.msk.f32.mxu1 %vm7091_vm0, %v7092_v4 }
 0xaec   :  { %6348 = vmatmul.mubr.msk.f32.gmra.mrb[96].mxu0 %vm392_vm10, %v8086_v22  ;;  %v2828_v30 = vmul.f32 %v8086_v22, %v8086_v22 }
 0xaed   :  { %6383 = vmatprep.mubr.msk.f32.mxu0 %vm7091_vm0, %v7092_v4 }
 0xaee   :  { %6371 = vmatmul.mubr.msk.f32.gmra.mrb[110].mxu1 %vm392_vm10, %v2828_v30 }
 0xaef   :  { %6408 = vmatprep.mubr.msk.f32.mxu1 %vm7091_vm0, %v7092_v4 }
 0xbaf   :  { %v2795_v50 = vpop.f32.mrb[88].mxu0 }
 0xbb0   :  { %v2819_v13 = vmul.f32 0.03125, %v2795_v50  ;;  %v6337_v25 = vpop.f32.mrb[89].mxu0 }
 0xbb1   :  { %v2910_v15 = vpop.f32.mrb[102].mxu1 }
 0xbb2   :  { %v2939_v35 = vmul.f32 %v2819_v13, %v2819_v13  ;;  %v2934_v49 = vmul.f32 0.03125, %v2910_v15  ;;  %v6360_v54 = vpop.f32.mrb[103].mxu1 }
 0xbb3   :  { %v2800_v29 = vpop.f32.mrb[90].mxu0 }
 0xbb4   :  { %v2944_v58 = vsub.f32 %v2934_v49, %v2939_v35  ;;  %v2820_v33 = vmul.f32 0.03125, %v2800_v29  ;;  %v6340_v10 = vpop.f32.mrb[91].mxu0 }
 0xbb5   :  { %v2915_v42 = vpop.f32.mrb[104].mxu1 }
 0xbb6   :  { %v2949_v43 = vmax.f32 %v2944_v58, 0.0  ;;  %v2940_v48 = vmul.f32 %v2820_v33, %v2820_v33  ;;  %v2935_v56 = vmul.f32 0.03125, %v2915_v42  ;;  %v6363_v52 = vpop.f32.mrb[105].mxu1 }
 0xbb7   :  { %v2805_v7 = vpop.f32.mrb[92].mxu0 }
 0xbb8   :  { %v2959_v63 = vadd.f32 1e-05, %v2949_v43  ;;  %v2945_v44 = vsub.f32 %v2935_v56, %v2940_v48  ;;  %v2821_v36 = vmul.f32 0.03125, %v2805_v7  ;;  %v6343_v11 = vpop.f32.mrb[93].mxu0 }
 0xbb9   :  { %v2920_v17 = vpop.f32.mrb[106].mxu1 }
 0xbba   :  { %7010 = vrsqrt.f32 %v2959_v63  ;;  %v2950_v46 = vmax.f32 %v2945_v44, 0.0  ;;  %v2941_v23 = vmul.f32 %v2821_v36, %v2821_v36  ;;  %v2936_v6 = vmul.f32 0.03125, %v2920_v17  ;;  %v6366_v20 = vpop.f32.mrb[107].mxu1 }
 0xbbb   :  { %v2810_v50 = vpop.f32.mrb[94].mxu0  ;;  %v2954_v44 = vsub.f32 %v8044_v19, %v2819_v13 }
 0xbbc   :  { %v2960_v30 = vadd.f32 1e-05, %v2950_v46  ;;  %v2946_v25 = vsub.f32 %v2936_v6, %v2941_v23  ;;  %v2822_v15 = vmul.f32 0.03125, %v2810_v50  ;;  %v6346_v35 = vpop.f32.mrb[95].mxu0  ;;  %v5405_v50 = vld [vmem:[%s8761_s0 + $0xe8] ss:$0 sm:$0xff] }
 0xbbd   :  { %v2925_v49 = vpop.f32.mrb[108].mxu1 }
 0xbbe   :  { %7012 = vrsqrt.f32 %v2960_v30  ;;  %v2951_v54 = vmax.f32 %v2946_v25, 0.0  ;;  %v2942_v29 = vmul.f32 %v2822_v15, %v2822_v15  ;;  %v2937_v58 = vmul.f32 0.03125, %v2925_v49  ;;  %v6369_v10 = vpop.f32.mrb[109].mxu1 }
 0xbbf   :  { %v2815_v42 = vpop.f32.mrb[96].mxu0  ;;  %v2955_v25 = vsub.f32 %v8053_v16, %v2820_v33  ;;  %v2956_v10 = vsub.f32 %v8066_v37, %v2821_v36 }
 0xbc0   :  { %v2961_v43 = vadd.f32 1e-05, %v2951_v54  ;;  %v2947_v48 = vsub.f32 %v2937_v58, %v2942_v29  ;;  %v2823_v56 = vmul.f32 0.03125, %v2815_v42  ;;  %v6349_v52 = vpop.f32.mrb[97].mxu0  ;;  %v5406_v29 = vld [vmem:[%s8761_s0 + $0xf0] ss:$0 sm:$0xff] }
 0xbc1   :  { %v2930_v63 = vpop.f32.mrb[110].mxu1  ;;  %v2957_v52 = vsub.f32 %v8075_v34, %v2822_v15 }
 0xbc2   :  { %7014 = vrsqrt.f32 %v2961_v43  ;;  %v2952_v7 = vmax.f32 %v2947_v48, 0.0  ;;  %v2943_v11 = vmul.f32 %v2823_v56, %v2823_v56  ;;  %v6372_v46 = vpop.f32.mrb[111].mxu1  ;;  %v2938_v23 = vmul.f32 0.03125, %v2930_v63 }
 0xbc4   :  { %v7011_v17 = vpop.eup %7010  ;;  %v2962_v6 = vadd.f32 1e-05, %v2952_v7  ;;  %v2948_v30 = vsub.f32 %v2938_v23, %v2943_v11  ;;  %v2958_v7 = vsub.f32 %v8086_v22, %v2823_v56  ;;  %v8131_v56 = vsel %vm3012_vm5, 1.0, %v7092_v4 }
 0xbc5   :  { %v2969_v20 = vmul.f32 %v7011_v17, %v2954_v44 }
 0xbc6   :  { %7016 = vrsqrt.f32 %v2962_v6  ;;  %v2953_v49 = vmax.f32 %v2948_v30, 0.0  ;;  %v5421_v6 = vld [vmem:[%s8761_s0 + $0xf9] ss:$0 sm:$0xff] }
 0xbc7   :  { %v2978_v19 = vmul.f32 %v5405_v50, %v2969_v20 }
 0xbc8   :  { %v7013_v35 = vpop.eup %7012  ;;  %v2963_v13 = vadd.f32 1e-05, %v2953_v49 }
 0xbc9   :  { %v2970_v54 = vmul.f32 %v7013_v35, %v2955_v25  ;;  %v8108_v43 = vadd.f32 %v5406_v29, %v2978_v19  ;;  %v8217_v19 = vld [vmem:[%s8761_s0 + $0x3] ss:$0 sm:$0xff] }
 0xbca   :  { %7018 = vrsqrt.f32 %v2963_v13 }
 0xbcb   :  { %v2979_v58 = vmul.f32 %v5405_v50, %v2970_v54 }
 0xbcc   :  { %v7015_v42 = vpop.eup %7014 }
 0xbcd   :  { %v8110_v48 = vadd.f32 %v5406_v29, %v2979_v58  ;;  %v2971_v16 = vmul.f32 %v7015_v42, %v2956_v10 }
 0xbcf   :  { %v6851_v33 = vpack.c.bf16 %v8110_v48, %v8108_v43  ;;  %v2980_v36 = vmul.f32 %v5405_v50, %v2971_v16 }
 0xbd0   :  { %v7017_v63 = vpop.eup %7016 }
 0xbd1   :  { %6852 = vmatpush3.bf16.msra.mxu0 %v6851_v33  ;;  %6858 = vmatpush3.bf16.msra.mxu1 %v6851_v33  ;;  %v2972_v37 = vmul.f32 %v7017_v63, %v2957_v52  ;;  %v8118_v46 = vadd.f32 %v5406_v29, %v2980_v36 }
 0xbd2   :  { %6853 = vmatprep.subr.bf16.mxu0 %v7090_v0  ;;  %6859 = vmatprep.subr.bf16.mxu1 %v7090_v0 }
 0xbd3   :  { %v2981_v44 = vmul.f32 %v5405_v50, %v2972_v37 }
 0xbd4   :  { %v7019_v11 = vpop.eup %7018 }
 0xbd5   :  { %v8120_v17 = vadd.f32 %v5406_v29, %v2981_v44  ;;  %v2973_v34 = vmul.f32 %v7019_v11, %v2958_v7 }
 0xbd7   :  { %v6854_v15 = vpack.c.bf16 %v8120_v17, %v8118_v46  ;;  %v2982_v23 = vmul.f32 %v5405_v50, %v2973_v34 }
 0xbd9   :  { %6855 = vmatpush3.bf16.msra.mxu0 %v6854_v15  ;;  %6861 = vmatpush3.bf16.msra.mxu1 %v6854_v15  ;;  %v8128_v22 = vadd.f32 %v5406_v29, %v2982_v23 }
 0xbda   :  { %6381 = vmatprep.subr.mxu0 %v7092_v4  ;;  %6406 = vmatprep.subr.mxu1 %v7092_v4 }
 0xbdd   :  { %6382 = vmatpush3.msk.msra.mxu0 %vm81_vm2, %v8128_v22  ;;  %6407 = vmatpush3.msk.msra.mxu1 %vm81_vm2, %v8128_v22 }
 0xbde   :  { %6384 = vmatmul.mubr.msk.f32.vlgmr.msra.gmra.mrb[98].mxu0 %vm65_vm3, %v8131_v56  ;;  %6409 = vmatmul.mubr.msk.f32.vlgmr.msra.gmra.mrb[112].mxu1 %vm65_vm3, %v7771_v32  ;;  %v8178_v32 = vsel %vm3005_vm13, 1.0, %v7092_v4 }
 0xbdf   :  { %6386 = vmatprep.mubr.msk.f32.mxu0 %vm7091_vm0, %v7092_v4  ;;  %6411 = vmatprep.mubr.msk.f32.mxu1 %vm7091_vm0, %v7092_v4 }
 0xbe0   :  { %6862 = vmatprep.subr.bf16.mxu0 %v7090_v0  ;;  %6866 = vmatprep.subr.bf16.mxu1 %v7090_v0 }
 0xbe1   :  { %6863 = vmatpush3.bf16.msra.mxu0 %v7093_v27  ;;  %6867 = vmatpush3.bf16.msra.mxu1 %v7093_v27 }
 0xbe2   :  { %6387 = vmatmul.mubr.msk.f32.gmra.mrb[100].mxu0 %vm65_vm3, %v8147_v8  ;;  %6412 = vmatmul.mubr.msk.f32.gmra.mrb[114].mxu1 %vm65_vm3, %v7793_v14  ;;  %v8192_v14 = vsel %vm3006_vm14, 1.0, %v7092_v4 }
 0xbe3   :  { %6389 = vmatprep.mubr.msk.f32.mxu0 %vm7091_vm0, %v7092_v4  ;;  %6414 = vmatprep.mubr.msk.f32.mxu1 %vm7091_vm0, %v7092_v4 }
 0xbe4   :  { %6864 = vmatprep.subr.bf16.mxu0 %v7090_v0  ;;  %6868 = vmatprep.subr.bf16.mxu1 %v7090_v0 }
 0xbe5   :  { %6865 = vmatpush3.bf16.msra.mxu0 %v7093_v27  ;;  %6869 = vmatpush3.bf16.msra.mxu1 %v7093_v27 }
 0xbe6   :  { %6390 = vmatmul.mubr.msk.f32.gmra.mrb[102].mxu0 %vm65_vm3, %v8162_v31  ;;  %6415 = vmatmul.mubr.msk.f32.gmra.mrb[116].mxu1 %vm65_vm3, %v7815_v61  ;;  %v5407_v61 = vld [vmem:[%s8761_s0 + $0xfa] ss:$0 sm:$0xff] }
 0xbe7   :  { %6392 = vmatprep.mubr.msk.f32.mxu0 %vm7091_vm0, %v7092_v4  ;;  %6417 = vmatprep.mubr.msk.f32.mxu1 %vm7091_vm0, %v7092_v4  ;;  %v2997_v30 = vmul.f32 %v5407_v61, %v8108_v43  ;;  %v2998_v10 = vmul.f32 %v5407_v61, %v8110_v48  ;;  %v2999_v37 = vmul.f32 %v5407_v61, %v8118_v46 }
 0xbe8   :  { %6870 = vmatprep.subr.bf16.mxu0 %v7090_v0  ;;  %6876 = vmatprep.subr.bf16.mxu1 %v7090_v0  ;;  %v3000_v46 = vmul.f32 %v5407_v61, %v8120_v17 }
 0xbea   :  { %6393 = vmatmul.mubr.msk.f32.gmra.mrb[104].mxu0 %vm65_vm3, %v8178_v32  ;;  %6418 = vmatmul.mubr.msk.f32.gmra.mrb[118].mxu1 %vm65_vm3, %v7839_v9  ;;  %v5414_v9 = vld [vmem:[%s8761_s0 + $0xf8] ss:$0 sm:$0xff] }
 0xbeb   :  { %6395 = vmatprep.mubr.msk.f32.mxu0 %vm7091_vm0, %v7092_v4  ;;  %6420 = vmatprep.mubr.msk.f32.mxu1 %vm7091_vm0, %v7092_v4 }
 0xbee   :  { %6396 = vmatmul.mubr.msk.f32.gmra.mrb[106].mxu0 %vm65_vm3, %v8192_v14  ;;  %6421 = vmatmul.mubr.msk.f32.gmra.mrb[120].mxu1 %vm65_vm3, %v7857_v45 }
 0xbef   :  { %6431 = vmatprep.mubr.msk.f32.mxu0 %vm7091_vm0, %v7092_v4  ;;  %6454 = vmatprep.mubr.msk.f32.mxu1 %vm7091_vm0, %v7092_v4 }
 0xcb1   :  { %v3106_v20 = vpop.f32.mrb[98].mxu0  ;;  %v3211_v45 = vpop.f32.mrb[112].mxu1 }
 0xcb2   :  { %v3135_v50 = vmul.f32 %v5414_v9, %v3106_v20  ;;  %v6385_v25 = vpop.f32.mrb[99].mxu0  ;;  %v3240_v35 = vmul.f32 %v5421_v6, %v3211_v45  ;;  %v6410_v49 = vpop.f32.mrb[113].mxu1 }
 0xcb4   :  { %v3140_v54 = vadd.f32 %v3135_v50, %v2997_v30 }
 0xcb5   :  { %v3111_v13 = vpop.f32.mrb[100].mxu0  ;;  %v3216_v29 = vpop.f32.mrb[114].mxu1 }
 0xcb6   :  { %v3245_v58 = vadd.f32 %v3240_v35, %v3140_v54  ;;  %v3136_v42 = vmul.f32 %v5414_v9, %v3111_v13  ;;  %v6388_v16 = vpop.f32.mrb[101].mxu0  ;;  %v3241_v33 = vmul.f32 %v5421_v6, %v3216_v29  ;;  %v6413_v52 = vpop.f32.mrb[115].mxu1 }
 0xcb7   :  { %v3001_v16 = vmul.f32 %v5407_v61, %v8128_v22 }
 0xcb8   :  { %vm3250_vm15 = vcmp.ge.f32.partialorder %v3245_v58, 0.0  ;;  %v3259_v43 = vmul.f32 %v8217_v19, %v3245_v58  ;;  %v3141_v63 = vadd.f32 %v3136_v42, %v2998_v10 }
 0xcb9   :  { %v3116_v36 = vpop.f32.mrb[102].mxu0  ;;  %v3221_v44 = vpop.f32.mrb[116].mxu1 }
 0xcba   :  { %v8222_v7 = vsel %vm3250_vm15, %v3245_v58, %v3259_v43  ;;  %v3246_v11 = vadd.f32 %v3241_v33, %v3141_v63  ;;  %v3137_v34 = vmul.f32 %v5414_v9, %v3116_v36  ;;  %v6391_v15 = vpop.f32.mrb[103].mxu0  ;;  %v3242_v23 = vmul.f32 %v5421_v6, %v3221_v44  ;;  %v6416_v20 = vpop.f32.mrb[117].mxu1 }
 0xcbb   :  { %v3379_v48 = vmul.f32 %v8222_v7, %v8222_v7  ;;  %6432 = vmatmul.mubr.msk.f32.vlgmr.msra.gmra.mrb[108].mxu0 %vm392_vm10, %v8222_v7  ;;  %vm4082_vm15 = vcmp.eq.s32.totalorder %v7757_v26, 8 }
 0xcbc   :  { %v3260_v45 = vmul.f32 %v8217_v19, %v3246_v11  ;;  %v3142_v30 = vadd.f32 %v3137_v34, %v2999_v37  ;;  %6434 = vmatprep.mubr.msk.f32.mxu0 %vm7091_vm0, %v7092_v4  ;;  %vm3251_vm1 = vcmp.ge.f32.partialorder %v3246_v11, 0.0  ;;  %v4097_v26 = vsel %vm4082_vm15, 1.0, %v7092_v4 }
 0xcbd   :  { %v3121_v50 = vpop.f32.mrb[104].mxu0  ;;  %6455 = vmatmul.mubr.msk.f32.vlgmr.msra.gmra.mrb[122].mxu1 %vm392_vm10, %v3379_v48  ;;  %v3226_v25 = vpop.f32.mrb[118].mxu1 }
 0xcbe   :  { %v3247_v35 = vadd.f32 %v3242_v23, %v3142_v30  ;;  %v3138_v49 = vmul.f32 %v5414_v9, %v3121_v50  ;;  %v6394_v54 = vpop.f32.mrb[105].mxu0  ;;  %v3243_v13 = vmul.f32 %v5421_v6, %v3226_v25  ;;  %v6419_v29 = vpop.f32.mrb[119].mxu1  ;;  %v8233_v58 = vsel %vm3251_vm1, %v3246_v11, %v3260_v45  ;;  %6457 = vmatprep.mubr.msk.f32.mxu1 %vm7091_vm0, %v7092_v4  ;;  %v2587_v45 = vld [vmem:[%s8761_s0 + $0x118] sm:$0xff]  ;;  %v2589_v50 = vld [vmem:[%s8761_s0 + $0x128] sm:$0xff] }
 0xcbf   :  { %6435 = vmatmul.mubr.msk.f32.gmra.mrb[110].mxu0 %vm392_vm10, %v8233_v58  ;;  %v3380_v17 = vmul.f32 %v8233_v58, %v8233_v58  ;;  %vm4083_vm1 = vcmp.eq.s32.totalorder %v7761_v47, 8 }
 0xcc0   :  { %v3261_v10 = vmul.f32 %v8217_v19, %v3247_v35  ;;  %v3143_v42 = vadd.f32 %v3138_v49, %v3000_v46  ;;  %6437 = vmatprep.mubr.msk.f32.mxu0 %vm7091_vm0, %v7092_v4  ;;  %vm3252_vm4 = vcmp.ge.f32.partialorder %v3247_v35, 0.0  ;;  %v2588_v46 = vld [vmem:[%s8761_s0 + $0x120] sm:$0xff]  ;;  %v3660_v49 = vld [vmem:[%s8761_s0 + $0x138] sm:$0xff] }
 0xcc1   :  { %v3126_v33 = vpop.f32.mrb[106].mxu0  ;;  %6458 = vmatmul.mubr.msk.f32.gmra.mrb[124].mxu1 %vm392_vm10, %v3380_v17  ;;  %v3231_v52 = vpop.f32.mrb[120].mxu1  ;;  %v6874_v25 = vpack.c.bf16 %v2589_v50, %v2588_v46 }
 0xcc2   :  { %v3248_v43 = vadd.f32 %v3243_v13, %v3143_v42  ;;  %v3139_v63 = vmul.f32 %v5414_v9, %v3126_v33  ;;  %v6397_v37 = vpop.f32.mrb[107].mxu0  ;;  %v3244_v36 = vmul.f32 %v5421_v6, %v3231_v52  ;;  %v8246_v44 = vsel %vm3252_vm4, %v3247_v35, %v3261_v10  ;;  %6460 = vmatprep.mubr.msk.f32.mxu1 %vm7091_vm0, %v7092_v4  ;;  %v6422_v11 = vpop.f32.mrb[121].mxu1  ;;  %v3659_v35 = vld [vmem:[%s8761_s0 + $0x130] sm:$0xff] }
 0xcc3   :  { %6438 = vmatmul.mubr.msk.f32.gmra.mrb[112].mxu0 %vm392_vm10, %v8246_v44  ;;  %v3381_v22 = vmul.f32 %v8246_v44, %v8246_v44  ;;  %v6877_v54 = vpack.c.bf16 %v3660_v49, %v3659_v35  ;;  %vm4088_vm4 = vcmp.ge.s32.totalorder %v7764_v53, 8 }
 0xcc4   :  { %v3262_v61 = vmul.f32 %v8217_v19, %v3248_v43  ;;  %v3144_v34 = vadd.f32 %v3139_v63, %v3001_v16  ;;  %6440 = vmatprep.mubr.msk.f32.mxu0 %vm7091_vm0, %v7092_v4  ;;  %vm3253_vm5 = vcmp.ge.f32.partialorder %v3248_v43, 0.0 }
 0xcc5   :  { %6461 = vmatmul.mubr.msk.f32.gmra.mrb[126].mxu1 %vm392_vm10, %v3381_v22 }
 0xcc6   :  { %v3249_v9 = vadd.f32 %v3244_v36, %v3144_v34  ;;  %v8258_v6 = vsel %vm3253_vm5, %v3248_v43, %v3262_v61  ;;  %6463 = vmatprep.mubr.msk.f32.mxu1 %vm7091_vm0, %v7092_v4  ;;  %6878 = vmatpush3.bf16.msra.mxu1 %v6877_v54  ;;  %vm4093_vm5 = vmand %vm4083_vm1, %vm4088_vm4 }
 0xcc7   :  { %6441 = vmatmul.mubr.msk.f32.gmra.mrb[114].mxu0 %vm392_vm10, %v8258_v6  ;;  %v3382_v15 = vmul.f32 %v8258_v6, %v8258_v6  ;;  %6883 = vmatprep.subr.bf16.mxu1 %v7090_v0 }
 0xcc8   :  { %v3263_v23 = vmul.f32 %v8217_v19, %v3249_v9  ;;  %6443 = vmatprep.mubr.msk.f32.mxu0 %vm7091_vm0, %v7092_v4  ;;  %vm3254_vm6 = vcmp.ge.f32.partialorder %v3249_v9, 0.0  ;;  %v2586_v19 = vld [vmem:[%s8761_s0 + $0x110] sm:$0xff] }
 0xcc9   :  { %6464 = vmatmul.mubr.msk.f32.gmra.mrb[128].mxu1 %vm392_vm10, %v3382_v15  ;;  %v6871_v30 = vpack.c.bf16 %v2587_v45, %v2586_v19 }
 0xcca   :  { %v8270_v20 = vsel %vm3254_vm6, %v3249_v9, %v3263_v23  ;;  %6466 = vmatprep.mubr.msk.f32.mxu1 %vm7091_vm0, %v7092_v4  ;;  %vm4084_vm6 = vcmp.eq.s32.totalorder %v7802_v60, 8  ;;  %v5458_v60 = vld [vmem:[%s8761_s0 + $0x152] ss:$0 sm:$0xff] }
 0xccb   :  { %6444 = vmatmul.mubr.msk.f32.gmra.mrb[116].mxu0 %vm392_vm10, %v8270_v20  ;;  %v3383_v48 = vmul.f32 %v8270_v20, %v8270_v20 }
 0xccc   :  { %6477 = vmatprep.mubr.msk.f32.mxu0 %vm7091_vm0, %v7092_v4  ;;  %6872 = vmatpush3.bf16.msra.mxu0 %v6871_v30 }
 0xccd   :  { %6467 = vmatmul.mubr.msk.f32.gmra.mrb[130].mxu1 %vm392_vm10, %v3383_v48  ;;  %6873 = vmatprep.subr.bf16.mxu0 %v7090_v0 }
 0xcce   :  { %6496 = vmatprep.mubr.msk.f32.mxu1 %vm7091_vm0, %v7092_v4 }
 0xcd0   :  { %6875 = vmatpush3.bf16.msra.mxu0 %v6874_v25 }
 0xcd1   :  { %6879 = vmatprep.subr.bf16.mxu0 %v7090_v0 }
 0xd8e   :  { %v3350_v13 = vpop.f32.mrb[108].mxu0 }
 0xd8f   :  { %v3374_v29 = vmul.f32 0.03125, %v3350_v13  ;;  %v6433_v17 = vpop.f32.mrb[109].mxu0 }
 0xd90   :  { %v3465_v10 = vpop.f32.mrb[122].mxu1 }
 0xd91   :  { %v3494_v42 = vmul.f32 %v3374_v29, %v3374_v29  ;;  %v3489_v16 = vmul.f32 0.03125, %v3465_v10  ;;  %v6456_v33 = vpop.f32.mrb[123].mxu1 }
 0xd92   :  { %v3355_v52 = vpop.f32.mrb[110].mxu0 }
 0xd93   :  { %v3499_v43 = vsub.f32 %v3489_v16, %v3494_v42  ;;  %v3375_v63 = vmul.f32 0.03125, %v3355_v52  ;;  %v6436_v37 = vpop.f32.mrb[111].mxu0 }
 0xd94   :  { %v3470_v36 = vpop.f32.mrb[124].mxu1 }
 0xd95   :  { %v3504_v11 = vmax.f32 %v3499_v43, 0.0  ;;  %v3495_v22 = vmul.f32 %v3375_v63, %v3375_v63  ;;  %v3490_v61 = vmul.f32 0.03125, %v3470_v36  ;;  %v6459_v34 = vpop.f32.mrb[125].mxu1 }
 0xd96   :  { %v3360_v9 = vpop.f32.mrb[112].mxu0 }
 0xd97   :  { %v3514_v15 = vadd.f32 1e-05, %v3504_v11  ;;  %v3500_v23 = vsub.f32 %v3490_v61, %v3495_v22  ;;  %v3376_v48 = vmul.f32 0.03125, %v3360_v9  ;;  %v6439_v19 = vpop.f32.mrb[113].mxu0 }
 0xd98   :  { %v3475_v45 = vpop.f32.mrb[126].mxu1  ;;  %v3509_v19 = vsub.f32 %v8222_v7, %v3374_v29 }
 0xd99   :  { %7020 = vrsqrt.f32 %v3514_v15  ;;  %v3505_v30 = vmax.f32 %v3500_v23, 0.0  ;;  %v3496_v46 = vmul.f32 %v3376_v48, %v3376_v48  ;;  %v6462_v50 = vpop.f32.mrb[127].mxu1  ;;  %v3491_v25 = vmul.f32 0.03125, %v3475_v45 }
 0xd9a   :  { %v3365_v35 = vpop.f32.mrb[114].mxu0 }
 0xd9b   :  { %v3515_v49 = vadd.f32 1e-05, %v3505_v30  ;;  %v3377_v54 = vmul.f32 0.03125, %v3365_v35  ;;  %v6442_v13 = vpop.f32.mrb[115].mxu0  ;;  %v3501_v17 = vsub.f32 %v3491_v25, %v3496_v46  ;;  %v5433_v30 = vld [vmem:[%s8761_s0 + $0x100] ss:$0 sm:$0xff] }
 0xd9c   :  { %v3480_v10 = vpop.f32.mrb[128].mxu1 }
 0xd9d   :  { %7022 = vrsqrt.f32 %v3515_v49  ;;  %v3497_v42 = vmul.f32 %v3377_v54, %v3377_v54  ;;  %v3492_v16 = vmul.f32 0.03125, %v3480_v10  ;;  %v6465_v33 = vpop.f32.mrb[129].mxu1  ;;  %v3506_v52 = vmax.f32 %v3501_v17, 0.0  ;;  %v5434_v49 = vld [vmem:[%s8761_s0 + $0x108] ss:$0 sm:$0xff] }
 0xd9e   :  { %v3370_v43 = vpop.f32.mrb[116].mxu0  ;;  %v3510_v17 = vsub.f32 %v8233_v58, %v3375_v63  ;;  %v3511_v33 = vsub.f32 %v8246_v44, %v3376_v48  ;;  %v3512_v63 = vsub.f32 %v8258_v6, %v3377_v54 }
 0xd9f   :  { %v3502_v37 = vsub.f32 %v3492_v16, %v3497_v42  ;;  %v3378_v36 = vmul.f32 0.03125, %v3370_v43  ;;  %v6445_v11 = vpop.f32.mrb[117].mxu0  ;;  %v3516_v22 = vadd.f32 1e-05, %v3506_v52 }
 0xda0   :  { %v3485_v61 = vpop.f32.mrb[130].mxu1 }
 0xda1   :  { %v3507_v34 = vmax.f32 %v3502_v37, 0.0  ;;  %v3498_v9 = vmul.f32 %v3378_v36, %v3378_v36  ;;  %v3493_v15 = vmul.f32 0.03125, %v3485_v61  ;;  %v6468_v23 = vpop.f32.mrb[131].mxu1  ;;  %7024 = vrsqrt.f32 %v3516_v22 }
 0xda2   :  { %v3513_v22 = vsub.f32 %v8270_v20, %v3378_v36 }
 0xda3   :  { %v7021_v45 = vpop.eup %7020  ;;  %v3517_v46 = vadd.f32 1e-05, %v3507_v34  ;;  %v3503_v50 = vsub.f32 %v3493_v15, %v3498_v9 }
 0xda4   :  { %v3524_v25 = vmul.f32 %v7021_v45, %v3509_v19 }
 0xda5   :  { %7026 = vrsqrt.f32 %v3517_v46  ;;  %v3508_v35 = vmax.f32 %v3503_v50, 0.0 }
 0xda6   :  { %v3533_v13 = vmul.f32 %v5433_v30, %v3524_v25 }
 0xda7   :  { %v7023_v10 = vpop.eup %7022  ;;  %v3518_v7 = vadd.f32 1e-05, %v3508_v35 }
 0xda8   :  { %v3542_v29 = vadd.f32 %v5434_v49, %v3533_v13  ;;  %v3525_v42 = vmul.f32 %v7023_v10, %v3510_v17 }
 0xda9   :  { %7028 = vrsqrt.f32 %v3518_v7 }
 0xdaa   :  { %6478 = vmatmul.mubr.msk.f32.vlgmr.msra.gmra.mrb[118].mxu0 %vm392_vm10, %v3542_v29  ;;  %v3534_v16 = vmul.f32 %v5433_v30, %v3525_v42 }
 0xdab   :  { %6480 = vmatprep.mubr.msk.f32.mxu0 %vm7091_vm0, %v7092_v4  ;;  %6880 = vmatpush3.bf16.msra.mxu0 %v7093_v27  ;;  %v7025_v52 = vpop.eup %7024 }
 0xdac   :  { %v3543_v43 = vadd.f32 %v5434_v49, %v3534_v16  ;;  %6881 = vmatprep.subr.bf16.mxu0 %v7090_v0  ;;  %v3526_v58 = vmul.f32 %v7025_v52, %v3511_v33 }
 0xdae   :  { %6481 = vmatmul.mubr.msk.f32.gmra.mrb[120].mxu0 %vm392_vm10, %v3543_v43  ;;  %v3535_v11 = vmul.f32 %v5433_v30, %v3526_v58 }
 0xdaf   :  { %v7027_v37 = vpop.eup %7026  ;;  %6483 = vmatprep.mubr.msk.f32.mxu0 %vm7091_vm0, %v7092_v4  ;;  %6882 = vmatpush3.bf16.msra.mxu0 %v7093_v27 }
 0xdb0   :  { %v3527_v44 = vmul.f32 %v7027_v37, %v3512_v63  ;;  %6887 = vmatprep.subr.bf16.mxu0 %v7090_v0  ;;  %v3544_v48 = vadd.f32 %v5434_v49, %v3535_v11 }
 0xdb2   :  { %v3536_v61 = vmul.f32 %v5433_v30, %v3527_v44  ;;  %6484 = vmatmul.mubr.msk.f32.gmra.mrb[122].mxu0 %vm392_vm10, %v3544_v48 }
 0xdb3   :  { %v7029_v34 = vpop.eup %7028  ;;  %6486 = vmatprep.mubr.msk.f32.mxu0 %vm7091_vm0, %v7092_v4 }
 0xdb4   :  { %v3545_v6 = vadd.f32 %v5434_v49, %v3536_v61  ;;  %v3528_v54 = vmul.f32 %v7029_v34, %v3513_v22 }
 0xdb6   :  { %v3537_v9 = vmul.f32 %v5433_v30, %v3528_v54  ;;  %6487 = vmatmul.mubr.msk.f32.gmra.mrb[124].mxu0 %vm392_vm10, %v3545_v6 }
 0xdb7   :  { %6489 = vmatprep.mubr.msk.f32.mxu0 %vm7091_vm0, %v7092_v4 }
 0xdb8   :  { %v3546_v15 = vadd.f32 %v5434_v49, %v3537_v9 }
 0xdba   :  { %6490 = vmatmul.mubr.msk.f32.gmra.mrb[126].mxu0 %vm392_vm10, %v3546_v15 }
 0xdbb   :  { %6519 = vmatprep.mubr.msk.f32.mxu0 %vm7091_vm0, %v7092_v4 }
 0xe7d   :  { %v3628_v20 = vpop.f32.mrb[118].mxu0 }
 0xe7e   :  { %v8335_v36 = vadd.f32 %v3628_v20, %v8003_v55  ;;  %v6479_v23 = vpop.f32.mrb[119].mxu0 }
 0xe80   :  { %6497 = vmatmul.mubr.msk.f32.vlgmr.msra.gmra.mrb[132].mxu1 %vm1470_vm11, %v8335_v36 }
 0xe81   :  { %v3633_v19 = vpop.f32.mrb[120].mxu0  ;;  %6499 = vmatprep.mubr.msk.f32.mxu1 %vm7091_vm0, %v7092_v4  ;;  %6884 = vmatpush3.bf16.msra.mxu1 %v7093_v27 }
 0xe82   :  { %v8343_v45 = vadd.f32 %v3633_v19, %v8011_v3  ;;  %v6482_v30 = vpop.f32.mrb[121].mxu0  ;;  %6885 = vmatprep.subr.bf16.mxu1 %v7090_v0 }
 0xe84   :  { %6500 = vmatmul.mubr.msk.f32.gmra.mrb[134].mxu1 %vm1470_vm11, %v8343_v45 }
 0xe85   :  { %6502 = vmatprep.mubr.msk.f32.mxu1 %vm7091_vm0, %v7092_v4  ;;  %6886 = vmatpush3.bf16.msra.mxu1 %v7093_v27  ;;  %v3638_v55 = vpop.f32.mrb[122].mxu0 }
 0xe86   :  { %6893 = vmatprep.subr.bf16.mxu1 %v7090_v0  ;;  %v8353_v46 = vadd.f32 %v3638_v55, %v8021_v38  ;;  %v6485_v50 = vpop.f32.mrb[123].mxu0 }
 0xe88   :  { %6503 = vmatmul.mubr.msk.f32.gmra.mrb[136].mxu1 %vm1470_vm11, %v8353_v46 }
 0xe89   :  { %v3643_v3 = vpop.f32.mrb[124].mxu0  ;;  %6505 = vmatprep.mubr.msk.f32.mxu1 %vm7091_vm0, %v7092_v4 }
 0xe8a   :  { %v8360_v25 = vadd.f32 %v3643_v3, %v8028_v24  ;;  %v6488_v35 = vpop.f32.mrb[125].mxu0  ;;  %v5445_v24 = vld [vmem:[%s8761_s0 + $0x4] ss:$0 sm:$0xff] }
 0xe8c   :  { %6506 = vmatmul.mubr.msk.f32.gmra.mrb[138].mxu1 %vm1470_vm11, %v8360_v25 }
 0xe8d   :  { %v3648_v49 = vpop.f32.mrb[126].mxu0  ;;  %6508 = vmatprep.mubr.msk.f32.mxu1 %vm7091_vm0, %v7092_v4 }
 0xe8e   :  { %v8367_v38 = vadd.f32 %v3648_v49, %v8035_v51  ;;  %v6491_v13 = vpop.f32.mrb[127].mxu0 }
 0xe90   :  { %6509 = vmatmul.mubr.msk.f32.gmra.mrb[140].mxu1 %vm1470_vm11, %v8367_v38 }
 0xe91   :  { %6542 = vmatprep.mubr.msk.f32.mxu1 %vm7091_vm0, %v7092_v4 }
 0xf53   :  { %v3750_v17 = vpop.f32.mrb[132].mxu1 }
 0xf54   :  { %vm3774_vm7 = vcmp.ge.f32.partialorder %v3750_v17, 0.0  ;;  %v3783_v10 = vmul.f32 %v5445_v24, %v3750_v17  ;;  %v6498_v7 = vpop.f32.mrb[133].mxu1 }
 0xf56   :  { %v8376_v29 = vsel %vm3774_vm7, %v3750_v17, %v3783_v10 }
 0xf57   :  { %v3903_v51 = vmul.f32 %v8376_v29, %v8376_v29  ;;  %v3755_v42 = vpop.f32.mrb[134].mxu1  ;;  %6520 = vmatmul.mubr.msk.f32.vlgmr.msra.gmra.mrb[128].mxu0 %vm392_vm10, %v8376_v29 }
 0xf58   :  { %vm3775_vm8 = vcmp.ge.f32.partialorder %v3755_v42, 0.0  ;;  %v3784_v16 = vmul.f32 %v5445_v24, %v3755_v42  ;;  %v6501_v33 = vpop.f32.mrb[135].mxu1  ;;  %6522 = vmatprep.mubr.msk.f32.mxu0 %vm7091_vm0, %v7092_v4 }
 0xf59   :  { %6543 = vmatmul.mubr.msk.f32.vlgmr.msra.gmra.mrb[142].mxu1 %vm392_vm10, %v3903_v51 }
 0xf5a   :  { %v8385_v52 = vsel %vm3775_vm8, %v3755_v42, %v3784_v16  ;;  %6545 = vmatprep.mubr.msk.f32.mxu1 %vm7091_vm0, %v7092_v4 }
 0xf5b   :  { %6523 = vmatmul.mubr.msk.f32.gmra.mrb[130].mxu0 %vm392_vm10, %v8385_v52  ;;  %v3904_v43 = vmul.f32 %v8385_v52, %v8385_v52  ;;  %v3760_v58 = vpop.f32.mrb[136].mxu1 }
 0xf5c   :  { %6525 = vmatprep.mubr.msk.f32.mxu0 %vm7091_vm0, %v7092_v4  ;;  %vm3776_vm12 = vcmp.ge.f32.partialorder %v3760_v58, 0.0  ;;  %v3785_v63 = vmul.f32 %v5445_v24, %v3760_v58  ;;  %v6504_v37 = vpop.f32.mrb[137].mxu1 }
 0xf5d   :  { %6546 = vmatmul.mubr.msk.f32.gmra.mrb[144].mxu1 %vm392_vm10, %v3904_v43 }
 0xf5e   :  { %6548 = vmatprep.mubr.msk.f32.mxu1 %vm7091_vm0, %v7092_v4  ;;  %v8398_v11 = vsel %vm3776_vm12, %v3760_v58, %v3785_v63  ;;  %vm4085_vm12 = vcmp.eq.s32.totalorder %v7826_v41, 8  ;;  %v5464_v41 = vld [vmem:[%s8761_s0 + $0x150] ss:$0 sm:$0xff] }
 0xf5f   :  { %v3765_v44 = vpop.f32.mrb[138].mxu1  ;;  %6526 = vmatmul.mubr.msk.f32.gmra.mrb[132].mxu0 %vm392_vm10, %v8398_v11  ;;  %v3905_v48 = vmul.f32 %v8398_v11, %v8398_v11 }
 0xf60   :  { %vm3777_vm13 = vcmp.ge.f32.partialorder %v3765_v44, 0.0  ;;  %v3786_v22 = vmul.f32 %v5445_v24, %v3765_v44  ;;  %v6507_v61 = vpop.f32.mrb[139].mxu1  ;;  %6528 = vmatprep.mubr.msk.f32.mxu0 %vm7091_vm0, %v7092_v4 }
 0xf61   :  { %6549 = vmatmul.mubr.msk.f32.gmra.mrb[146].mxu1 %vm392_vm10, %v3905_v48 }
 0xf62   :  { %v8407_v34 = vsel %vm3777_vm13, %v3765_v44, %v3786_v22  ;;  %6551 = vmatprep.mubr.msk.f32.mxu1 %vm7091_vm0, %v7092_v4 }
 0xf63   :  { %v3770_v6 = vpop.f32.mrb[140].mxu1  ;;  %6529 = vmatmul.mubr.msk.f32.gmra.mrb[134].mxu0 %vm392_vm10, %v8407_v34  ;;  %v3906_v54 = vmul.f32 %v8407_v34, %v8407_v34 }
 0xf64   :  { %vm3778_vm14 = vcmp.ge.f32.partialorder %v3770_v6, 0.0  ;;  %v3787_v9 = vmul.f32 %v5445_v24, %v3770_v6  ;;  %v6510_v15 = vpop.f32.mrb[141].mxu1  ;;  %6531 = vmatprep.mubr.msk.f32.mxu0 %vm7091_vm0, %v7092_v4 }
 0xf65   :  { %6552 = vmatmul.mubr.msk.f32.gmra.mrb[148].mxu1 %vm392_vm10, %v3906_v54 }
 0xf66   :  { %v8418_v20 = vsel %vm3778_vm14, %v3770_v6, %v3787_v9  ;;  %6554 = vmatprep.mubr.msk.f32.mxu1 %vm7091_vm0, %v7092_v4 }
 0xf67   :  { %6532 = vmatmul.mubr.msk.f32.gmra.mrb[136].mxu0 %vm392_vm10, %v8418_v20  ;;  %v3907_v23 = vmul.f32 %v8418_v20, %v8418_v20 }
 0xf68   :  { %6567 = vmatprep.mubr.msk.f32.mxu0 %vm7091_vm0, %v7092_v4 }
 0xf69   :  { %6555 = vmatmul.mubr.msk.f32.gmra.mrb[150].mxu1 %vm392_vm10, %v3907_v23 }
 0xf6a   :  { %6592 = vmatprep.mubr.msk.f32.mxu1 %vm7091_vm0, %v7092_v4 }
0x102a   :  { %v3874_v19 = vpop.f32.mrb[128].mxu0 }
0x102b   :  { %v3898_v30 = vmul.f32 0.03125, %v3874_v19  ;;  %v6521_v55 = vpop.f32.mrb[129].mxu0 }
0x102c   :  { %v3989_v50 = vpop.f32.mrb[142].mxu1 }
0x102d   :  { %v4018_v3 = vmul.f32 %v3898_v30, %v3898_v30  ;;  %v4013_v35 = vmul.f32 0.03125, %v3989_v50  ;;  %v6544_v49 = vpop.f32.mrb[143].mxu1 }
0x102e   :  { %v3879_v13 = vpop.f32.mrb[130].mxu0 }
0x102f   :  { %v4023_v24 = vsub.f32 %v4013_v35, %v4018_v3  ;;  %v3899_v17 = vmul.f32 0.03125, %v3879_v13  ;;  %v6524_v10 = vpop.f32.mrb[131].mxu0 }
0x1030   :  { %v3994_v7 = vpop.f32.mrb[144].mxu1 }
0x1031   :  { %v4028_v51 = vmax.f32 %v4023_v24, 0.0  ;;  %v4019_v42 = vmul.f32 %v3899_v17, %v3899_v17  ;;  %v4014_v16 = vmul.f32 0.03125, %v3994_v7  ;;  %v6547_v33 = vpop.f32.mrb[145].mxu1 }
0x1032   :  { %v3884_v63 = vpop.f32.mrb[132].mxu0  ;;  %v4033_v33 = vsub.f32 %v8376_v29, %v3898_v30 }
0x1033   :  { %v4038_v43 = vadd.f32 1e-05, %v4028_v51  ;;  %v4024_v58 = vsub.f32 %v4014_v16, %v4019_v42  ;;  %v3900_v37 = vmul.f32 0.03125, %v3884_v63  ;;  %v6527_v44 = vpop.f32.mrb[133].mxu0 }
0x1034   :  { %v3999_v22 = vpop.f32.mrb[146].mxu1 }
0x1035   :  { %7030 = vrsqrt.f32 %v4038_v43  ;;  %v4029_v48 = vmax.f32 %v4024_v58, 0.0  ;;  %v4020_v61 = vmul.f32 %v3900_v37, %v3900_v37  ;;  %v4015_v6 = vmul.f32 0.03125, %v3999_v22  ;;  %v6550_v54 = vpop.f32.mrb[147].mxu1 }
0x1036   :  { %v3889_v15 = vpop.f32.mrb[134].mxu0  ;;  %v5456_v54 = vld [vmem:[%s8761_s0 + $0x140] ss:$0 sm:$0xff] }
0x1037   :  { %v4039_v9 = vadd.f32 1e-05, %v4029_v48  ;;  %v4025_v23 = vsub.f32 %v4015_v6, %v4020_v61  ;;  %v3901_v19 = vmul.f32 0.03125, %v3889_v15  ;;  %v6530_v55 = vpop.f32.mrb[135].mxu0 }
0x1038   :  { %v4004_v50 = vpop.f32.mrb[148].mxu1 }
0x1039   :  { %7032 = vrsqrt.f32 %v4039_v9  ;;  %v4030_v3 = vmax.f32 %v4025_v23, 0.0  ;;  %v4021_v35 = vmul.f32 %v3901_v19, %v3901_v19  ;;  %v4016_v49 = vmul.f32 0.03125, %v4004_v50  ;;  %v6553_v13 = vpop.f32.mrb[149].mxu1  ;;  %v5457_v50 = vld [vmem:[%s8761_s0 + $0x148] ss:$0 sm:$0xff] }
0x103a   :  { %v3894_v24 = vpop.f32.mrb[136].mxu0  ;;  %v4034_v9 = vsub.f32 %v8385_v52, %v3899_v17 }
0x103b   :  { %v4040_v10 = vadd.f32 1e-05, %v4030_v3  ;;  %v4026_v7 = vsub.f32 %v4016_v49, %v4021_v35  ;;  %v3902_v51 = vmul.f32 0.03125, %v3894_v24  ;;  %v6533_v42 = vpop.f32.mrb[137].mxu0  ;;  %v4035_v35 = vsub.f32 %v8398_v11, %v3900_v37 }
0x103c   :  { %v4009_v16 = vpop.f32.mrb[150].mxu1 }
0x103d   :  { %7034 = vrsqrt.f32 %v4040_v10  ;;  %v4031_v43 = vmax.f32 %v4026_v7, 0.0  ;;  %v4022_v58 = vmul.f32 %v3902_v51, %v3902_v51  ;;  %v6556_v63 = vpop.f32.mrb[151].mxu1  ;;  %v4017_v48 = vmul.f32 0.03125, %v4009_v16 }
0x103e   :  { %v4036_v10 = vsub.f32 %v8407_v34, %v3901_v19  ;;  %v4037_v16 = vsub.f32 %v8418_v20, %v3902_v51  ;;  %v5268_v20 = vadd.s32 4294967279, %v7172_v18  ;;  %v4098_v18 = vsel %vm4093_vm5, 1.0, %v7092_v4 }
0x103f   :  { %v7031_v44 = vpop.eup %7030  ;;  %v4041_v22 = vadd.f32 1e-05, %v4031_v43  ;;  %v4027_v6 = vsub.f32 %v4017_v48, %v4022_v58 }
0x1040   :  { %v4048_v61 = vmul.f32 %v7031_v44, %v4033_v33  ;;  %vm4089_vm7 = vcmp.ge.s32.totalorder %v5268_v20, 8 }
0x1041   :  { %7036 = vrsqrt.f32 %v4041_v22  ;;  %v4032_v23 = vmax.f32 %v4027_v6, 0.0  ;;  %vm4094_vm8 = vmand %vm4084_vm6, %vm4089_vm7  ;;  %v8532_v6 = vld [vmem:[%s8761_s0 + $0x5] ss:$0 sm:$0xff] }
0x1042   :  { %v4057_v29 = vmul.f32 %v5456_v54, %v4048_v61  ;;  %v4099_v47 = vsel %vm4094_vm8, 1.0, %v7092_v4 }
0x1043   :  { %v7033_v15 = vpop.eup %7032  ;;  %v4042_v30 = vadd.f32 1e-05, %v4032_v23 }
0x1044   :  { %v4049_v55 = vmul.f32 %v7033_v15, %v4034_v9  ;;  %v8440_v13 = vadd.f32 %v5457_v50, %v4057_v29 }
0x1045   :  { %7038 = vrsqrt.f32 %v4042_v30 }
0x1046   :  { %v4058_v3 = vmul.f32 %v5456_v54, %v4049_v55 }
0x1047   :  { %v7035_v49 = vpop.eup %7034 }
0x1048   :  { %v8442_v24 = vadd.f32 %v5457_v50, %v4058_v3  ;;  %v4050_v52 = vmul.f32 %v7035_v49, %v4035_v35 }
0x104a   :  { %v6888_v17 = vpack.c.bf16 %v8442_v24, %v8440_v13  ;;  %v4059_v37 = vmul.f32 %v5456_v54, %v4050_v52  ;;  %v4077_v23 = vmul.f32 %v5458_v60, %v8442_v24 }
0x104b   :  { %v7037_v7 = vpop.eup %7036 }
0x104c   :  { %6889 = vmatpush3.bf16.msra.mxu0 %v6888_v17  ;;  %6895 = vmatpush3.bf16.msra.mxu1 %v6888_v17  ;;  %v4051_v11 = vmul.f32 %v7037_v7, %v4036_v10  ;;  %v8450_v43 = vadd.f32 %v5457_v50, %v4059_v37 }
0x104d   :  { %6890 = vmatprep.subr.bf16.mxu0 %v7090_v0  ;;  %6896 = vmatprep.subr.bf16.mxu1 %v7090_v0 }
0x104e   :  { %v4060_v42 = vmul.f32 %v5456_v54, %v4051_v11  ;;  %v4078_v49 = vmul.f32 %v5458_v60, %v8450_v43 }
0x104f   :  { %v7039_v33 = vpop.eup %7038 }
0x1050   :  { %v8452_v58 = vadd.f32 %v5457_v50, %v4060_v42  ;;  %v4052_v63 = vmul.f32 %v7039_v33, %v4037_v16 }
0x1052   :  { %v6891_v34 = vpack.c.bf16 %v8452_v58, %v8450_v43  ;;  %v4061_v19 = vmul.f32 %v5456_v54, %v4052_v63  ;;  %v4079_v43 = vmul.f32 %v5458_v60, %v8452_v58 }
0x1054   :  { %6892 = vmatpush3.bf16.msra.mxu0 %v6891_v34  ;;  %6898 = vmatpush3.bf16.msra.mxu1 %v6891_v34  ;;  %v8458_v44 = vadd.f32 %v5457_v50, %v4061_v19 }
0x1055   :  { %6565 = vmatprep.subr.mxu0 %v7092_v4  ;;  %6590 = vmatprep.subr.mxu1 %v7092_v4 }
0x1058   :  { %6566 = vmatpush3.msk.msra.mxu0 %vm81_vm2, %v8458_v44  ;;  %6591 = vmatpush3.msk.msra.mxu1 %vm81_vm2, %v8458_v44 }
0x1059   :  { %6568 = vmatmul.mubr.f32.vlgmr.msra.gmra.mrb[138].mxu0 %v7092_v4  ;;  %6593 = vmatmul.mubr.msk.f32.vlgmr.msra.gmra.mrb[152].mxu1 %vm65_vm3, %v8131_v56  ;;  %v5471_v56 = vld [vmem:[%s8761_s0 + $0x151] ss:$0 sm:$0xff] }
0x105a   :  { %6570 = vmatprep.mubr.msk.f32.mxu0 %vm7091_vm0, %v7092_v4  ;;  %6595 = vmatprep.mubr.msk.f32.mxu1 %vm7091_vm0, %v7092_v4 }
0x105b   :  { %6899 = vmatprep.subr.bf16.mxu0 %v7090_v0  ;;  %6903 = vmatprep.subr.bf16.mxu1 %v7090_v0 }
0x105c   :  { %6900 = vmatpush3.bf16.msra.mxu0 %v7093_v27  ;;  %6904 = vmatpush3.bf16.msra.mxu1 %v7093_v27 }
0x105d   :  { %6571 = vmatmul.mubr.msk.f32.gmra.mrb[140].mxu0 %vm65_vm3, %v4097_v26  ;;  %6596 = vmatmul.mubr.msk.f32.gmra.mrb[154].mxu1 %vm65_vm3, %v8147_v8 }
0x105e   :  { %6573 = vmatprep.mubr.msk.f32.mxu0 %vm7091_vm0, %v7092_v4  ;;  %6598 = vmatprep.mubr.msk.f32.mxu1 %vm7091_vm0, %v7092_v4 }
0x105f   :  { %6901 = vmatprep.subr.bf16.mxu0 %v7090_v0  ;;  %6905 = vmatprep.subr.bf16.mxu1 %v7090_v0 }
0x1060   :  { %6902 = vmatpush3.bf16.msra.mxu0 %v7093_v27  ;;  %6906 = vmatpush3.bf16.msra.mxu1 %v7093_v27  ;;  %v4100_v27 = vsel %vm4085_vm12, 1.0, %v7092_v4 }
0x1061   :  { %6574 = vmatmul.mubr.msk.f32.gmra.mrb[142].mxu0 %vm65_vm3, %v4098_v18  ;;  %6599 = vmatmul.mubr.msk.f32.gmra.mrb[156].mxu1 %vm65_vm3, %v8162_v31 }
0x1062   :  { %6576 = vmatprep.mubr.msk.f32.mxu0 %vm7091_vm0, %v7092_v4  ;;  %6601 = vmatprep.mubr.msk.f32.mxu1 %vm7091_vm0, %v7092_v4 }
0x1063   :  { %6907 = vmatprep.subr.bf16.mxu0 %v7090_v0  ;;  %6913 = vmatprep.subr.bf16.mxu1 %v7090_v0 }
0x1065   :  { %6577 = vmatmul.mubr.msk.f32.gmra.mrb[144].mxu0 %vm65_vm3, %v4099_v47  ;;  %6602 = vmatmul.mubr.msk.f32.gmra.mrb[158].mxu1 %vm65_vm3, %v8178_v32  ;;  %v4076_v32 = vmul.f32 %v5458_v60, %v8440_v13 }
0x1066   :  { %6579 = vmatprep.mubr.msk.f32.mxu0 %vm7091_vm0, %v7092_v4  ;;  %6604 = vmatprep.mubr.msk.f32.mxu1 %vm7091_vm0, %v7092_v4 }
0x1069   :  { %6580 = vmatmul.mubr.msk.f32.gmra.mrb[146].mxu0 %vm65_vm3, %v4100_v27  ;;  %6605 = vmatmul.mubr.msk.f32.gmra.mrb[160].mxu1 %vm65_vm3, %v8192_v14 }
0x106a   :  { %6615 = vmatprep.mubr.msk.f32.mxu0 %vm7091_vm0, %v7092_v4  ;;  %6638 = vmatprep.mubr.msk.f32.mxu1 %vm7091_vm0, %v7092_v4 }
0x112c   :  { %v4185_v8 = vpop.f32.mrb[138].mxu0  ;;  %v4290_v31 = vpop.f32.mrb[152].mxu1 }
0x112d   :  { %v4214_v14 = vmul.f32 %v5464_v41, %v4185_v8  ;;  %v6569_v51 = vpop.f32.mrb[139].mxu0  ;;  %v4319_v48 = vmul.f32 %v5471_v56, %v4290_v31  ;;  %v6594_v22 = vpop.f32.mrb[153].mxu1 }
0x112f   :  { %v4219_v61 = vadd.f32 %v4214_v14, %v4076_v32  ;;  %v4080_v32 = vmul.f32 %v5458_v60, %v8458_v44 }
0x1130   :  { %v4190_v54 = vpop.f32.mrb[140].mxu0  ;;  %v4295_v9 = vpop.f32.mrb[154].mxu1 }
0x1131   :  { %v4324_v15 = vadd.f32 %v4319_v48, %v4219_v61  ;;  %v4215_v55 = vmul.f32 %v5464_v41, %v4190_v54  ;;  %v6572_v29 = vpop.f32.mrb[141].mxu0  ;;  %v4320_v30 = vmul.f32 %v5471_v56, %v4295_v9  ;;  %v6597_v50 = vpop.f32.mrb[155].mxu1 }
0x1133   :  { %vm4329_vm13 = vcmp.ge.f32.partialorder %v4324_v15, 0.0  ;;  %v4338_v3 = vmul.f32 %v8532_v6, %v4324_v15  ;;  %v4220_v35 = vadd.f32 %v4215_v55, %v4077_v23 }
0x1134   :  { %v4195_v13 = vpop.f32.mrb[142].mxu0  ;;  %v4300_v52 = vpop.f32.mrb[156].mxu1 }
0x1135   :  { %v8537_v17 = vsel %vm4329_vm13, %v4324_v15, %v4338_v3  ;;  %v4325_v10 = vadd.f32 %v4320_v30, %v4220_v35  ;;  %v4216_v7 = vmul.f32 %v5464_v41, %v4195_v13  ;;  %v6575_v11 = vpop.f32.mrb[143].mxu0  ;;  %v4321_v37 = vmul.f32 %v5471_v56, %v4300_v52  ;;  %v6600_v42 = vpop.f32.mrb[157].mxu1  ;;  %v3666_v3 = vld [vmem:[%s8761_s0 + $0x170] sm:$0xff]  ;;  %v3668_v13 = vld [vmem:[%s8761_s0 + $0x180] sm:$0xff] }
0x1136   :  { %v4458_v24 = vmul.f32 %v8537_v17, %v8537_v17  ;;  %6616 = vmatmul.mubr.msk.f32.vlgmr.msra.gmra.mrb[148].mxu0 %vm392_vm10, %v8537_v17 }
0x1137   :  { %v4339_v16 = vmul.f32 %v8532_v6, %v4325_v10  ;;  %v4221_v33 = vadd.f32 %v4216_v7, %v4078_v49  ;;  %6618 = vmatprep.mubr.msk.f32.mxu0 %vm7091_vm0, %v7092_v4  ;;  %vm4330_vm14 = vcmp.ge.f32.partialorder %v4325_v10, 0.0  ;;  %v3667_v49 = vld [vmem:[%s8761_s0 + $0x178] sm:$0xff]  ;;  %v4737_v7 = vld [vmem:[%s8761_s0 + $0x48] sm:$0xff] }
0x1138   :  { %v4200_v63 = vpop.f32.mrb[144].mxu0  ;;  %6639 = vmatmul.mubr.msk.f32.vlgmr.msra.gmra.mrb[162].mxu1 %vm392_vm10, %v4458_v24  ;;  %v4305_v34 = vpop.f32.mrb[158].mxu1  ;;  %v6911_v52 = vpack.c.bf16 %v3668_v13, %v3667_v49 }
0x1139   :  { %v4326_v19 = vadd.f32 %v4321_v37, %v4221_v33  ;;  %v4217_v20 = vmul.f32 %v5464_v41, %v4200_v63  ;;  %v6578_v26 = vpop.f32.mrb[145].mxu0  ;;  %v4322_v18 = vmul.f32 %v5471_v56, %v4305_v34  ;;  %v6603_v47 = vpop.f32.mrb[159].mxu1  ;;  %v8548_v27 = vsel %vm4330_vm14, %v4325_v10, %v4339_v16  ;;  %6641 = vmatprep.mubr.msk.f32.mxu1 %vm7091_vm0, %v7092_v4  ;;  %v4736_v10 = vld [vmem:[%s8761_s0 + $0x40] sm:$0xff] }
0x113a   :  { %6619 = vmatmul.mubr.msk.f32.gmra.mrb[150].mxu0 %vm392_vm10, %v8548_v27  ;;  %v4459_v58 = vmul.f32 %v8548_v27, %v8548_v27  ;;  %v6914_v11 = vpack.c.bf16 %v4737_v7, %v4736_v10 }
0x113b   :  { %v4340_v8 = vmul.f32 %v8532_v6, %v4326_v19  ;;  %v4222_v31 = vadd.f32 %v4217_v20, %v4079_v43  ;;  %6621 = vmatprep.mubr.msk.f32.mxu0 %vm7091_vm0, %v7092_v4  ;;  %vm4331_vm15 = vcmp.ge.f32.partialorder %v4326_v19, 0.0 }
0x113c   :  { %v4205_v14 = vpop.f32.mrb[146].mxu0  ;;  %6642 = vmatmul.mubr.msk.f32.gmra.mrb[164].mxu1 %vm392_vm10, %v4459_v58  ;;  %v4310_v51 = vpop.f32.mrb[160].mxu1 }
0x113d   :  { %v4327_v48 = vadd.f32 %v4322_v18, %v4222_v31  ;;  %v4218_v22 = vmul.f32 %v5464_v41, %v4205_v14  ;;  %v4323_v61 = vmul.f32 %v5471_v56, %v4310_v51  ;;  %v8561_v54 = vsel %vm4331_vm15, %v4326_v19, %v4340_v8  ;;  %6644 = vmatprep.mubr.msk.f32.mxu1 %vm7091_vm0, %v7092_v4  ;;  %v6581_v9 = vpop.f32.mrb[147].mxu0  ;;  %v6606_v15 = vpop.f32.mrb[161].mxu1 }
0x113e   :  { %6622 = vmatmul.mubr.msk.f32.gmra.mrb[152].mxu0 %vm392_vm10, %v8561_v54  ;;  %v4460_v44 = vmul.f32 %v8561_v54, %v8561_v54  ;;  %6915 = vmatpush3.bf16.msra.mxu1 %v6914_v11 }
0x113f   :  { %v4341_v60 = vmul.f32 %v8532_v6, %v4327_v48  ;;  %v4223_v23 = vadd.f32 %v4218_v22, %v4080_v32  ;;  %6624 = vmatprep.mubr.msk.f32.mxu0 %vm7091_vm0, %v7092_v4  ;;  %vm4332_vm1 = vcmp.ge.f32.partialorder %v4327_v48, 0.0  ;;  %6919 = vmatprep.subr.bf16.mxu1 %v7090_v0 }
0x1140   :  { %6645 = vmatmul.mubr.msk.f32.gmra.mrb[166].mxu1 %vm392_vm10, %v4460_v44 }
0x1141   :  { %v4328_v41 = vadd.f32 %v4323_v61, %v4223_v23  ;;  %v8573_v56 = vsel %vm4332_vm1, %v4327_v48, %v4341_v60  ;;  %6647 = vmatprep.mubr.msk.f32.mxu1 %vm7091_vm0, %v7092_v4 }
0x1142   :  { %6625 = vmatmul.mubr.msk.f32.gmra.mrb[154].mxu0 %vm392_vm10, %v8573_v56  ;;  %v4461_v55 = vmul.f32 %v8573_v56, %v8573_v56 }
0x1143   :  { %v4342_v29 = vmul.f32 %v8532_v6, %v4328_v41  ;;  %6627 = vmatprep.mubr.msk.f32.mxu0 %vm7091_vm0, %v7092_v4  ;;  %vm4333_vm4 = vcmp.ge.f32.partialorder %v4328_v41, 0.0  ;;  %v3665_v6 = vld [vmem:[%s8761_s0 + $0x168] sm:$0xff] }
0x1144   :  { %6648 = vmatmul.mubr.msk.f32.gmra.mrb[168].mxu1 %vm392_vm10, %v4461_v55  ;;  %v6908_v35 = vpack.c.bf16 %v3666_v3, %v3665_v6 }
0x1145   :  { %v8585_v30 = vsel %vm4333_vm4, %v4328_v41, %v4342_v29  ;;  %6650 = vmatprep.mubr.msk.f32.mxu1 %vm7091_vm0, %v7092_v4 }
0x1146   :  { %6628 = vmatmul.mubr.msk.f32.gmra.mrb[156].mxu0 %vm392_vm10, %v8585_v30  ;;  %v4462_v50 = vmul.f32 %v8585_v30, %v8585_v30 }
0x1147   :  { %6661 = vmatprep.mubr.msk.f32.mxu0 %vm7091_vm0, %v7092_v4  ;;  %6909 = vmatpush3.bf16.msra.mxu0 %v6908_v35 }
0x1148   :  { %6651 = vmatmul.mubr.msk.f32.gmra.mrb[170].mxu1 %vm392_vm10, %v4462_v50  ;;  %6910 = vmatprep.subr.bf16.mxu0 %v7090_v0 }
0x1149   :  { %6680 = vmatprep.mubr.msk.f32.mxu1 %vm7091_vm0, %v7092_v4 }
0x114b   :  { %6912 = vmatpush3.bf16.msra.mxu0 %v6911_v52 }
0x114c   :  { %6916 = vmatprep.subr.bf16.mxu0 %v7090_v0 }
0x1209   :  { %v4429_v37 = vpop.f32.mrb[148].mxu0 }
0x120a   :  { %v4453_v42 = vmul.f32 0.03125, %v4429_v37  ;;  %v6617_v24 = vpop.f32.mrb[149].mxu0 }
0x120b   :  { %v4544_v16 = vpop.f32.mrb[162].mxu1 }
0x120c   :  { %v4573_v33 = vmul.f32 %v4453_v42, %v4453_v42  ;;  %v4568_v43 = vmul.f32 0.03125, %v4544_v16  ;;  %v6640_v63 = vpop.f32.mrb[163].mxu1 }
0x120d   :  { %v4434_v34 = vpop.f32.mrb[150].mxu0 }
0x120e   :  { %v4578_v19 = vsub.f32 %v4568_v43, %v4573_v33  ;;  %v4454_v20 = vmul.f32 0.03125, %v4434_v34  ;;  %v6620_v26 = vpop.f32.mrb[151].mxu0  ;;  %v4588_v34 = vsub.f32 %v8537_v17, %v4453_v42 }
0x120f   :  { %v4549_v18 = vpop.f32.mrb[164].mxu1  ;;  %v5483_v26 = vld [vmem:[%s8761_s0 + $0x158] ss:$0 sm:$0xff] }
0x1210   :  { %v4583_v47 = vmax.f32 %v4578_v19, 0.0  ;;  %v4574_v58 = vmul.f32 %v4454_v20, %v4454_v20  ;;  %v4569_v8 = vmul.f32 0.03125, %v4549_v18  ;;  %v6643_v31 = vpop.f32.mrb[165].mxu1 }
0x1211   :  { %v4439_v32 = vpop.f32.mrb[152].mxu0  ;;  %v5484_v31 = vld [vmem:[%s8761_s0 + $0x160] ss:$0 sm:$0xff] }
0x1212   :  { %v4593_v14 = vadd.f32 1e-05, %v4583_v47  ;;  %v4579_v51 = vsub.f32 %v4569_v8, %v4574_v58  ;;  %v4455_v48 = vmul.f32 0.03125, %v4439_v32  ;;  %v6623_v22 = vpop.f32.mrb[153].mxu0 }
0x1213   :  { %v4554_v61 = vpop.f32.mrb[166].mxu1 }
0x1214   :  { %7040 = vrsqrt.f32 %v4593_v14  ;;  %v4584_v9 = vmax.f32 %v4579_v51, 0.0  ;;  %v4575_v15 = vmul.f32 %v4455_v48, %v4455_v48  ;;  %v6646_v44 = vpop.f32.mrb[167].mxu1  ;;  %v4570_v60 = vmul.f32 0.03125, %v4554_v61 }
0x1215   :  { %v4444_v23 = vpop.f32.mrb[154].mxu0  ;;  %v4589_v14 = vsub.f32 %v8548_v27, %v4454_v20 }
0x1216   :  { %v4594_v41 = vadd.f32 1e-05, %v4584_v9  ;;  %v4456_v55 = vmul.f32 0.03125, %v4444_v23  ;;  %v6626_v29 = vpop.f32.mrb[155].mxu0  ;;  %v4580_v50 = vsub.f32 %v4570_v60, %v4575_v15  ;;  %v4590_v9 = vsub.f32 %v8561_v54, %v4455_v48 }
0x1217   :  { %v4559_v6 = vpop.f32.mrb[168].mxu1 }
0x1218   :  { %7042 = vrsqrt.f32 %v4594_v41  ;;  %v4576_v3 = vmul.f32 %v4456_v55, %v4456_v55  ;;  %v4571_v35 = vmul.f32 0.03125, %v4559_v6  ;;  %v6649_v49 = vpop.f32.mrb[169].mxu1  ;;  %v4585_v13 = vmax.f32 %v4580_v50, 0.0 }
0x1219   :  { %v4449_v52 = vpop.f32.mrb[156].mxu0  ;;  %v4591_v23 = vsub.f32 %v8573_v56, %v4456_v55 }
0x121a   :  { %v4581_v10 = vsub.f32 %v4571_v35, %v4576_v3  ;;  %v4457_v7 = vmul.f32 0.03125, %v4449_v52  ;;  %v6629_v11 = vpop.f32.mrb[157].mxu0  ;;  %v4595_v37 = vadd.f32 1e-05, %v4585_v13 }
0x121b   :  { %v4564_v24 = vpop.f32.mrb[170].mxu1 }
0x121c   :  { %v4586_v16 = vmax.f32 %v4581_v10, 0.0  ;;  %v4577_v33 = vmul.f32 %v4457_v7, %v4457_v7  ;;  %v4572_v43 = vmul.f32 0.03125, %v4564_v24  ;;  %v6652_v63 = vpop.f32.mrb[171].mxu1  ;;  %7044 = vrsqrt.f32 %v4595_v37 }
0x121d   :  { %v4592_v50 = vsub.f32 %v8585_v30, %v4457_v7 }
0x121e   :  { %v7041_v19 = vpop.eup %7040  ;;  %v4596_v18 = vadd.f32 1e-05, %v4586_v16  ;;  %v4582_v47 = vsub.f32 %v4572_v43, %v4577_v33 }
0x121f   :  { %v4603_v58 = vmul.f32 %v7041_v19, %v4588_v34 }
0x1220   :  { %7046 = vrsqrt.f32 %v4596_v18  ;;  %v4587_v8 = vmax.f32 %v4582_v47, 0.0 }
0x1221   :  { %v4612_v32 = vmul.f32 %v5483_v26, %v4603_v58 }
0x1222   :  { %v7043_v51 = vpop.eup %7042  ;;  %v4597_v17 = vadd.f32 1e-05, %v4587_v8 }
0x1223   :  { %v4621_v42 = vadd.f32 %v5484_v31, %v4612_v32  ;;  %v4604_v22 = vmul.f32 %v7043_v51, %v4589_v14 }
0x1224   :  { %7048 = vrsqrt.f32 %v4597_v17 }
0x1225   :  { %6662 = vmatmul.mubr.msk.f32.vlgmr.msra.gmra.mrb[158].mxu0 %vm392_vm10, %v4621_v42  ;;  %v4613_v61 = vmul.f32 %v5483_v26, %v4604_v22 }
0x1226   :  { %6664 = vmatprep.mubr.msk.f32.mxu0 %vm7091_vm0, %v7092_v4  ;;  %v7045_v15 = vpop.eup %7044 }
0x1227   :  { %v4622_v44 = vadd.f32 %v5484_v31, %v4613_v61  ;;  %v4605_v60 = vmul.f32 %v7045_v15, %v4590_v9 }
0x1229   :  { %6665 = vmatmul.mubr.msk.f32.gmra.mrb[160].mxu0 %vm392_vm10, %v4622_v44  ;;  %v4614_v20 = vmul.f32 %v5483_v26, %v4605_v60 }
0x122a   :  { %v7047_v27 = vpop.eup %7046  ;;  %6667 = vmatprep.mubr.msk.f32.mxu0 %vm7091_vm0, %v7092_v4 }
0x122b   :  { %v4606_v41 = vmul.f32 %v7047_v27, %v4591_v23  ;;  %v4623_v29 = vadd.f32 %v5484_v31, %v4614_v20 }
0x122d   :  { %v4615_v54 = vmul.f32 %v5483_v26, %v4606_v41  ;;  %6668 = vmatmul.mubr.msk.f32.gmra.mrb[162].mxu0 %vm392_vm10, %v4623_v29 }
0x122e   :  { %v7049_v48 = vpop.eup %7048  ;;  %6670 = vmatprep.mubr.msk.f32.mxu0 %vm7091_vm0, %v7092_v4 }
0x122f   :  { %v4624_v6 = vadd.f32 %v5484_v31, %v4615_v54  ;;  %v4607_v56 = vmul.f32 %v7049_v48, %v4592_v50 }
0x1231   :  { %v4616_v55 = vmul.f32 %v5483_v26, %v4607_v56  ;;  %6671 = vmatmul.mubr.msk.f32.gmra.mrb[164].mxu0 %vm392_vm10, %v4624_v6 }
0x1232   :  { %6673 = vmatprep.mubr.msk.f32.mxu0 %vm7091_vm0, %v7092_v4 }
0x1233   :  { %v4625_v3 = vadd.f32 %v5484_v31, %v4616_v55 }
0x1235   :  { %6674 = vmatmul.mubr.msk.f32.gmra.mrb[166].mxu0 %vm392_vm10, %v4625_v3 }
0x1236   :  { %6699 = vmatprep.mubr.msk.f32.mxu0 %vm7091_vm0, %v7092_v4 }
0x12f8   :  { %v4707_v30 = vpop.f32.mrb[158].mxu0 }
0x12f9   :  { %v4731_v35 = vadd.f32 %v4707_v30, %v8335_v36  ;;  %v6663_v49 = vpop.f32.mrb[159].mxu0 }
0x12fb   :  { %6681 = vmatmul.mubr.msk.f32.vlgmr.msra.gmra.mrb[172].mxu1 %vm1470_vm11, %v4731_v35 }
0x12fc   :  { %v4712_v13 = vpop.f32.mrb[160].mxu0  ;;  %6683 = vmatprep.mubr.msk.f32.mxu1 %vm7091_vm0, %v7092_v4 }
0x12fd   :  { %v4732_v52 = vadd.f32 %v4712_v13, %v8343_v45  ;;  %v6666_v10 = vpop.f32.mrb[161].mxu0 }
0x12ff   :  { %6684 = vmatmul.mubr.msk.f32.gmra.mrb[174].mxu1 %vm1470_vm11, %v4732_v52 }
0x1300   :  { %6686 = vmatprep.mubr.msk.f32.mxu1 %vm7091_vm0, %v7092_v4  ;;  %v4717_v7 = vpop.f32.mrb[162].mxu0 }
0x1301   :  { %v4733_v11 = vadd.f32 %v4717_v7, %v8353_v46  ;;  %v6669_v37 = vpop.f32.mrb[163].mxu0  ;;  %v4883_v46 = vld [vmem:[%s8761_s0 + $0x50] sm:$0xff] }
0x1303   :  { %6687 = vmatmul.mubr.msk.f32.gmra.mrb[176].mxu1 %vm1470_vm11, %v4733_v11  ;;  %v5023_v11 = vld [vmem:[%s8761_s0 + $0x78] sm:$0xff] }
0x1304   :  { %v4722_v36 = vpop.f32.mrb[164].mxu0  ;;  %6689 = vmatprep.mubr.msk.f32.mxu1 %vm7091_vm0, %v7092_v4 }
0x1305   :  { %v4734_v24 = vadd.f32 %v4722_v36, %v8360_v25  ;;  %v6672_v16 = vpop.f32.mrb[165].mxu0  ;;  %v4884_v25 = vld [vmem:[%s8761_s0 + $0x58] sm:$0xff] }
0x1306   :  { %v6917_v63 = vpack.c.bf16 %v4884_v25, %v4883_v46 }
0x1307   :  { %6690 = vmatmul.mubr.msk.f32.gmra.mrb[178].mxu1 %vm1470_vm11, %v4734_v24 }
0x1308   :  { %v4727_v45 = vpop.f32.mrb[166].mxu0  ;;  %6692 = vmatprep.mubr.msk.f32.mxu1 %vm7091_vm0, %v7092_v4  ;;  %6918 = vmatpush3.bf16.msra.mxu0 %v6917_v63 }
0x1309   :  { %v4735_v33 = vadd.f32 %v4727_v45, %v8367_v38  ;;  %v6675_v43 = vpop.f32.mrb[167].mxu0  ;;  %6925 = vmatprep.subr.bf16.mxu0 %v7090_v0 }
0x130b   :  { %6693 = vmatmul.mubr.msk.f32.gmra.mrb[180].mxu1 %vm1470_vm11, %v4735_v33 }
0x130c   :  { %6722 = vmatprep.mubr.msk.f32.mxu1 %vm7091_vm0, %v7092_v4 }
0x13ce   :  { %v4819_v34 = vpop.f32.mrb[172].mxu1 }
0x13cf   :  { %v5495_v38 = vmul.f32 -1.442695, %v4819_v34  ;;  %v6682_v19 = vpop.f32.mrb[173].mxu1 }
0x13d1   :  { %7050 = vpow2.f32 %v5495_v38 }
0x13d2   :  { %v4824_v26 = vpop.f32.mrb[174].mxu1 }
0x13d3   :  { %v5496_v18 = vmul.f32 -1.442695, %v4824_v26  ;;  %v6685_v47 = vpop.f32.mrb[175].mxu1 }
0x13d5   :  { %7052 = vpow2.f32 %v5496_v18 }
0x13d6   :  { %v4829_v58 = vpop.f32.mrb[176].mxu1 }
0x13d7   :  { %v5497_v8 = vmul.f32 -1.442695, %v4829_v58  ;;  %v6688_v31 = vpop.f32.mrb[177].mxu1 }
0x13d9   :  { %7054 = vpow2.f32 %v5497_v8 }
0x13da   :  { %v4834_v14 = vpop.f32.mrb[178].mxu1 }
0x13db   :  { %v7051_v32 = vpop.eup %7050  ;;  %v5498_v17 = vmul.f32 -1.442695, %v4834_v14  ;;  %v6691_v42 = vpop.f32.mrb[179].mxu1 }
0x13dc   :  { %v4858_v51 = vadd.f32 1.0, %v7051_v32 }
0x13de   :  { %7056 = vrcp.f32 %v4858_v51  ;;  %v4839_v61 = vpop.f32.mrb[180].mxu1 }
0x13df   :  { %v7053_v22 = vpop.eup %7052  ;;  %7058 = vpow2.f32 %v5498_v17  ;;  %v5499_v15 = vmul.f32 -1.442695, %v4839_v61  ;;  %v6694_v44 = vpop.f32.mrb[181].mxu1 }
0x13e0   :  { %v4859_v9 = vadd.f32 1.0, %v7053_v22 }
0x13e2   :  { %7060 = vrcp.f32 %v4859_v9 }
0x13e3   :  { %7062 = vpow2.f32 %v5499_v15  ;;  %v7055_v60 = vpop.eup %7054 }
0x13e4   :  { %v4860_v23 = vadd.f32 1.0, %v7055_v60 }
0x13e6   :  { %7064 = vrcp.f32 %v4860_v23 }
0x13e8   :  { %v7057_v27 = vpop.eup %7056 }
0x13e9   :  { %v7059_v20 = vpop.eup %7058  ;;  %v4873_v41 = vsub.f32 1.0, %v7057_v27 }
0x13ea   :  { %v4861_v29 = vadd.f32 1.0, %v7059_v20 }
0x13eb   :  { %v4878_v50 = vmul.f32 %v4873_v41, %v7493_v28 }
0x13ec   :  { %v7061_v54 = vpop.eup %7060  ;;  %7066 = vrcp.f32 %v4861_v29 }
0x13ed   :  { %v7063_v48 = vpop.eup %7062  ;;  %v4874_v6 = vsub.f32 1.0, %v7061_v54  ;;  %6700 = vmatmul.mubr.msk.f32.vlgmr.msra.gmra.mrb[168].mxu0 %vm1470_vm11, %v4878_v50 }
0x13ee   :  { %v4862_v56 = vadd.f32 1.0, %v7063_v48  ;;  %6702 = vmatprep.mubr.msk.f32.mxu0 %vm7091_vm0, %v7092_v4 }
0x13ef   :  { %v4879_v55 = vmul.f32 %v4874_v6, %v7495_v40 }
0x13f0   :  { %7068 = vrcp.f32 %v4862_v56  ;;  %v7065_v3 = vpop.eup %7064 }
0x13f1   :  { %6703 = vmatmul.mubr.msk.f32.gmra.mrb[170].mxu0 %vm1470_vm11, %v4879_v55  ;;  %v4875_v30 = vsub.f32 1.0, %v7065_v3 }
0x13f2   :  { %6705 = vmatprep.mubr.msk.f32.mxu0 %vm7091_vm0, %v7092_v4 }
0x13f3   :  { %v4880_v28 = vmul.f32 %v4875_v30, %v7497_v62  ;;  %v5020_v62 = vld [vmem:[%s8761_s0 + $0x60] sm:$0xff] }
0x13f5   :  { %6706 = vmatmul.mubr.msk.f32.gmra.mrb[172].mxu0 %vm1470_vm11, %v4880_v28 }
0x13f6   :  { %v7067_v35 = vpop.eup %7066  ;;  %6708 = vmatprep.mubr.msk.f32.mxu0 %vm7091_vm0, %v7092_v4 }
0x13f7   :  { %v4876_v49 = vsub.f32 1.0, %v7067_v35 }
0x13f9   :  { %v4881_v13 = vmul.f32 %v4876_v49, %v7499_v2  ;;  %v5021_v2 = vld [vmem:[%s8761_s0 + $0x68] sm:$0xff] }
0x13fa   :  { %v7069_v40 = vpop.eup %7068  ;;  %v6920_v7 = vpack.c.bf16 %v5021_v2, %v5020_v62 }
0x13fb   :  { %v4877_v52 = vsub.f32 1.0, %v7069_v40  ;;  %6709 = vmatmul.mubr.msk.f32.gmra.mrb[174].mxu0 %vm1470_vm11, %v4881_v13 }
0x13fc   :  { %6711 = vmatprep.mubr.msk.f32.mxu0 %vm7091_vm0, %v7092_v4  ;;  %6921 = vmatpush3.bf16.msra.mxu1 %v6920_v7 }
0x13fd   :  { %v4882_v10 = vmul.f32 %v4877_v52, %v7501_v5  ;;  %6922 = vmatprep.subr.bf16.mxu1 %v7090_v0  ;;  %v5022_v5 = vld [vmem:[%s8761_s0 + $0x70] sm:$0xff]  ;;  %s7094_s0 = smov 124  }
0x13fe   :  { %v6923_v37 = vpack.c.bf16 %v5023_v11, %v5022_v5 }
0x13ff   :  { %6712 = vmatmul.mubr.msk.f32.gmra.mrb[176].mxu0 %vm1470_vm11, %v4882_v10 }
0x1400   :  { %6747 = vmatprep.mubr.msk.f32.mxu0 %vm7091_vm0, %v7092_v4  ;;  %6924 = vmatpush3.bf16.msra.mxu1 %v6923_v37  ;;  %v5269_v37 = vadd.s32 4294967279, %v7187_v21 }
0x14c0   :  { %v4966_v36 = vpop.f32.mrb[168].mxu0 }
0x14c1   :  { %v5505_v24 = vmul.f32 -1.442695, %v4966_v36  ;;  %v6701_v16 = vpop.f32.mrb[169].mxu0 }
0x14c3   :  { %7070 = vpow2.f32 %v5505_v24 }
0x14c4   :  { %v4971_v45 = vpop.f32.mrb[170].mxu0 }
0x14c5   :  { %v5506_v33 = vmul.f32 -1.442695, %v4971_v45  ;;  %v6704_v43 = vpop.f32.mrb[171].mxu0 }
0x14c7   :  { %7072 = vpow2.f32 %v5506_v33 }
0x14c8   :  { %v4976_v46 = vpop.f32.mrb[172].mxu0 }
0x14c9   :  { %v5507_v25 = vmul.f32 -1.442695, %v4976_v46  ;;  %v6707_v63 = vpop.f32.mrb[173].mxu0 }
0x14cb   :  { %7074 = vpow2.f32 %v5507_v25 }
0x14cd   :  { %v7071_v34 = vpop.eup %7070 }
0x14ce   :  { %v5005_v38 = vadd.f32 1.0, %v7071_v34  ;;  %v4981_v19 = vpop.f32.mrb[174].mxu0 }
0x14cf   :  { %v5508_v26 = vmul.f32 -1.442695, %v4981_v19  ;;  %v6710_v18 = vpop.f32.mrb[175].mxu0 }
0x14d0   :  { %7076 = vrcp.f32 %v5005_v38 }
0x14d1   :  { %v7073_v47 = vpop.eup %7072  ;;  %7078 = vpow2.f32 %v5508_v26 }
0x14d2   :  { %v5006_v58 = vadd.f32 1.0, %v7073_v47  ;;  %v4986_v8 = vpop.f32.mrb[176].mxu0 }
0x14d3   :  { %v5509_v31 = vmul.f32 -1.442695, %v4986_v8  ;;  %v6713_v32 = vpop.f32.mrb[177].mxu0 }
0x14d4   :  { %7080 = vrcp.f32 %v5006_v58 }
0x14d5   :  { %7082 = vpow2.f32 %v5509_v31  ;;  %v7075_v14 = vpop.eup %7074 }
0x14d6   :  { %v5007_v51 = vadd.f32 1.0, %v7075_v14 }
0x14d8   :  { %7084 = vrcp.f32 %v5007_v51 }
0x14da   :  { %v7077_v17 = vpop.eup %7076 }
0x14db   :  { %v7079_v42 = vpop.eup %7078  ;;  %6723 = vmatmul.mubr.msk.f32.vlgmr.msra.gmra.mrb[182].mxu1 %vm392_vm10, %v7077_v17 }
0x14dc   :  { %v5008_v22 = vadd.f32 1.0, %v7079_v42  ;;  %6725 = vmatprep.mubr.msk.f32.mxu1 %vm7091_vm0, %v7092_v4 }
0x14de   :  { %v7081_v61 = vpop.eup %7080  ;;  %7086 = vrcp.f32 %v5008_v22 }
0x14df   :  { %v7083_v9 = vpop.eup %7082  ;;  %6726 = vmatmul.mubr.msk.f32.gmra.mrb[184].mxu1 %vm392_vm10, %v7081_v61 }
0x14e0   :  { %v5009_v15 = vadd.f32 1.0, %v7083_v9  ;;  %6728 = vmatprep.mubr.msk.f32.mxu1 %vm7091_vm0, %v7092_v4 }
0x14e2   :  { %7088 = vrcp.f32 %v5009_v15  ;;  %v7085_v44 = vpop.eup %7084 }
0x14e3   :  { %6729 = vmatmul.mubr.msk.f32.gmra.mrb[186].mxu1 %vm392_vm10, %v7085_v44 }
0x14e4   :  { %6731 = vmatprep.mubr.msk.f32.mxu1 %vm7091_vm0, %v7092_v4 }
0x14e8   :  { %v7087_v60 = vpop.eup %7086 }
0x14e9   :  { %6732 = vmatmul.mubr.msk.f32.gmra.mrb[188].mxu1 %vm392_vm10, %v7087_v60 }
0x14ea   :  { %6734 = vmatprep.mubr.msk.f32.mxu1 %vm7091_vm0, %v7092_v4 }
0x14ec   :  { %v7089_v23 = vpop.eup %7088 }
0x14ed   :  { %6735 = vmatmul.mubr.msk.f32.gmra.mrb[190].mxu1 %vm392_vm10, %v7089_v23 }
0x15ae   :  { %v5105_v27 = vpop.f32.mrb[182].mxu1 }
0x15af   :  { %v6724_v20 = vpop.f32.mrb[183].mxu1 }
0x15b2   :  { %v5110_v41 = vpop.f32.mrb[184].mxu1 }
0x15b3   :  { %v6727_v29 = vpop.f32.mrb[185].mxu1  ;;  %v6960_v50 = vpack.i.bf16 %v5110_v41, %v5105_v27 }
0x15b5   :  { %6961 = vrot.lane.b32.xlu0 %v6960_v50, %s7094_s0 }
0x15b6   :  { %v5115_v54 = vpop.f32.mrb[186].mxu1 }
0x15b7   :  { %v6730_v48 = vpop.f32.mrb[187].mxu1 }
0x15bc   :  { %v5120_v6 = vpop.f32.mrb[188].mxu1 }
0x15bd   :  { %v6965_v56 = vpack.i.bf16 %v5120_v6, %v5115_v54  ;;  %v6733_v55 = vpop.f32.mrb[189].mxu1 }
0x15bf   :  { %6966 = vrot.lane.b32.xlu0 %v6965_v56, %s7094_s0 }
0x15c0   :  { %v5125_v3 = vpop.f32.mrb[190].mxu1 }
0x15c1   :  { %5142 = vrot.lane.b32.xlu1 %v5125_v3, %s7094_s0  ;;  %v6736_v30 = vpop.f32.mrb[191].mxu1 }
0x1627   :  { %v6962_v28 = vpop.permute.xlu0 %6961 }
0x1628   :  { %v6964_v35 = vunpack.i.h.bf16 %v6962_v28  ;;  %v6963_v49 = vunpack.i.l.bf16 %v6962_v28 }
0x162a   :  { %v6926_v13 = vpack.c.bf16 %v6964_v35, %v6963_v49 }
0x162c   :  { %6927 = vmatpush3.bf16.msra.mxu0 %v6926_v13 }
0x162d   :  { %6928 = vmatprep.subr.bf16.mxu0 %v7090_v0 }
0x1631   :  { %v6967_v40 = vpop.permute.xlu0 %6966 }
0x1632   :  { %v6969_v52 = vunpack.i.h.bf16 %v6967_v40  ;;  %v6968_v10 = vunpack.i.l.bf16 %v6967_v40 }
0x1633   :  { %v5143_v2 = vpop.permute.xlu1 %5142 }
0x1634   :  { %v6929_v62 = vpack.c.bf16 %v6969_v52, %v6968_v10 }
0x1636   :  { %6930 = vmatpush3.bf16.msra.mxu0 %v6929_v62 }
0x1637   :  { %6745 = vmatprep.subr.mxu0 %v7092_v4 }
0x163a   :  { %6746 = vmatpush3.msk.msra.mxu0 %vm81_vm2, %v5143_v2  ;;  %vm5242_vm2 = vcmp.lt.s32.totalorder %v7764_v53, 16 }
0x163b   :  { %6748 = vmatmul.mubr.msk.f32.vlgmr.msra.gmra.mrb[178].mxu0 %vm65_vm3, %v7774_v12 }
0x163c   :  { %6750 = vmatprep.mubr.msk.f32.mxu0 %vm7091_vm0, %v7092_v4 }
0x163f   :  { %6751 = vmatmul.mubr.msk.f32.gmra.mrb[180].mxu0 %vm65_vm3, %v7798_v59 }
0x1640   :  { %6753 = vmatprep.mubr.msk.f32.mxu0 %vm7091_vm0, %v7092_v4 }
0x1643   :  { %6754 = vmatmul.mubr.msk.f32.gmra.mrb[182].mxu0 %vm65_vm3, %v7820_v57 }
0x1644   :  { %6756 = vmatprep.mubr.msk.f32.mxu0 %vm7091_vm0, %v7092_v4 }
0x1647   :  { %6757 = vmatmul.mubr.msk.f32.gmra.mrb[184].mxu0 %vm65_vm3, %v7844_v39  ;;  %v5247_v39 = vsel %vm5242_vm2, %v5115_v54, 0.0 }
0x1648   :  { %6759 = vmatprep.mubr.msk.f32.mxu0 %vm7091_vm0, %v7092_v4  ;;  %vm5244_vm0 = vcmp.lt.s32.totalorder %v5269_v37, 16 }
0x1649   :  { %v5249_v45 = vsel %vm5244_vm0, %v5125_v3, 0.0 }
0x164b   :  { %6760 = vmatmul.mubr.msk.f32.gmra.mrb[186].mxu0 %vm65_vm3, %v7862_v1  ;;  %vm5259_vm3 = vcmask 25600  }
0x170e   :  { %v5216_v0 = vpop.f32.mrb[178].mxu0 }
0x170f   :  { %v5250_v12 = vadd.f32 %v5216_v0, %v5105_v27  ;;  %v6749_v59 = vpop.f32.mrb[179].mxu0 }
0x1711   :  { %5255 = vst.msk [vmem:[%s8763_s3] sm:$0xff] %vm175_vm9, %v5250_v12 }
0x1712   :  { %v5221_v57 = vpop.f32.mrb[180].mxu0 }
0x1713   :  { %v5251_v7 = vadd.f32 %v5221_v57, %v5110_v41  ;;  %v6752_v5 = vpop.f32.mrb[181].mxu0 }
0x1715   :  { %5256 = vst.msk [vmem:[%s8763_s3 + $0x8] sm:$0xff] %vm175_vm9, %v5251_v7 }
0x1716   :  { %v5226_v4 = vpop.f32.mrb[182].mxu0 }
0x1717   :  { %v5252_v1 = vadd.f32 %v5247_v39, %v5226_v4  ;;  %v6755_v11 = vpop.f32.mrb[183].mxu0 }
0x1719   :  { %5257 = vst.msk [vmem:[%s8763_s3 + $0x10] sm:$0xff] %vm175_vm9, %v5252_v1 }
0x171a   :  { %v5231_v36 = vpop.f32.mrb[184].mxu0 }
0x171b   :  { %v5253_v24 = vadd.f32 %v5231_v36, %v5120_v6  ;;  %v6758_v16 = vpop.f32.mrb[185].mxu0 }
0x171d   :  { %5258 = vst.msk [vmem:[%s8763_s3 + $0x18] sm:$0xff] %vm175_vm9, %v5253_v24 }
0x171e   :  { %v5236_v53 = vpop.f32.mrb[186].mxu0 }
0x171f   :  { %v5254_v33 = vadd.f32 %v5249_v45, %v5236_v53  ;;  %v6761_v43 = vpop.f32.mrb[187].mxu0 }
0x1721   :  { %5260 = vst.msk [vmem:[%s8763_s3 + $0x20] sm:$0x3] %vm5259_vm3, %v5254_v33 }

</bundles_post_ra>
